<compile_context>
chip_gen: v5e
topology: v5e:2x2
jax: 0.10.0
libtpu: 0.0.40
codegen_flags: <defaults>
</compile_context>

<pallas_src>
import jax
import jax.numpy as jnp
from jax.experimental import pallas as pl
from jax.experimental.pallas import tpu as pltpu

IN_DIM = 28 * 28            # 784
IN_PAD = 896                # 7 * 128 (zero-padded K for fc1)
H1, H2, H3, OUT = 1024, 512, 256, 10
OUT_PAD = 128               # lane-dense output block
NEG_BIG = -1e30             # pad bias -> exp underflows to 0 in softmax
TB_MAX = 512                # max batch tile (amortizes per-grid-step overhead)
MIN_SPLIT_B = 16            # split into >=2 grid steps (2 TCs on v7x) once B >= this


def _round_up(n, m):
    return ((n + m - 1) // m) * m


def _cdiv(a, b):
    return -(-a // b)


def _fc_net_kernel(x_ref,
                   w1_ref, b1_ref,
                   w2_ref, b2_ref,
                   w3_ref, b3_ref,
                   w4_ref, b4_ref,
                   o_ref):
    # Whole MLP hot path on one batch tile, all operands resident in VMEM.
    x = x_ref[...]                                                    # (TB, 896) bf16

    h1 = jnp.dot(x, w1_ref[...], preferred_element_type=jnp.float32) + b1_ref[...]
    h1 = jnp.maximum(h1, 0.0).astype(jnp.bfloat16)                    # relu(fc1)

    h2 = jnp.dot(h1, w2_ref[...], preferred_element_type=jnp.float32) + b2_ref[...]
    h2 = jnp.maximum(h2, 0.0).astype(jnp.bfloat16)                    # drop(relu(fc2)) -> eval dropout = id

    h3 = jnp.dot(h2, w3_ref[...], preferred_element_type=jnp.float32) + b3_ref[...]
    h3 = jnp.maximum(h3, 0.0).astype(jnp.bfloat16)                    # drop(relu(fc3)) -> eval dropout = id

    logits = jnp.dot(h3, w4_ref[...], preferred_element_type=jnp.float32) + b4_ref[...]
    # logits: (TB, 128) f32; lanes >= OUT carry bias -1e30 -> exp == 0.

    # softmax over dim=1; exact division so rows sum to 1 within f32 precision.
    m = jnp.max(logits, axis=1, keepdims=True)
    e = jnp.exp(logits - m)
    o_ref[...] = e / jnp.sum(e, axis=1, keepdims=True)


def _make_call(tb, b_pad):
    n_tiles = b_pad // tb

    # Advisory cost hint for XLA when this call is embedded in a larger graph.
    flops = 2 * b_pad * (IN_PAD * H1 + H1 * H2 + H2 * H3 + H3 * OUT_PAD)
    weight_bytes = 2 * (IN_PAD * H1 + H1 * H2 + H2 * H3 + H3 * OUT_PAD) \
                   + 4 * (H1 + H2 + H3 + OUT_PAD)
    bytes_accessed = weight_bytes + b_pad * (IN_PAD * 2 + OUT_PAD * 4)
    cost = pl.CostEstimate(flops=flops,
                           transcendentals=b_pad * OUT_PAD,
                           bytes_accessed=bytes_accessed)

    wspec = lambda shape: pl.BlockSpec(shape, lambda i: (0, 0))   # grid-invariant

    return pl.pallas_call(
        _fc_net_kernel,
        out_shape=jax.ShapeDtypeStruct((b_pad, OUT_PAD), jnp.float32),
        grid_spec=pltpu.PrefetchScalarGridSpec(
            num_scalar_prefetch=0,
            grid=(n_tiles,),
            in_specs=[
                pl.BlockSpec((tb, IN_PAD), lambda i: (i, 0)),   # x tile (bf16)
                wspec((IN_PAD, H1)), wspec((1, H1)),
                wspec((H1, H2)),     wspec((1, H2)),
                wspec((H2, H3)),     wspec((1, H3)),
                wspec((H3, OUT_PAD)), wspec((1, OUT_PAD)),
            ],
            out_specs=pl.BlockSpec((tb, OUT_PAD), lambda i: (i, 0)),
        ),
        compiler_params=pltpu.CompilerParams(
            dimension_semantics=("parallel",),   # batch axis shards across TCs
            vmem_limit_bytes=32 << 20,           # ~20 MiB footprint at TB=512
        ),
        cost_estimate=cost,
    )


def _select_tiles(B):
    """cdiv-based batch split: bounds per-tile padding to < 8 rows and keeps
    >= 2 grid steps when B is large enough (so v7x's 2nd TensorCore is used)."""
    n_tiles = _cdiv(B, TB_MAX)
    if B >= MIN_SPLIT_B:
        n_tiles = max(2, n_tiles)
    n_tiles = max(1, n_tiles)
    tb = _round_up(_cdiv(B, n_tiles), 8)
    b_pad = n_tiles * tb
    return tb, b_pad


def prepare_params(params):
    """One-time conversion to kernel layout: pad K/N, cast weights to bf16."""
    w1, b1, w2, b2, w3, b3, w4, b4 = params

    w1p = jnp.zeros((IN_PAD, H1), jnp.float32).at[:IN_DIM, :].set(w1)
    w4p = jnp.zeros((H3, OUT_PAD), jnp.float32).at[:, :OUT].set(w4)
    b4p = jnp.full((1, OUT_PAD), NEG_BIG, jnp.float32).at[:, :OUT].set(b4)

    return (w1p.astype(jnp.bfloat16), b1.astype(jnp.float32),
            w2.astype(jnp.bfloat16),  b2.astype(jnp.float32),
            w3.astype(jnp.bfloat16),  b3.astype(jnp.float32),
            w4p.astype(jnp.bfloat16), b4p)


def fc_net_forward(x_nchw, prepared_params):
    """x_nchw: float32 [B, 1, 28, 28] -> probabilities [B, 10]."""
    B = x_nchw.shape[0]
    if B == 0:
        return jnp.zeros((0, OUT), jnp.float32)

    tb, b_pad = _select_tiles(B)

    # Flatten, cast to bf16, and do K pad + batch pad in a single jnp.pad.
    x = x_nchw.reshape(B, IN_DIM).astype(jnp.bfloat16)
    x = jnp.pad(x, ((0, b_pad - B), (0, IN_PAD - IN_DIM)))

    out = _make_call(tb, b_pad)(x, *prepared_params)
    return out[:B, :OUT]


def init_params(key):
    """Deterministic synthetic parameters with nn.Linear shapes (stored transposed)."""
    ks = jax.random.split(key, 8)

    def linear(kw, kb, fan_in, fan_out):
        # U(-1/sqrt(fan_in), 1/sqrt(fan_in)), like torch.nn.Linear's default.
        bound = 1.0 / jnp.sqrt(fan_in)
        w = jax.random.uniform(kw, (fan_in, fan_out), jnp.float32, -bound, bound)
        b = jax.random.uniform(kb, (1, fan_out), jnp.float32, -bound, bound)
        return w, b

    w1, b1 = linear(ks[0], ks[1], IN_DIM, H1)
    w2, b2 = linear(ks[2], ks[3], H1, H2)
    w3, b3 = linear(ks[4], ks[5], H2, H3)
    w4, b4 = linear(ks[6], ks[7], H3, OUT)
    return (w1, b1, w2, b2, w3, b3, w4, b4)


def _reference(x_nchw, params):
    """Pure-JAX reference mirroring the kernel's bf16 GEMM / f32-accumulate numerics."""
    w1, b1, w2, b2, w3, b3, w4, b4 = params
    x = x_nchw.reshape(x_nchw.shape[0], -1)

    def lin(h, w, b):
        return jnp.dot(h.astype(jnp.bfloat16), w.astype(jnp.bfloat16),
                       preferred_element_type=jnp.float32) + b

    h = jnp.maximum(lin(x, w1, b1), 0.0)
    h = jnp.maximum(lin(h, w2, b2), 0.0)
    h = jnp.maximum(lin(h, w3, b3), 0.0)
    return jax.nn.softmax(lin(h, w4, b4), axis=1)


if __name__ == "__main__":
    key = jax.random.PRNGKey(0)
    kx, kp = jax.random.split(key)

    B = 8
    x = jax.random.normal(kx, (B, 1, 28, 28), jnp.float32)   # NCHW, MNIST-shaped
    params = init_params(kp)
    prepared = prepare_params(params)                        # one-time pad + bf16 cast

    out = fc_net_forward(x, prepared)
    out = jax.block_until_ready(out)

    ref = _reference(x, params)
    assert out.shape == (B, OUT)
    # bf16 GEMMs => relaxed tolerance vs. the f32 reference.
    assert jnp.allclose(out, ref, atol=2e-3, rtol=2e-3), "mismatch vs reference"
    assert jnp.allclose(jnp.sum(out, axis=1), jnp.ones((B,)), atol=2e-3)

    print("KERNEL_OK")
</pallas_src>

<mosaic_0001>
module attributes {stable_mosaic.version = 11 : i64} {
  func.func @_fc_net_kernel(%arg0: i32, %arg1: memref<8x896xbf16, #tpu.memory_space<vmem>>, %arg2: memref<896x1024xbf16, #tpu.memory_space<vmem>>, %arg3: memref<1x1024xf32, #tpu.memory_space<vmem>>, %arg4: memref<1024x512xbf16, #tpu.memory_space<vmem>>, %arg5: memref<1x512xf32, #tpu.memory_space<vmem>>, %arg6: memref<512x256xbf16, #tpu.memory_space<vmem>>, %arg7: memref<1x256xf32, #tpu.memory_space<vmem>>, %arg8: memref<256x128xbf16, #tpu.memory_space<vmem>>, %arg9: memref<1x128xf32, #tpu.memory_space<vmem>>, %arg10: memref<8x128xf32, #tpu.memory_space<vmem>>) attributes {dimension_semantics = [#tpu.dimension_semantics<parallel>], iteration_bounds = array<i64: 1>, scalar_prefetch = 0 : i64, scratch_operands = 0 : i64, tpu.core_type = #tpu.core_type<tc>, window_params = [{transform_indices = @transform_0, window_bounds = array<i64: 8, 896>}, {pipeline_mode = #tpu.pipeline_mode<synchronous>, transform_indices = @transform_1, window_bounds = array<i64: 896, 1024>}, {pipeline_mode = #tpu.pipeline_mode<synchronous>, transform_indices = @transform_2, window_bounds = array<i64: 1, 1024>}, {pipeline_mode = #tpu.pipeline_mode<synchronous>, transform_indices = @transform_3, window_bounds = array<i64: 1024, 512>}, {pipeline_mode = #tpu.pipeline_mode<synchronous>, transform_indices = @transform_4, window_bounds = array<i64: 1, 512>}, {pipeline_mode = #tpu.pipeline_mode<synchronous>, transform_indices = @transform_5, window_bounds = array<i64: 512, 256>}, {pipeline_mode = #tpu.pipeline_mode<synchronous>, transform_indices = @transform_6, window_bounds = array<i64: 1, 256>}, {pipeline_mode = #tpu.pipeline_mode<synchronous>, transform_indices = @transform_7, window_bounds = array<i64: 256, 128>}, {pipeline_mode = #tpu.pipeline_mode<synchronous>, transform_indices = @transform_8, window_bounds = array<i64: 1, 128>}, {transform_indices = @transform_9, window_bounds = array<i64: 8, 128>}]} {
    %c0 = arith.constant 0 : index
    %c0_0 = arith.constant 0 : index
    %0 = vector.load %arg1[%c0, %c0_0] : memref<8x896xbf16, #tpu.memory_space<vmem>>, vector<8x896xbf16>
    %c0_1 = arith.constant 0 : index
    %c0_2 = arith.constant 0 : index
    %1 = vector.load %arg2[%c0_1, %c0_2] : memref<896x1024xbf16, #tpu.memory_space<vmem>>, vector<896x1024xbf16>
    %cst = arith.constant dense<0.000000e+00> : vector<8x1024xf32>
    %2 = tpu.matmul %0, %1, %cst {dimension_numbers = #tpu.dot_dimension_numbers<[1], [0], [0], [1], [0, 0, 1, 1], [], []>} : vector<8x896xbf16>, vector<896x1024xbf16>, vector<8x1024xf32> -> vector<8x1024xf32>
    %c0_3 = arith.constant 0 : index
    %c0_4 = arith.constant 0 : index
    %3 = vector.load %arg3[%c0_3, %c0_4] : memref<1x1024xf32, #tpu.memory_space<vmem>>, vector<1x1024xf32>
    %4 = vector.broadcast %3 : vector<1x1024xf32> to vector<8x1024xf32>
    %5 = arith.addf %2, %4 : vector<8x1024xf32>
    %cst_5 = arith.constant 0.000000e+00 : f32
    %6 = vector.broadcast %cst_5 : f32 to vector<8x1024xf32>
    %7 = arith.maximumf %5, %6 : vector<8x1024xf32>
    %8 = arith.truncf %7 : vector<8x1024xf32> to vector<8x1024xbf16>
    %c0_6 = arith.constant 0 : index
    %c0_7 = arith.constant 0 : index
    %9 = vector.load %arg4[%c0_6, %c0_7] : memref<1024x512xbf16, #tpu.memory_space<vmem>>, vector<1024x512xbf16>
    %cst_8 = arith.constant dense<0.000000e+00> : vector<8x512xf32>
    %10 = tpu.matmul %8, %9, %cst_8 {dimension_numbers = #tpu.dot_dimension_numbers<[1], [0], [0], [1], [0, 0, 1, 1], [], []>} : vector<8x1024xbf16>, vector<1024x512xbf16>, vector<8x512xf32> -> vector<8x512xf32>
    %c0_9 = arith.constant 0 : index
    %c0_10 = arith.constant 0 : index
    %11 = vector.load %arg5[%c0_9, %c0_10] : memref<1x512xf32, #tpu.memory_space<vmem>>, vector<1x512xf32>
    %12 = vector.broadcast %11 : vector<1x512xf32> to vector<8x512xf32>
    %13 = arith.addf %10, %12 : vector<8x512xf32>
    %cst_11 = arith.constant 0.000000e+00 : f32
    %14 = vector.broadcast %cst_11 : f32 to vector<8x512xf32>
    %15 = arith.maximumf %13, %14 : vector<8x512xf32>
    %16 = arith.truncf %15 : vector<8x512xf32> to vector<8x512xbf16>
    %c0_12 = arith.constant 0 : index
    %c0_13 = arith.constant 0 : index
    %17 = vector.load %arg6[%c0_12, %c0_13] : memref<512x256xbf16, #tpu.memory_space<vmem>>, vector<512x256xbf16>
    %cst_14 = arith.constant dense<0.000000e+00> : vector<8x256xf32>
    %18 = tpu.matmul %16, %17, %cst_14 {dimension_numbers = #tpu.dot_dimension_numbers<[1], [0], [0], [1], [0, 0, 1, 1], [], []>} : vector<8x512xbf16>, vector<512x256xbf16>, vector<8x256xf32> -> vector<8x256xf32>
    %c0_15 = arith.constant 0 : index
    %c0_16 = arith.constant 0 : index
    %19 = vector.load %arg7[%c0_15, %c0_16] : memref<1x256xf32, #tpu.memory_space<vmem>>, vector<1x256xf32>
    %20 = vector.broadcast %19 : vector<1x256xf32> to vector<8x256xf32>
    %21 = arith.addf %18, %20 : vector<8x256xf32>
    %cst_17 = arith.constant 0.000000e+00 : f32
    %22 = vector.broadcast %cst_17 : f32 to vector<8x256xf32>
    %23 = arith.maximumf %21, %22 : vector<8x256xf32>
    %24 = arith.truncf %23 : vector<8x256xf32> to vector<8x256xbf16>
    %c0_18 = arith.constant 0 : index
    %c0_19 = arith.constant 0 : index
    %25 = vector.load %arg8[%c0_18, %c0_19] : memref<256x128xbf16, #tpu.memory_space<vmem>>, vector<256x128xbf16>
    %cst_20 = arith.constant dense<0.000000e+00> : vector<8x128xf32>
    %26 = tpu.matmul %24, %25, %cst_20 {dimension_numbers = #tpu.dot_dimension_numbers<[1], [0], [0], [1], [0, 0, 1, 1], [], []>} : vector<8x256xbf16>, vector<256x128xbf16>, vector<8x128xf32> -> vector<8x128xf32>
    %c0_21 = arith.constant 0 : index
    %c0_22 = arith.constant 0 : index
    %27 = vector.load %arg9[%c0_21, %c0_22] : memref<1x128xf32, #tpu.memory_space<vmem>>, vector<1x128xf32>
    %28 = vector.broadcast %27 : vector<1x128xf32> to vector<8x128xf32>
    %29 = arith.addf %26, %28 : vector<8x128xf32>
    %cst_23 = arith.constant dense<0xFF800000> : vector<8xf32>
    %30 = vector.multi_reduction <maximumf>, %29, %cst_23 [1] : vector<8x128xf32> to vector<8xf32>
    %31 = vector.shape_cast %30 : vector<8xf32> to vector<8x1xf32>
    %32 = vector.broadcast %31 : vector<8x1xf32> to vector<8x128xf32>
    %33 = arith.subf %29, %32 : vector<8x128xf32>
    %34 = math.exp %33 : vector<8x128xf32>
    %cst_24 = arith.constant dense<0.000000e+00> : vector<8xf32>
    %35 = vector.multi_reduction <add>, %34, %cst_24 [1] : vector<8x128xf32> to vector<8xf32>
    %36 = vector.shape_cast %35 : vector<8xf32> to vector<8x1xf32>
    %37 = vector.broadcast %36 : vector<8x1xf32> to vector<8x128xf32>
    %38 = arith.divf %34, %37 : vector<8x128xf32>
    %c0_25 = arith.constant 0 : index
    %c0_26 = arith.constant 0 : index
    %39 = vector.load %arg10[%c0_25, %c0_26] : memref<8x128xf32, #tpu.memory_space<vmem>>, vector<8x128xf32>
    tpu.vector_store %arg10[%c0_25, %c0_26], %38 {strides = array<i32>} : memref<8x128xf32, #tpu.memory_space<vmem>>, vector<8x128xf32>,
    return
  }
  func.func @transform_0(%arg0: i32) -> (i32, i32) {
    %c0_i32 = arith.constant 0 : i32
    %c0_i32_0 = arith.constant 0 : i32
    return %arg0, %c0_i32 : i32, i32
  }
  func.func @transform_1(%arg0: i32) -> (i32, i32) {
    %c0_i32 = arith.constant 0 : i32
    %c0_i32_0 = arith.constant 0 : i32
    %c0_i32_1 = arith.constant 0 : i32
    return %c0_i32, %c0_i32_0 : i32, i32
  }
  func.func @transform_2(%arg0: i32) -> (i32, i32) {
    %c0_i32 = arith.constant 0 : i32
    %c0_i32_0 = arith.constant 0 : i32
    %c0_i32_1 = arith.constant 0 : i32
    return %c0_i32, %c0_i32_0 : i32, i32
  }
  func.func @transform_3(%arg0: i32) -> (i32, i32) {
    %c0_i32 = arith.constant 0 : i32
    %c0_i32_0 = arith.constant 0 : i32
    %c0_i32_1 = arith.constant 0 : i32
    return %c0_i32, %c0_i32_0 : i32, i32
  }
  func.func @transform_4(%arg0: i32) -> (i32, i32) {
    %c0_i32 = arith.constant 0 : i32
    %c0_i32_0 = arith.constant 0 : i32
    %c0_i32_1 = arith.constant 0 : i32
    return %c0_i32, %c0_i32_0 : i32, i32
  }
  func.func @transform_5(%arg0: i32) -> (i32, i32) {
    %c0_i32 = arith.constant 0 : i32
    %c0_i32_0 = arith.constant 0 : i32
    %c0_i32_1 = arith.constant 0 : i32
    return %c0_i32, %c0_i32_0 : i32, i32
  }
  func.func @transform_6(%arg0: i32) -> (i32, i32) {
    %c0_i32 = arith.constant 0 : i32
    %c0_i32_0 = arith.constant 0 : i32
    %c0_i32_1 = arith.constant 0 : i32
    return %c0_i32, %c0_i32_0 : i32, i32
  }
  func.func @transform_7(%arg0: i32) -> (i32, i32) {
    %c0_i32 = arith.constant 0 : i32
    %c0_i32_0 = arith.constant 0 : i32
    %c0_i32_1 = arith.constant 0 : i32
    return %c0_i32, %c0_i32_0 : i32, i32
  }
  func.func @transform_8(%arg0: i32) -> (i32, i32) {
    %c0_i32 = arith.constant 0 : i32
    %c0_i32_0 = arith.constant 0 : i32
    %c0_i32_1 = arith.constant 0 : i32
    return %c0_i32, %c0_i32_0 : i32, i32
  }
  func.func @transform_9(%arg0: i32) -> (i32, i32) {
    %c0_i32 = arith.constant 0 : i32
    %c0_i32_0 = arith.constant 0 : i32
    return %arg0, %c0_i32 : i32, i32
  }
}

</mosaic_0001>

<bundles_post_ra>
// kernel: tpu_custom_call.1
= control target key start
LH: loop header
LB: loop body
LE: loop exit
PB: predicated region body
PF: predicated region fallthrough
CT: control target
= control target key end

     0   :  { %14 = vsyncpa [#allocation3], 0  ;;  %s10874_s0 = inlined_call_operand.hbm [shape: bf16[8,896], index: 0, kind: input, shape index: {}]   ;;  %s10875_s1 = inlined_call_operand.hbm [shape: bf16[896,1024], index: 1, kind: input, shape index: {}]   ;;  %s10876_s2 = inlined_call_operand.hbm [shape: f32[1,1024], index: 2, kind: input, shape index: {}]   ;;  %s10877_s3 = inlined_call_operand.hbm [shape: bf16[1024,512], index: 3, kind: input, shape index: {}]   ;;  %s10878_s4 = inlined_call_operand.hbm [shape: f32[1,512], index: 4, kind: input, shape index: {}]   ;;  %s10879_s5 = inlined_call_operand.hbm [shape: bf16[512,256], index: 5, kind: input, shape index: {}]   ;;  %s10880_s6 = inlined_call_operand.hbm [shape: f32[1,256], index: 6, kind: input, shape index: {}]   ;;  %s10881_s7 = inlined_call_operand.hbm [shape: bf16[256,128], index: 7, kind: input, shape index: {}]   ;;  %s10882_s8 = inlined_call_operand.hbm [shape: f32[1,128], index: 8, kind: input, shape index: {}]   ;;  %s10883_s9 = inlined_call_operand.hbm [shape: f32[8,128], index: 9, kind: output, shape index: {}]  }
   0x1   :  { %15 = vsyncpa [#allocation6], 0 }
   0x2   :  { %16 = vsyncpa [#allocation9], 0 }
   0x3   :  { %17 = vsyncpa [#allocation12], 0 }
   0x4   :  { %18 = vsyncpa [#allocation15], 0  ;;  %s35_s11 = sshll.u32 %s10875_s1, 4  ;;  %s36_s11 = int_to_ptr.hbm [resolvable:$true] %s35_s11 }
   0x5   :  { %19 = vsyncpa [#allocation4], 0  ;;  %s10510_s12 = smov [#allocation5]   ;;  %s59_s16 = sshll.u32 %s10877_s3, 4  ;;  %s60_s16 = int_to_ptr.hbm [resolvable:$true] %s59_s16 }
   0x6   :  { %s37_s13 = sshll.u32 %s10510_s12, 4  ;;  %s10511_s17 = smov 512   ;;  %s38_s13 = int_to_ptr.vmem [resolvable:$true] %s37_s13 }
   0x7   :  { %s10512_s18 = smov 32   ;;  %s10513_s19 = smov [#allocation8]  }
   0x8   :  { %43 = dma.hbm_to_vmem [thread:$0]  %s36_s11, 57344, %s38_s13, [#allocation6], %s10511_s17, %s10511_s17, %s10512_s18  }
   0x9   :  { %s61_s20 = sshll.u32 %s10513_s19, 4  ;;  %s10514_s21 = smov 256   ;;  %s62_s20 = int_to_ptr.vmem [resolvable:$true] %s61_s20 }
   0xa   :  { %s10515_s22 = smov 16   ;;  %s83_s24 = sshll.u32 %s10879_s5, 4  ;;  %s84_s24 = int_to_ptr.hbm [resolvable:$true] %s83_s24 }
   0xb   :  { %67 = dma.hbm_to_vmem [thread:$0]  %s60_s16, 32768, %s62_s20, [#allocation9], %s10514_s21, %s10514_s21, %s10515_s22  }
   0xc   :  { %s10516_s25 = smov [#allocation11]   ;;  %s107_s28 = sshll.u32 %s10881_s7, 4  ;;  %s108_s28 = int_to_ptr.hbm [resolvable:$true] %s107_s28 }
   0xd   :  { %s85_s26 = sshll.u32 %s10516_s25, 4  ;;  %s10517_s29 = smov 128   ;;  %s86_s26 = int_to_ptr.vmem [resolvable:$true] %s85_s26 }
   0xe   :  { %s10518_s30 = smov 8   ;;  %s10519_s10 = smov [#allocation14]  }
   0xf   :  { %91 = dma.hbm_to_vmem [thread:$0]  %s84_s24, 8192, %s86_s26, [#allocation12], %s10517_s29, %s10517_s29, %s10518_s30  }
  0x10   :  { %s109_s11 = sshll.u32 %s10519_s10, 4  ;;  %s10520_s12 = smov 64   ;;  %s110_s11 = int_to_ptr.vmem [resolvable:$true] %s109_s11 }
  0x11   :  { %s10521_s13 = smov 4   ;;  %s25_s15 = sshll.u32 %s10874_s0, 4  ;;  %s26_s15 = int_to_ptr.hbm [resolvable:$true] %s25_s15 }
  0x12   :  { %115 = dma.hbm_to_vmem [thread:$0]  %s108_s28, 2048, %s110_s11, [#allocation15], %s10520_s12, %s10520_s12, %s10521_s13  }
  0x13   :  { %s10522_s16 = smov [#allocation2]   ;;  %s49_s19 = sshll.u32 %s10876_s2, 4  ;;  %s50_s19 = int_to_ptr.hbm [resolvable:$true] %s49_s19 }
  0x14   :  { %s27_s17 = sshll.u32 %s10522_s16, 4  ;;  %s10523_s20 = smov [#allocation7]   ;;  %s28_s17 = int_to_ptr.vmem [resolvable:$true] %s27_s17 }
  0x15   :  { %30 = dma.hbm_to_vmem [thread:$0]  %s26_s15, 448, %s28_s17, [#allocation3]  }
  0x16   :  { %s51_s21 = sshll.u32 %s10523_s20, 4  ;;  %s73_s23 = sshll.u32 %s10878_s4, 4  ;;  %s52_s21 = int_to_ptr.vmem [resolvable:$true] %s51_s21  ;;  %s74_s23 = int_to_ptr.hbm [resolvable:$true] %s73_s23 }
  0x17   :  { %54 = dma.hbm_to_vmem [thread:$0]  %s50_s19, 128, %s52_s21, [#allocation6]  }
  0x18   :  { %s97_s25 = sshll.u32 %s10880_s6, 4  ;;  %s10524_s26 = smov [#allocation10]   ;;  %s98_s25 = int_to_ptr.hbm [resolvable:$true] %s97_s25 }
  0x19   :  { %s75_s27 = sshll.u32 %s10524_s26, 4  ;;  %s10525_s2 = smov [#allocation13]   ;;  %s76_s27 = int_to_ptr.vmem [resolvable:$true] %s75_s27 }
  0x1a   :  { %78 = dma.hbm_to_vmem [thread:$0]  %s74_s23, 64, %s76_s27, [#allocation9]  }
  0x1b   :  { %s99_s3 = sshll.u32 %s10525_s2, 4  ;;  %s121_s30 = sshll.u32 %s10882_s8, 4  ;;  %s100_s3 = int_to_ptr.vmem [resolvable:$true] %s99_s3  ;;  %s122_s30 = int_to_ptr.hbm [resolvable:$true] %s121_s30 }
  0x1c   :  { %102 = dma.hbm_to_vmem [thread:$0]  %s98_s25, 32, %s100_s3, [#allocation12]  }
  0x1d   :  { %s10526_s4 = smov [#allocation16]  }
  0x1e   :  { %s123_s10 = sshll.u32 %s10526_s4, 4  ;;  %s124_s10 = int_to_ptr.vmem [resolvable:$true] %s123_s10 }
  0x1f   :  { %126 = dma.hbm_to_vmem [thread:$0]  %s122_s30, 16, %s124_s10, [#allocation15]  }
  0x20   :  { %10498 = dma.done.wait [#allocation3], 448  }
  0x21   :  { %10499 = vsyncadd [#allocation3], 4294966848 }
  0x22   :  { %10500 = dma.done.wait [#allocation6], 57472  }
  0x23   :  { %10501 = vsyncadd [#allocation6], 4294909824 }
  0x24   :  { %10502 = dma.done.wait [#allocation9], 32832  }
  0x25   :  { %10503 = vsyncadd [#allocation9], 4294934464 }
  0x26   :  { %10504 = dma.done.wait [#allocation12], 8224  }
  0x27   :  { %10505 = vsyncadd [#allocation12], 4294959072 }
  0x28   :  { %10506 = dma.done.wait [#allocation15], 2064  }
  0x29   :  { %10507 = vsyncadd [#allocation15], 4294965232  ;;  %v6538_v0 = vld [vmem:[#allocation5 + $0x1c0] sm:$0xf]  ;;  %s10527_s6 = smov [#allocation17]   ;;  %s6298_s13 = sshll.u32 %s10883_s9, 4  ;;  %s6299_s13 = int_to_ptr.hbm [resolvable:$true] %s6298_s13 }
  0x2a   :  { %v9508_v1 = vld [vmem:[#allocation5 + $0x1dc] sm:$0xf0]  ;;  %s6296_s8 = sshll.u32 %s10527_s6, 4  ;;  %s6297_s8 = int_to_ptr.vmem [resolvable:$true] %s6296_s8 }
  0x2b   :  { %v6794_v2 = vld [vmem:[#allocation5 + $0x3c0] sm:$0xf]  ;;  %v6539_v3 = vor.u32 %v9508_v1, %v6538_v0 }
  0x2c   :  { %v9572_v4 = vld [vmem:[#allocation5 + $0x3dc] sm:$0xf0] }
  0x2d   :  { %v7050_v5 = vld [vmem:[#allocation5 + $0x5c0] sm:$0xf]  ;;  %v6795_v7 = vor.u32 %v9572_v4, %v6794_v2  ;;  %2898 = vmatpush.bf16.msra.mxu0 %v6539_v3 }
  0x2e   :  { %v9636_v6 = vld [vmem:[#allocation5 + $0x5dc] sm:$0xf0] }
  0x2f   :  { %v7051_v8 = vor.u32 %v9636_v6, %v7050_v5  ;;  %v7306_v9 = vld [vmem:[#allocation5 + $0x7c0] sm:$0xf]  ;;  %2911 = vmatpush.bf16.msra.mxu1 %v6795_v7 }
  0x30   :  { %v9700_v10 = vld [vmem:[#allocation5 + $0x7dc] sm:$0xf0] }
  0x31   :  { %v6506_v11 = vld [vmem:[#allocation5 + $0x180] sm:$0xf]  ;;  %v7307_v12 = vor.u32 %v9700_v10, %v7306_v9  ;;  %2924 = vmatpush.bf16.msra.mxu2 %v7051_v8 }
  0x32   :  { %v9500_v13 = vld [vmem:[#allocation5 + $0x19c] sm:$0xf0] }
  0x33   :  { %v6762_v14 = vld [vmem:[#allocation5 + $0x380] sm:$0xf]  ;;  %v6507_v16 = vor.u32 %v9500_v13, %v6506_v11  ;;  %2937 = vmatpush.bf16.msra.mxu3 %v7307_v12 }
  0x34   :  { %v9564_v15 = vld [vmem:[#allocation5 + $0x39c] sm:$0xf0] }
  0x35   :  { %v6763_v17 = vor.u32 %v9564_v15, %v6762_v14  ;;  %v7018_v18 = vld [vmem:[#allocation5 + $0x580] sm:$0xf]  ;;  %2899 = vmatpush.bf16.msra.mxu0 %v6507_v16 }
  0x36   :  { %v9628_v19 = vld [vmem:[#allocation5 + $0x59c] sm:$0xf0] }
  0x37   :  { %v7274_v20 = vld [vmem:[#allocation5 + $0x780] sm:$0xf]  ;;  %v7019_v21 = vor.u32 %v9628_v19, %v7018_v18  ;;  %2912 = vmatpush.bf16.msra.mxu1 %v6763_v17 }
  0x38   :  { %v9692_v22 = vld [vmem:[#allocation5 + $0x79c] sm:$0xf0] }
  0x39   :  { %v6474_v23 = vld [vmem:[#allocation5 + $0x140] sm:$0xf]  ;;  %v7275_v25 = vor.u32 %v9692_v22, %v7274_v20  ;;  %2925 = vmatpush.bf16.msra.mxu2 %v7019_v21 }
  0x3a   :  { %v9492_v24 = vld [vmem:[#allocation5 + $0x15c] sm:$0xf0] }
  0x3b   :  { %v6730_v26 = vld [vmem:[#allocation5 + $0x340] sm:$0xf]  ;;  %v6475_v29 = vor.u32 %v9492_v24, %v6474_v23  ;;  %2938 = vmatpush.bf16.msra.mxu3 %v7275_v25 }
  0x3c   :  { %v9556_v27 = vld [vmem:[#allocation5 + $0x35c] sm:$0xf0] }
  0x3d   :  { %v6986_v28 = vld [vmem:[#allocation5 + $0x540] sm:$0xf]  ;;  %v6731_v33 = vor.u32 %v9556_v27, %v6730_v26  ;;  %2900 = vmatpush.bf16.msra.mxu0 %v6475_v29 }
  0x3e   :  { %v9620_v30 = vld [vmem:[#allocation5 + $0x55c] sm:$0xf0] }
  0x3f   :  { %v7242_v31 = vld [vmem:[#allocation5 + $0x740] sm:$0xf]  ;;  %v6987_v34 = vor.u32 %v9620_v30, %v6986_v28  ;;  %2913 = vmatpush.bf16.msra.mxu1 %v6731_v33 }
  0x40   :  { %v9684_v32 = vld [vmem:[#allocation5 + $0x75c] sm:$0xf0] }
  0x41   :  { %v6442_v35 = vld [vmem:[#allocation5 + $0x100] sm:$0xf]  ;;  %v7243_v38 = vor.u32 %v9684_v32, %v7242_v31  ;;  %2926 = vmatpush.bf16.msra.mxu2 %v6987_v34 }
  0x42   :  { %v9484_v36 = vld [vmem:[#allocation5 + $0x11c] sm:$0xf0] }
  0x43   :  { %v6698_v37 = vld [vmem:[#allocation5 + $0x300] sm:$0xf]  ;;  %v6443_v44 = vor.u32 %v9484_v36, %v6442_v35  ;;  %2939 = vmatpush.bf16.msra.mxu3 %v7243_v38  ;;  %v6540_v38 = vld [vmem:[#allocation5 + $0x1e0] sm:$0xf0] }
  0x44   :  { %v9548_v39 = vld [vmem:[#allocation5 + $0x31c] sm:$0xf0] }
  0x45   :  { %v6954_v40 = vld [vmem:[#allocation5 + $0x500] sm:$0xf]  ;;  %v6699_v45 = vor.u32 %v9548_v39, %v6698_v37  ;;  %2901 = vmatpush.bf16.msra.mxu0 %v6443_v44  ;;  %v9504_v37 = vld [vmem:[#allocation5 + $0x1c4] sm:$0xf] }
  0x46   :  { %v9612_v41 = vld [vmem:[#allocation5 + $0x51c] sm:$0xf0] }
  0x47   :  { %v7210_v42 = vld [vmem:[#allocation5 + $0x700] sm:$0xf]  ;;  %v6955_v46 = vor.u32 %v9612_v41, %v6954_v40  ;;  %2914 = vmatpush.bf16.msra.mxu1 %v6699_v45 }
  0x48   :  { %v9676_v43 = vld [vmem:[#allocation5 + $0x71c] sm:$0xf0] }
  0x49   :  { %v6410_v47 = vld [vmem:[#allocation5 + $0xc0] sm:$0xf]  ;;  %v7211_v50 = vor.u32 %v9676_v43, %v7210_v42  ;;  %2927 = vmatpush.bf16.msra.mxu2 %v6955_v46  ;;  %v6543_v46 = vor.u32 %v9504_v37, %v6540_v38 }
  0x4a   :  { %v9476_v48 = vld [vmem:[#allocation5 + $0xdc] sm:$0xf0] }
  0x4b   :  { %v6666_v49 = vld [vmem:[#allocation5 + $0x2c0] sm:$0xf]  ;;  %v6411_v56 = vor.u32 %v9476_v48, %v6410_v47  ;;  %2940 = vmatpush.bf16.msra.mxu3 %v7211_v50  ;;  %v9496_v50 = vld [vmem:[#allocation5 + $0x184] sm:$0xf] }
  0x4c   :  { %v9540_v51 = vld [vmem:[#allocation5 + $0x2dc] sm:$0xf0] }
  0x4d   :  { %v6922_v52 = vld [vmem:[#allocation5 + $0x4c0] sm:$0xf]  ;;  %v6667_v57 = vor.u32 %v9540_v51, %v6666_v49  ;;  %2902 = vmatpush.bf16.msra.mxu0 %v6411_v56  ;;  %v6508_v51 = vld [vmem:[#allocation5 + $0x1a0] sm:$0xf0] }
  0x4e   :  { %v9604_v53 = vld [vmem:[#allocation5 + $0x4dc] sm:$0xf0] }
  0x4f   :  { %v7178_v54 = vld [vmem:[#allocation5 + $0x6c0] sm:$0xf]  ;;  %v6923_v58 = vor.u32 %v9604_v53, %v6922_v52  ;;  %2915 = vmatpush.bf16.msra.mxu1 %v6667_v57 }
  0x50   :  { %v9668_v55 = vld [vmem:[#allocation5 + $0x6dc] sm:$0xf0] }
  0x51   :  { %v6378_v59 = vld [vmem:[#allocation5 + $0x80] sm:$0xf]  ;;  %v7179_v62 = vor.u32 %v9668_v55, %v7178_v54  ;;  %2928 = vmatpush.bf16.msra.mxu2 %v6923_v58 }
  0x52   :  { %v9468_v60 = vld [vmem:[#allocation5 + $0x9c] sm:$0xf0] }
  0x53   :  { %v6634_v61 = vld [vmem:[#allocation5 + $0x280] sm:$0xf]  ;;  %v6379_v4 = vor.u32 %v9468_v60, %v6378_v59  ;;  %2941 = vmatpush.bf16.msra.mxu3 %v7179_v62  ;;  %v6511_v59 = vor.u32 %v9496_v50, %v6508_v51  ;;  %v9488_v62 = vld [vmem:[#allocation5 + $0x144] sm:$0xf] }
  0x54   :  { %v9532_v63 = vld [vmem:[#allocation5 + $0x29c] sm:$0xf0] }
  0x55   :  { %v6890_v0 = vld [vmem:[#allocation5 + $0x480] sm:$0xf]  ;;  %v6635_v5 = vor.u32 %v9532_v63, %v6634_v61  ;;  %2903 = vmatpush.bf16.msra.mxu0 %v6379_v4  ;;  %v6476_v63 = vld [vmem:[#allocation5 + $0x160] sm:$0xf0] }
  0x56   :  { %v9596_v1 = vld [vmem:[#allocation5 + $0x49c] sm:$0xf0] }
  0x57   :  { %v7146_v2 = vld [vmem:[#allocation5 + $0x680] sm:$0xf]  ;;  %v6891_v6 = vor.u32 %v9596_v1, %v6890_v0  ;;  %2916 = vmatpush.bf16.msra.mxu1 %v6635_v5 }
  0x58   :  { %v9660_v3 = vld [vmem:[#allocation5 + $0x69c] sm:$0xf0] }
  0x59   :  { %v6346_v7 = vld [vmem:[#allocation5 + $0x40] sm:$0xf]  ;;  %v7147_v10 = vor.u32 %v9660_v3, %v7146_v2  ;;  %2929 = vmatpush.bf16.msra.mxu2 %v6891_v6  ;;  %v164_v2 = vld [vmem:[#allocation2 + $0x8] sm:$0xff]  ;;  %v163_v3 = vld [vmem:[#allocation2] sm:$0xff] }
  0x5a   :  { %v9460_v8 = vld [vmem:[#allocation5 + $0x5c] sm:$0xf0] }
  0x5b   :  { %v6602_v9 = vld [vmem:[#allocation5 + $0x240] sm:$0xf]  ;;  %v6347_v16 = vor.u32 %v9460_v8, %v6346_v7  ;;  %2942 = vmatpush.bf16.msra.mxu3 %v7147_v10  ;;  %v639_v8 = vunpack.c.l.b16 %v164_v2  ;;  %v640_v10 = vunpack.c.h.b16 %v164_v2 }
  0x5c   :  { %v9524_v11 = vld [vmem:[#allocation5 + $0x25c] sm:$0xf0] }
  0x5d   :  { %v6858_v12 = vld [vmem:[#allocation5 + $0x440] sm:$0xf]  ;;  %v6603_v19 = vor.u32 %v9524_v11, %v6602_v9  ;;  %2904 = vmatpush.bf16.msra.mxu0 %v6347_v16  ;;  %v637_v9 = vunpack.c.l.b16 %v163_v3  ;;  %v6479_v11 = vor.u32 %v9488_v62, %v6476_v63  ;;  %v9480_v16 = vld [vmem:[#allocation5 + $0x104] sm:$0xf] }
  0x5e   :  { %v9588_v13 = vld [vmem:[#allocation5 + $0x45c] sm:$0xf0] }
  0x5f   :  { %v7114_v14 = vld [vmem:[#allocation5 + $0x640] sm:$0xf]  ;;  %v6859_v20 = vor.u32 %v9588_v13, %v6858_v12  ;;  %2917 = vmatpush.bf16.msra.mxu1 %v6603_v19  ;;  %v10607_v19 = vpack.c.b16 %v637_v9, %v637_v9  ;;  %v6796_v9 = vld [vmem:[#allocation5 + $0x3e0] sm:$0xf0] }
  0x60   :  { %v9652_v15 = vld [vmem:[#allocation5 + $0x65c] sm:$0xf0] }
  0x61   :  { %v6314_v17 = vld [vmem:[#allocation5] sm:$0xf]  ;;  %v7115_v24 = vor.u32 %v9652_v15, %v7114_v14  ;;  %2930 = vmatpush.bf16.msra.mxu2 %v6859_v20  ;;  %v638_v15 = vunpack.c.h.b16 %v163_v3  ;;  %v10609_v20 = vpack.c.b16 %v640_v10, %v640_v10  ;;  %v166_v3 = vld [vmem:[#allocation2 + $0x18] sm:$0xf]  ;;  %v9632_v10 = vld [vmem:[#allocation5 + $0x5c4] sm:$0xf] }
  0x62   :  { %v9452_v18 = vld [vmem:[#allocation5 + $0x1c] sm:$0xf0] }
  0x63   :  { %v6570_v21 = vld [vmem:[#allocation5 + $0x200] sm:$0xf]  ;;  %v6315_v31 = vor.u32 %v9452_v18, %v6314_v17  ;;  %2943 = vmatpush.bf16.msra.mxu3 %v7115_v24  ;;  %v6444_v17 = vld [vmem:[#allocation5 + $0x120] sm:$0xf0]  ;;  %v10605_v18 = vpack.c.b16 %v639_v8, %v639_v8 }
  0x64   :  { %v9516_v22 = vld [vmem:[#allocation5 + $0x21c] sm:$0xf0]  ;;  %v9568_v8 = vld [vmem:[#allocation5 + $0x3c4] sm:$0xf] }
  0x65   :  { %v6826_v23 = vld [vmem:[#allocation5 + $0x400] sm:$0xf]  ;;  %v6571_v35 = vor.u32 %v9516_v22, %v6570_v21  ;;  %2905 = vmatpush.bf16.msra.mxu0 %v6315_v31  ;;  %v10611_v22 = vpack.c.b16 %v638_v15, %v638_v15  ;;  %v643_v15 = vunpack.c.l.b16 %v166_v3 }
  0x66   :  { %v9580_v25 = vld [vmem:[#allocation5 + $0x41c] sm:$0xf0] }
  0x67   :  { %v7082_v26 = vld [vmem:[#allocation5 + $0x600] sm:$0xf]  ;;  %v6827_v36 = vor.u32 %v9580_v25, %v6826_v23  ;;  %2918 = vmatpush.bf16.msra.mxu1 %v6571_v35 }
  0x68   :  { %v9644_v27 = vld [vmem:[#allocation5 + $0x61c] sm:$0xf0]  ;;  %2906 = vmatmul.bf16.vlgmr.msra.gmra.mxu0 %v10607_v19 }
  0x69   :  { %v7562_v28 = vld [vmem:[#allocation5 + $0x9c0] sm:$0xf]  ;;  %v7083_v39 = vor.u32 %v9644_v27, %v7082_v26  ;;  %2931 = vmatpush.bf16.msra.mxu2 %v6827_v36 }
  0x6a   :  { %v9764_v29 = vld [vmem:[#allocation5 + $0x9dc] sm:$0xf0]  ;;  %2919 = vmatmul.bf16.vlgmr.msra.gmra.mxu1 %v10611_v22 }
  0x6b   :  { %v7818_v30 = vld [vmem:[#allocation5 + $0xbc0] sm:$0xf]  ;;  %v7563_v40 = vor.u32 %v9764_v29, %v7562_v28  ;;  %2944 = vmatpush.bf16.msra.mxu3 %v7083_v39  ;;  %v6447_v28 = vor.u32 %v9480_v16, %v6444_v17 }
  0x6c   :  { %v9828_v32 = vld [vmem:[#allocation5 + $0xbdc] sm:$0xf0]  ;;  %2932 = vmatmul.bf16.vlgmr.msra.gmra.mxu2 %v10605_v18 }
  0x6d   :  { %v8074_v33 = vld [vmem:[#allocation5 + $0xdc0] sm:$0xf]  ;;  %v7819_v41 = vor.u32 %v9828_v32, %v7818_v30  ;;  %2950 = vmatpush.bf16.msrb.mxu0 %v7563_v40  ;;  %v9472_v32 = vld [vmem:[#allocation5 + $0xc4] sm:$0xf] }
  0x6e   :  { %v9892_v34 = vld [vmem:[#allocation5 + $0xddc] sm:$0xf0]  ;;  %2945 = vmatmul.bf16.vlgmr.msra.gmra.mxu3 %v10609_v20 }
  0x6f   :  { %v8075_v42 = vor.u32 %v9892_v34, %v8074_v33  ;;  %v7530_v43 = vld [vmem:[#allocation5 + $0x980] sm:$0xf]  ;;  %2963 = vmatpush.bf16.msrb.mxu1 %v7819_v41  ;;  %2989 = vmatpush.bf16.msrb.mxu3 %v6543_v46  ;;  %v6412_v33 = vld [vmem:[#allocation5 + $0xe0] sm:$0xf0] }
  0x70   :  { %v9756_v44 = vld [vmem:[#allocation5 + $0x99c] sm:$0xf0]  ;;  %v6415_v40 = vor.u32 %v9472_v32, %v6412_v33  ;;  %v9624_v32 = vld [vmem:[#allocation5 + $0x584] sm:$0xf] }
  0x71   :  { %v7786_v45 = vld [vmem:[#allocation5 + $0xb80] sm:$0xf]  ;;  %v7531_v52 = vor.u32 %v9756_v44, %v7530_v43  ;;  %2976 = vmatpush.bf16.msrb.mxu2 %v8075_v42  ;;  %v9464_v44 = vld [vmem:[#allocation5 + $0x84] sm:$0xf] }
  0x72   :  { %v9820_v47 = vld [vmem:[#allocation5 + $0xb9c] sm:$0xf0] }
  0x73   :  { %v8042_v48 = vld [vmem:[#allocation5 + $0xd80] sm:$0xf]  ;;  %v7787_v54 = vor.u32 %v9820_v47, %v7786_v45  ;;  %2951 = vmatpush.bf16.msrb.mxu0 %v7531_v52  ;;  %2990 = vmatpush.bf16.msrb.mxu3 %v6511_v59  ;;  %v6380_v45 = vld [vmem:[#allocation5 + $0xa0] sm:$0xf0] }
  0x74   :  { %v9884_v49 = vld [vmem:[#allocation5 + $0xd9c] sm:$0xf0]  ;;  %v6383_v52 = vor.u32 %v9464_v44, %v6380_v45  ;;  %v9552_v45 = vld [vmem:[#allocation5 + $0x344] sm:$0xf] }
  0x75   :  { %v7498_v53 = vld [vmem:[#allocation5 + $0x940] sm:$0xf]  ;;  %v8043_v55 = vor.u32 %v9884_v49, %v8042_v48  ;;  %2964 = vmatpush.bf16.msrb.mxu1 %v7787_v54 }
  0x76   :  { %v9748_v56 = vld [vmem:[#allocation5 + $0x95c] sm:$0xf0] }
  0x77   :  { %v7754_v57 = vld [vmem:[#allocation5 + $0xb40] sm:$0xf]  ;;  %v7499_v0 = vor.u32 %v9748_v56, %v7498_v53  ;;  %2977 = vmatpush.bf16.msrb.mxu2 %v8043_v55  ;;  %2991 = vmatpush.bf16.msrb.mxu3 %v6479_v11  ;;  %v9456_v56 = vld [vmem:[#allocation5 + $0x44] sm:$0xf] }
  0x78   :  { %v9812_v58 = vld [vmem:[#allocation5 + $0xb5c] sm:$0xf0] }
  0x79   :  { %v8010_v60 = vld [vmem:[#allocation5 + $0xd40] sm:$0xf]  ;;  %v7755_v1 = vor.u32 %v9812_v58, %v7754_v57  ;;  %2952 = vmatpush.bf16.msrb.mxu0 %v7499_v0  ;;  %v6348_v57 = vld [vmem:[#allocation5 + $0x60] sm:$0xf0] }
  0x7a   :  { %v9876_v61 = vld [vmem:[#allocation5 + $0xd5c] sm:$0xf0] }
  0x7b   :  { %v8011_v4 = vor.u32 %v9876_v61, %v8010_v60  ;;  %v7466_v5 = vld [vmem:[#allocation5 + $0x900] sm:$0xf]  ;;  %2965 = vmatpush.bf16.msrb.mxu1 %v7755_v1  ;;  %2992 = vmatpush.bf16.msrb.mxu3 %v6447_v28 }
  0x7c   :  { %v9740_v6 = vld [vmem:[#allocation5 + $0x91c] sm:$0xf0] }
  0x7d   :  { %v7722_v7 = vld [vmem:[#allocation5 + $0xb00] sm:$0xf]  ;;  %v7467_v21 = vor.u32 %v9740_v6, %v7466_v5  ;;  %2978 = vmatpush.bf16.msrb.mxu2 %v8011_v4  ;;  %v6351_v4 = vor.u32 %v9456_v56, %v6348_v57  ;;  %v9448_v5 = vld [vmem:[#allocation5 + $0x4] sm:$0xf] }
  0x7e   :  { %v9804_v12 = vld [vmem:[#allocation5 + $0xb1c] sm:$0xf0]  ;;  %v6316_v6 = vld [vmem:[#allocation5 + $0x20] sm:$0xf0] }
  0x7f   :  { %v7978_v13 = vld [vmem:[#allocation5 + $0xd00] sm:$0xf]  ;;  %v7723_v23 = vor.u32 %v9804_v12, %v7722_v7  ;;  %2953 = vmatpush.bf16.msrb.mxu0 %v7467_v21  ;;  %2993 = vmatpush.bf16.msrb.mxu3 %v6415_v40  ;;  %v165_v7 = vld [vmem:[#allocation2 + $0x10] sm:$0xff]  ;;  %v7052_v12 = vld [vmem:[#allocation5 + $0x5e0] sm:$0xf0] }
  0x80   :  { %v9868_v14 = vld [vmem:[#allocation5 + $0xd1c] sm:$0xf0]  ;;  %v9760_v21 = vld [vmem:[#allocation5 + $0x9c4] sm:$0xf]  ;;  %v7055_v28 = vor.u32 %v9632_v10, %v7052_v12 }
  0x81   :  { %v7979_v24 = vor.u32 %v9868_v14, %v7978_v13  ;;  %v7434_v25 = vld [vmem:[#allocation5 + $0x8c0] sm:$0xf]  ;;  %2966 = vmatpush.bf16.msrb.mxu1 %v7723_v23  ;;  %v9696_v13 = vld [vmem:[#allocation5 + $0x7c4] sm:$0xf] }
  0x82   :  { %v9732_v26 = vld [vmem:[#allocation5 + $0x8dc] sm:$0xf0]  ;;  %v7308_v14 = vld [vmem:[#allocation5 + $0x7e0] sm:$0xf0] }
  0x83   :  { %v7690_v27 = vld [vmem:[#allocation5 + $0xac0] sm:$0xf]  ;;  %v7435_v34 = vor.u32 %v9732_v26, %v7434_v25  ;;  %2979 = vmatpush.bf16.msrb.mxu2 %v7979_v24  ;;  %2994 = vmatpush.bf16.msrb.mxu3 %v6383_v52  ;;  %v7564_v23 = vld [vmem:[#allocation5 + $0x9e0] sm:$0xf0]  ;;  %v641_v24 = vunpack.c.l.b16 %v165_v7  ;;  %v642_v25 = vunpack.c.h.b16 %v165_v7  ;;  %v6319_v26 = vor.u32 %v9448_v5, %v6316_v6 }
  0x84   :  { %v9796_v29 = vld [vmem:[#allocation5 + $0xadc] sm:$0xf0]  ;;  %v7567_v33 = vor.u32 %v9760_v21, %v7564_v23  ;;  %v9744_v52 = vld [vmem:[#allocation5 + $0x944] sm:$0xf] }
  0x85   :  { %v7946_v30 = vld [vmem:[#allocation5 + $0xcc0] sm:$0xf]  ;;  %v7691_v35 = vor.u32 %v9796_v29, %v7690_v27  ;;  %2954 = vmatpush.bf16.msrb.mxu0 %v7435_v34  ;;  %v6799_v27 = vor.u32 %v9568_v8, %v6796_v9  ;;  %v7311_v29 = vor.u32 %v9696_v13, %v7308_v14  ;;  %v7020_v34 = vld [vmem:[#allocation5 + $0x5a0] sm:$0xf0]  ;;  %v10619_v40 = vpack.c.b16 %v641_v24, %v641_v24 }
  0x86   :  { %v9860_v31 = vld [vmem:[#allocation5 + $0xcdc] sm:$0xf0]  ;;  %v9544_v57 = vld [vmem:[#allocation5 + $0x304] sm:$0xf] }
  0x87   :  { %v7947_v36 = vor.u32 %v9860_v31, %v7946_v30  ;;  %v7402_v37 = vld [vmem:[#allocation5 + $0x880] sm:$0xf]  ;;  %2967 = vmatpush.bf16.msrb.mxu1 %v7691_v35  ;;  %2995 = vmatpush.bf16.msrb.mxu3 %v6351_v4  ;;  %v9560_v30 = vld [vmem:[#allocation5 + $0x384] sm:$0xf] }
  0x88   :  { %v9724_v38 = vld [vmem:[#allocation5 + $0x89c] sm:$0xf0]  ;;  %v6764_v31 = vld [vmem:[#allocation5 + $0x3a0] sm:$0xf0] }
  0x89   :  { %v7658_v39 = vld [vmem:[#allocation5 + $0xa80] sm:$0xf]  ;;  %v7403_v46 = vor.u32 %v9724_v38, %v7402_v37  ;;  %2980 = vmatpush.bf16.msrb.mxu2 %v7947_v36  ;;  %v9688_v35 = vld [vmem:[#allocation5 + $0x784] sm:$0xf]  ;;  %v10617_v37 = vpack.c.b16 %v643_v15, %v643_v15 }
  0x8a   :  { %v9788_v41 = vld [vmem:[#allocation5 + $0xa9c] sm:$0xf0]  ;;  %v7276_v36 = vld [vmem:[#allocation5 + $0x7a0] sm:$0xf0] }
  0x8b   :  { %v7914_v42 = vld [vmem:[#allocation5 + $0xc80] sm:$0xf]  ;;  %v7659_v47 = vor.u32 %v9788_v41, %v7658_v39  ;;  %2955 = vmatpush.bf16.msrb.mxu0 %v7403_v46  ;;  %v9752_v38 = vld [vmem:[#allocation5 + $0x984] sm:$0xf]  ;;  %v10621_v41 = vpack.c.b16 %v642_v25, %v642_v25  ;;  %2996 = vmatpush.bf16.msrb.mxu3 %v6319_v26  ;;  %v7279_v44 = vor.u32 %v9688_v35, %v7276_v36 }
  0x8c   :  { %v9852_v43 = vld [vmem:[#allocation5 + $0xc9c] sm:$0xf0]  ;;  %v7532_v39 = vld [vmem:[#allocation5 + $0x9a0] sm:$0xf0] }
  0x8d   :  { %v7915_v48 = vor.u32 %v9852_v43, %v7914_v42  ;;  %v7370_v49 = vld [vmem:[#allocation5 + $0x840] sm:$0xf]  ;;  %2968 = vmatpush.bf16.msrb.mxu1 %v7659_v47  ;;  %v6767_v42 = vor.u32 %v9560_v30, %v6764_v31  ;;  %v7023_v43 = vor.u32 %v9624_v32, %v7020_v34  ;;  %v6732_v46 = vld [vmem:[#allocation5 + $0x360] sm:$0xf0] }
  0x8e   :  { %v9716_v50 = vld [vmem:[#allocation5 + $0x85c] sm:$0xf0]  ;;  %v9616_v47 = vld [vmem:[#allocation5 + $0x544] sm:$0xf]  ;;  %2997 = vmatmul.bf16.vlgmr.msrb.gmra.mxu3 %v10607_v19 }
  0x8f   :  { %v7626_v51 = vld [vmem:[#allocation5 + $0xa40] sm:$0xf]  ;;  %v7371_v59 = vor.u32 %v9716_v50, %v7370_v49  ;;  %2981 = vmatpush.bf16.msrb.mxu2 %v7915_v48  ;;  %3041 = vmatpush.bf16.msra.mxu3 %v7567_v33  ;;  %v7535_v48 = vor.u32 %v9752_v38, %v7532_v39  ;;  %v6988_v49 = vld [vmem:[#allocation5 + $0x560] sm:$0xf0] }
  0x90   :  { %v9780_v53 = vld [vmem:[#allocation5 + $0xa5c] sm:$0xf0]  ;;  %v9680_v50 = vld [vmem:[#allocation5 + $0x744] sm:$0xf] }
  0x91   :  { %v7882_v54 = vld [vmem:[#allocation5 + $0xc40] sm:$0xf]  ;;  %v7627_v63 = vor.u32 %v9780_v53, %v7626_v51  ;;  %2956 = vmatpush.bf16.msrb.mxu0 %v7371_v59  ;;  %v7244_v51 = vld [vmem:[#allocation5 + $0x760] sm:$0xf0] }
  0x92   :  { %v9844_v55 = vld [vmem:[#allocation5 + $0xc5c] sm:$0xf0]  ;;  %v7500_v53 = vld [vmem:[#allocation5 + $0x960] sm:$0xf0]  ;;  %v7247_v56 = vor.u32 %v9680_v50, %v7244_v51 }
  0x93   :  { %v7338_v58 = vld [vmem:[#allocation5 + $0x800] sm:$0xf]  ;;  %v7883_v0 = vor.u32 %v9844_v55, %v7882_v54  ;;  %2969 = vmatpush.bf16.msrb.mxu1 %v7627_v63  ;;  %v6735_v54 = vor.u32 %v9552_v45, %v6732_v46  ;;  %v6991_v55 = vor.u32 %v9616_v47, %v6988_v49  ;;  %v9608_v59 = vld [vmem:[#allocation5 + $0x504] sm:$0xf]  ;;  %3042 = vmatpush.bf16.msra.mxu3 %v7535_v48 }
  0x94   :  { %v9708_v60 = vld [vmem:[#allocation5 + $0x81c] sm:$0xf0]  ;;  %v7212_v63 = vld [vmem:[#allocation5 + $0x720] sm:$0xf0] }
  0x95   :  { %v7594_v61 = vld [vmem:[#allocation5 + $0xa00] sm:$0xf]  ;;  %v7339_v11 = vor.u32 %v9708_v60, %v7338_v58  ;;  %2982 = vmatpush.bf16.msrb.mxu2 %v7883_v0  ;;  %v6700_v58 = vld [vmem:[#allocation5 + $0x320] sm:$0xf0]  ;;  %v7503_v60 = vor.u32 %v9744_v52, %v7500_v53 }
  0x96   :  { %v9772_v62 = vld [vmem:[#allocation5 + $0xa1c] sm:$0xf0]  ;;  %v9736_v0 = vld [vmem:[#allocation5 + $0x904] sm:$0xf] }
  0x97   :  { %v7850_v1 = vld [vmem:[#allocation5 + $0xc00] sm:$0xf]  ;;  %v7595_v16 = vor.u32 %v9772_v62, %v7594_v61  ;;  %2957 = vmatpush.bf16.msrb.mxu0 %v7339_v11  ;;  %v6956_v61 = vld [vmem:[#allocation5 + $0x520] sm:$0xf0]  ;;  %3043 = vmatpush.bf16.msra.mxu3 %v7503_v60 }
  0x98   :  { %v9836_v2 = vld [vmem:[#allocation5 + $0xc1c] sm:$0xf0]  ;;  %v9672_v62 = vld [vmem:[#allocation5 + $0x704] sm:$0xf]  ;;  %v6959_v3 = vor.u32 %v9608_v59, %v6956_v61 }
  0x99   :  { %v7851_v17 = vor.u32 %v9836_v2, %v7850_v1  ;;  %2970 = vmatpush.bf16.msrb.mxu1 %v7595_v16  ;;  %v7468_v1 = vld [vmem:[#allocation5 + $0x920] sm:$0xf0]  ;;  %v6703_v2 = vor.u32 %v9544_v57, %v6700_v58  ;;  %v7215_v4 = vor.u32 %v9672_v62, %v7212_v63  ;;  %v6546_v62 = vld [vmem:[#allocation5 + $0x1c8] sm:$0xf] }
  0x9a   :  { %2958 = vmatmul.bf16.vlgmr.msrb.gmra.mxu0 %v10619_v40  ;;  %v9536_v5 = vld [vmem:[#allocation5 + $0x2c4] sm:$0xf]  ;;  %v7471_v8 = vor.u32 %v9736_v0, %v7468_v1  ;;  %v9509_v63 = vld [vmem:[#allocation5 + $0x1e4] sm:$0xf0] }
  0x9b   :  { %2983 = vmatpush.bf16.msrb.mxu2 %v7851_v17  ;;  %3002 = vmatpush.bf16.msra.mxu0 %v6799_v27  ;;  %v6668_v6 = vld [vmem:[#allocation5 + $0x2e0] sm:$0xf0] }
  0x9c   :  { %2971 = vmatmul.bf16.vlgmr.msrb.gmra.mxu1 %v10621_v41  ;;  %v9600_v7 = vld [vmem:[#allocation5 + $0x4c4] sm:$0xf]  ;;  %v6671_v14 = vor.u32 %v9536_v5, %v6668_v6  ;;  %3044 = vmatpush.bf16.msra.mxu3 %v7471_v8 }
  0x9d   :  { %3015 = vmatpush.bf16.msra.mxu1 %v7055_v28  ;;  %v6924_v9 = vld [vmem:[#allocation5 + $0x4e0] sm:$0xf0] }
  0x9e   :  { %2984 = vmatmul.bf16.vlgmr.msrb.gmra.mxu2 %v10617_v37  ;;  %v9664_v10 = vld [vmem:[#allocation5 + $0x6c4] sm:$0xf]  ;;  %v6927_v15 = vor.u32 %v9600_v7, %v6924_v9  ;;  %v6547_v7 = vor.u32 %v9509_v63, %v6546_v62 }
  0x9f   :  { %3028 = vmatpush.bf16.msra.mxu2 %v7311_v29  ;;  %3003 = vmatpush.bf16.msra.mxu0 %v6767_v42  ;;  %v7180_v11 = vld [vmem:[#allocation5 + $0x6e0] sm:$0xf0] }
  0xa0   :  { %v9728_v12 = vld [vmem:[#allocation5 + $0x8c4] sm:$0xf]  ;;  %v7183_v16 = vor.u32 %v9664_v10, %v7180_v11 }
  0xa1   :  { %3016 = vmatpush.bf16.msra.mxu1 %v7023_v43  ;;  %v7436_v13 = vld [vmem:[#allocation5 + $0x8e0] sm:$0xf0] }
  0xa2   :  { %v9528_v17 = vld [vmem:[#allocation5 + $0x284] sm:$0xf]  ;;  %v7439_v24 = vor.u32 %v9728_v12, %v7436_v13  ;;  %v6514_v13 = vld [vmem:[#allocation5 + $0x188] sm:$0xf] }
  0xa3   :  { %3029 = vmatpush.bf16.msra.mxu2 %v7279_v44  ;;  %3004 = vmatpush.bf16.msra.mxu0 %v6735_v54  ;;  %v6636_v21 = vld [vmem:[#allocation5 + $0x2a0] sm:$0xf0] }
  0xa4   :  { %v9592_v23 = vld [vmem:[#allocation5 + $0x484] sm:$0xf]  ;;  %v6639_v30 = vor.u32 %v9528_v17, %v6636_v21  ;;  %3045 = vmatpush.bf16.msra.mxu3 %v7439_v24 }
  0xa5   :  { %3017 = vmatpush.bf16.msra.mxu1 %v6991_v55  ;;  %v6892_v25 = vld [vmem:[#allocation5 + $0x4a0] sm:$0xf0] }
  0xa6   :  { %v9656_v26 = vld [vmem:[#allocation5 + $0x684] sm:$0xf]  ;;  %v6895_v31 = vor.u32 %v9592_v23, %v6892_v25 }
  0xa7   :  { %3030 = vmatpush.bf16.msra.mxu2 %v7247_v56  ;;  %3005 = vmatpush.bf16.msra.mxu0 %v6703_v2  ;;  %v7148_v27 = vld [vmem:[#allocation5 + $0x6a0] sm:$0xf0]  ;;  %v6802_v2 = vld [vmem:[#allocation5 + $0x3c8] sm:$0xf] }
  0xa8   :  { %v9720_v28 = vld [vmem:[#allocation5 + $0x884] sm:$0xf]  ;;  %v7151_v32 = vor.u32 %v9656_v26, %v7148_v27 }
  0xa9   :  { %3018 = vmatpush.bf16.msra.mxu1 %v6959_v3  ;;  %v7404_v29 = vld [vmem:[#allocation5 + $0x8a0] sm:$0xf0]  ;;  %v9573_v3 = vld [vmem:[#allocation5 + $0x3e4] sm:$0xf0] }
  0xaa   :  { %v9520_v33 = vld [vmem:[#allocation5 + $0x244] sm:$0xf]  ;;  %v7407_v36 = vor.u32 %v9720_v28, %v7404_v29  ;;  %v6803_v11 = vor.u32 %v9573_v3, %v6802_v2  ;;  %v6482_v29 = vld [vmem:[#allocation5 + $0x148] sm:$0xf] }
  0xab   :  { %3031 = vmatpush.bf16.msra.mxu2 %v7215_v4  ;;  %3006 = vmatpush.bf16.msra.mxu0 %v6671_v14  ;;  %v6604_v34 = vld [vmem:[#allocation5 + $0x260] sm:$0xf0]  ;;  %v9501_v14 = vld [vmem:[#allocation5 + $0x1a4] sm:$0xf0] }
  0xac   :  { %v9584_v35 = vld [vmem:[#allocation5 + $0x444] sm:$0xf]  ;;  %v6607_v45 = vor.u32 %v9520_v33, %v6604_v34  ;;  %3046 = vmatpush.bf16.msra.mxu3 %v7407_v36  ;;  %v6515_v23 = vor.u32 %v9501_v14, %v6514_v13 }
  0xad   :  { %3019 = vmatpush.bf16.msra.mxu1 %v6927_v15  ;;  %v6860_v38 = vld [vmem:[#allocation5 + $0x460] sm:$0xf0]  ;;  %v6770_v15 = vld [vmem:[#allocation5 + $0x388] sm:$0xf] }
  0xae   :  { %v9648_v39 = vld [vmem:[#allocation5 + $0x644] sm:$0xf]  ;;  %v6863_v48 = vor.u32 %v9584_v35, %v6860_v38 }
  0xaf   :  { %3032 = vmatpush.bf16.msra.mxu2 %v7183_v16  ;;  %v7116_v42 = vld [vmem:[#allocation5 + $0x660] sm:$0xf0]  ;;  %3007 = vmatpush.bf16.msra.mxu0 %v6639_v30  ;;  %v9565_v16 = vld [vmem:[#allocation5 + $0x3a4] sm:$0xf0] }
  0xb0   :  { %v9712_v43 = vld [vmem:[#allocation5 + $0x844] sm:$0xf]  ;;  %v7119_v49 = vor.u32 %v9648_v39, %v7116_v42  ;;  %v6771_v27 = vor.u32 %v9565_v16, %v6770_v15  ;;  %v9493_v30 = vld [vmem:[#allocation5 + $0x164] sm:$0xf0] }
  0xb1   :  { %v7372_v44 = vld [vmem:[#allocation5 + $0x860] sm:$0xf0]  ;;  %3020 = vmatpush.bf16.msra.mxu1 %v6895_v31  ;;  %v6738_v31 = vld [vmem:[#allocation5 + $0x348] sm:$0xf]  ;;  %v6483_v35 = vor.u32 %v9493_v30, %v6482_v29 }
  0xb2   :  { %v9512_v46 = vld [vmem:[#allocation5 + $0x204] sm:$0xf]  ;;  %v7375_v53 = vor.u32 %v9712_v43, %v7372_v44  ;;  %v6450_v44 = vld [vmem:[#allocation5 + $0x108] sm:$0xf] }
  0xb3   :  { %v6572_v47 = vld [vmem:[#allocation5 + $0x220] sm:$0xf0]  ;;  %3033 = vmatpush.bf16.msra.mxu2 %v7151_v32  ;;  %3008 = vmatpush.bf16.msra.mxu0 %v6607_v45  ;;  %v9557_v32 = vld [vmem:[#allocation5 + $0x364] sm:$0xf0] }
  0xb4   :  { %v9576_v50 = vld [vmem:[#allocation5 + $0x404] sm:$0xf]  ;;  %v6575_v60 = vor.u32 %v9512_v46, %v6572_v47  ;;  %3047 = vmatpush.bf16.msra.mxu3 %v7375_v53  ;;  %v6739_v42 = vor.u32 %v9557_v32, %v6738_v31  ;;  %v9485_v45 = vld [vmem:[#allocation5 + $0x124] sm:$0xf0] }
  0xb5   :  { %v6828_v51 = vld [vmem:[#allocation5 + $0x420] sm:$0xf0]  ;;  %3021 = vmatpush.bf16.msra.mxu1 %v6863_v48  ;;  %v6706_v46 = vld [vmem:[#allocation5 + $0x308] sm:$0xf] }
  0xb6   :  { %v9640_v52 = vld [vmem:[#allocation5 + $0x604] sm:$0xf]  ;;  %v6831_v0 = vor.u32 %v9576_v50, %v6828_v51  ;;  %v9549_v47 = vld [vmem:[#allocation5 + $0x324] sm:$0xf0]  ;;  %v6451_v50 = vor.u32 %v9485_v45, %v6450_v44 }
  0xb7   :  { %v7084_v54 = vld [vmem:[#allocation5 + $0x620] sm:$0xf0]  ;;  %3034 = vmatpush.bf16.msra.mxu2 %v7119_v49  ;;  %3009 = vmatpush.bf16.msra.mxu0 %v6575_v60  ;;  %v6354_v16 = vld [vmem:[#allocation5 + $0x48] sm:$0xf] }
  0xb8   :  { %v9704_v55 = vld [vmem:[#allocation5 + $0x804] sm:$0xf]  ;;  %v7087_v1 = vor.u32 %v9640_v52, %v7084_v54  ;;  %v6707_v54 = vor.u32 %v9549_v47, %v6706_v46  ;;  %v6322_v31 = vld [vmem:[#allocation5 + $0x8] sm:$0xf] }
  0xb9   :  { %v7340_v56 = vld [vmem:[#allocation5 + $0x820] sm:$0xf0]  ;;  %3022 = vmatpush.bf16.msra.mxu1 %v6831_v0  ;;  %v7570_v44 = vld [vmem:[#allocation5 + $0x9c8] sm:$0xf] }
  0xba   :  { %v9824_v57 = vld [vmem:[#allocation5 + $0xbc4] sm:$0xf]  ;;  %v7343_v4 = vor.u32 %v9704_v55, %v7340_v56  ;;  %3010 = vmatmul.bf16.vlgmr.msra.gmra.mxu0 %v10611_v22  ;;  %v6418_v56 = vld [vmem:[#allocation5 + $0xc8] sm:$0xf] }
  0xbb   :  { %v7820_v58 = vld [vmem:[#allocation5 + $0xbe0] sm:$0xf0]  ;;  %3035 = vmatpush.bf16.msra.mxu2 %v7087_v1  ;;  %v9765_v45 = vld [vmem:[#allocation5 + $0x9e4] sm:$0xf0] }
  0xbc   :  { %v9888_v59 = vld [vmem:[#allocation5 + $0xdc4] sm:$0xf]  ;;  %v7823_v5 = vor.u32 %v9824_v57, %v7820_v58  ;;  %3048 = vmatpush.bf16.msra.mxu3 %v7343_v4  ;;  %3023 = vmatmul.bf16.vlgmr.msra.gmra.mxu1 %v10605_v18  ;;  %v9477_v57 = vld [vmem:[#allocation5 + $0xe4] sm:$0xf0] }
  0xbd   :  { %v8076_v61 = vld [vmem:[#allocation5 + $0xde0] sm:$0xf0]  ;;  %v6674_v58 = vld [vmem:[#allocation5 + $0x2c8] sm:$0xf]  ;;  %v6419_v62 = vor.u32 %v9477_v57, %v6418_v56 }
  0xbe   :  { %v8079_v6 = vor.u32 %v9888_v59, %v8076_v61  ;;  %v9816_v8 = vld [vmem:[#allocation5 + $0xb84] sm:$0xf]  ;;  %3054 = vmatpush.bf16.msrb.mxu0 %v7823_v5  ;;  %3036 = vmatmul.bf16.vlgmr.msra.gmra.mxu2 %v10609_v20  ;;  %v9541_v59 = vld [vmem:[#allocation5 + $0x2e4] sm:$0xf0] }
  0xbf   :  { %v7788_v9 = vld [vmem:[#allocation5 + $0xba0] sm:$0xf0]  ;;  %3080 = vmatpush.bf16.msrb.mxu2 %v6547_v7  ;;  %3049 = vmatmul.bf16.vlgmr.msra.gmra.mxu3 %v10619_v40  ;;  %v6675_v2 = vor.u32 %v9541_v59, %v6674_v58  ;;  %v6386_v4 = vld [vmem:[#allocation5 + $0x88] sm:$0xf] }
  0xc0   :  { %v9880_v10 = vld [vmem:[#allocation5 + $0xd84] sm:$0xf]  ;;  %v7791_v17 = vor.u32 %v9816_v8, %v7788_v9  ;;  %3067 = vmatpush.bf16.msrb.mxu1 %v8079_v6  ;;  %3093 = vmatpush.bf16.msrb.mxu3 %v6803_v11  ;;  %v9469_v5 = vld [vmem:[#allocation5 + $0xa4] sm:$0xf0] }
  0xc1   :  { %v8044_v12 = vld [vmem:[#allocation5 + $0xda0] sm:$0xf0]  ;;  %v6642_v6 = vld [vmem:[#allocation5 + $0x288] sm:$0xf] }
  0xc2   :  { %v8047_v21 = vor.u32 %v9880_v10, %v8044_v12  ;;  %v9808_v24 = vld [vmem:[#allocation5 + $0xb44] sm:$0xf]  ;;  %3055 = vmatpush.bf16.msrb.mxu0 %v7791_v17  ;;  %v9533_v7 = vld [vmem:[#allocation5 + $0x2a4] sm:$0xf0]  ;;  %v6387_v10 = vor.u32 %v9469_v5, %v6386_v4 }
  0xc3   :  { %v7756_v25 = vld [vmem:[#allocation5 + $0xb60] sm:$0xf0]  ;;  %3081 = vmatpush.bf16.msrb.mxu2 %v6515_v23  ;;  %v6643_v14 = vor.u32 %v9533_v7, %v6642_v6  ;;  %v9461_v17 = vld [vmem:[#allocation5 + $0x64] sm:$0xf0] }
  0xc4   :  { %v9872_v26 = vld [vmem:[#allocation5 + $0xd44] sm:$0xf]  ;;  %v7759_v33 = vor.u32 %v9808_v24, %v7756_v25  ;;  %3068 = vmatpush.bf16.msrb.mxu1 %v8047_v21  ;;  %3094 = vmatpush.bf16.msrb.mxu3 %v6771_v27  ;;  %v6610_v21 = vld [vmem:[#allocation5 + $0x248] sm:$0xf] }
  0xc5   :  { %v8012_v28 = vld [vmem:[#allocation5 + $0xd60] sm:$0xf0]  ;;  %v9525_v23 = vld [vmem:[#allocation5 + $0x264] sm:$0xf0] }
  0xc6   :  { %v8015_v34 = vor.u32 %v9872_v26, %v8012_v28  ;;  %v9800_v36 = vld [vmem:[#allocation5 + $0xb04] sm:$0xf]  ;;  %3056 = vmatpush.bf16.msrb.mxu0 %v7759_v33  ;;  %v6355_v28 = vor.u32 %v9461_v17, %v6354_v16  ;;  %v6611_v32 = vor.u32 %v9525_v23, %v6610_v21  ;;  %v9453_v33 = vld [vmem:[#allocation5 + $0x24] sm:$0xf0] }
  0xc7   :  { %v7724_v38 = vld [vmem:[#allocation5 + $0xb20] sm:$0xf0]  ;;  %3082 = vmatpush.bf16.msrb.mxu2 %v6483_v35  ;;  %v9517_v35 = vld [vmem:[#allocation5 + $0x224] sm:$0xf0]  ;;  %v6323_v47 = vor.u32 %v9453_v33, %v6322_v31 }
  0xc8   :  { %v9864_v39 = vld [vmem:[#allocation5 + $0xd04] sm:$0xf]  ;;  %v7727_v48 = vor.u32 %v9800_v36, %v7724_v38  ;;  %3069 = vmatpush.bf16.msrb.mxu1 %v8015_v34  ;;  %3095 = vmatpush.bf16.msrb.mxu3 %v6739_v42  ;;  %v6578_v34 = vld [vmem:[#allocation5 + $0x208] sm:$0xf] }
  0xc9   :  { %v7980_v43 = vld [vmem:[#allocation5 + $0xd20] sm:$0xf0]  ;;  %v7058_v36 = vld [vmem:[#allocation5 + $0x5c8] sm:$0xf] }
  0xca   :  { %v7983_v49 = vor.u32 %v9864_v39, %v7980_v43  ;;  %v9792_v51 = vld [vmem:[#allocation5 + $0xac4] sm:$0xf]  ;;  %3057 = vmatpush.bf16.msrb.mxu0 %v7727_v48  ;;  %v9637_v38 = vld [vmem:[#allocation5 + $0x5e4] sm:$0xf0] }
  0xcb   :  { %v7692_v52 = vld [vmem:[#allocation5 + $0xae0] sm:$0xf0]  ;;  %3083 = vmatpush.bf16.msrb.mxu2 %v6451_v50  ;;  %v7314_v39 = vld [vmem:[#allocation5 + $0x7c8] sm:$0xf]  ;;  %v6579_v50 = vor.u32 %v9517_v35, %v6578_v34 }
  0xcc   :  { %v9856_v53 = vld [vmem:[#allocation5 + $0xcc4] sm:$0xf]  ;;  %v7695_v60 = vor.u32 %v9792_v51, %v7692_v52  ;;  %3070 = vmatpush.bf16.msrb.mxu1 %v7983_v49  ;;  %3096 = vmatpush.bf16.msrb.mxu3 %v6707_v54  ;;  %v9701_v43 = vld [vmem:[#allocation5 + $0x7e4] sm:$0xf0]  ;;  %v7059_v51 = vor.u32 %v9637_v38, %v7058_v36 }
  0xcd   :  { %v7948_v55 = vld [vmem:[#allocation5 + $0xce0] sm:$0xf0]  ;;  %v7826_v48 = vld [vmem:[#allocation5 + $0xbc8] sm:$0xf]  ;;  %v7315_v52 = vor.u32 %v9701_v43, %v7314_v39 }
  0xce   :  { %v7951_v61 = vor.u32 %v9856_v53, %v7948_v55  ;;  %v9784_v63 = vld [vmem:[#allocation5 + $0xa84] sm:$0xf]  ;;  %3058 = vmatpush.bf16.msrb.mxu0 %v7695_v60  ;;  %v9829_v49 = vld [vmem:[#allocation5 + $0xbe4] sm:$0xf0]  ;;  %v7571_v53 = vor.u32 %v9765_v45, %v7570_v44 }
  0xcf   :  { %v7660_v0 = vld [vmem:[#allocation5 + $0xaa0] sm:$0xf0]  ;;  %3084 = vmatpush.bf16.msrb.mxu2 %v6419_v62  ;;  %v7026_v54 = vld [vmem:[#allocation5 + $0x588] sm:$0xf]  ;;  %v7827_v57 = vor.u32 %v9829_v49, %v7826_v48 }
  0xd0   :  { %v9848_v1 = vld [vmem:[#allocation5 + $0xc84] sm:$0xf]  ;;  %v7663_v8 = vor.u32 %v9784_v63, %v7660_v0  ;;  %3071 = vmatpush.bf16.msrb.mxu1 %v7951_v61  ;;  %3097 = vmatpush.bf16.msrb.mxu3 %v6675_v2  ;;  %v9629_v55 = vld [vmem:[#allocation5 + $0x5a4] sm:$0xf0] }
  0xd1   :  { %v7916_v3 = vld [vmem:[#allocation5 + $0xca0] sm:$0xf0]  ;;  %v7282_v56 = vld [vmem:[#allocation5 + $0x788] sm:$0xf]  ;;  %v7027_v63 = vor.u32 %v9629_v55, %v7026_v54 }
  0xd2   :  { %v7919_v9 = vor.u32 %v9848_v1, %v7916_v3  ;;  %v9776_v11 = vld [vmem:[#allocation5 + $0xa44] sm:$0xf]  ;;  %3059 = vmatpush.bf16.msrb.mxu0 %v7663_v8  ;;  %v9693_v58 = vld [vmem:[#allocation5 + $0x7a4] sm:$0xf0] }
  0xd3   :  { %v7628_v12 = vld [vmem:[#allocation5 + $0xa60] sm:$0xf0]  ;;  %3085 = vmatpush.bf16.msrb.mxu2 %v6387_v10  ;;  %v7538_v59 = vld [vmem:[#allocation5 + $0x988] sm:$0xf]  ;;  %v7283_v0 = vor.u32 %v9693_v58, %v7282_v56 }
  0xd4   :  { %v9840_v13 = vld [vmem:[#allocation5 + $0xc44] sm:$0xf]  ;;  %v7631_v24 = vor.u32 %v9776_v11, %v7628_v12  ;;  %3072 = vmatpush.bf16.msrb.mxu1 %v7919_v9  ;;  %3098 = vmatpush.bf16.msrb.mxu3 %v6643_v14  ;;  %v9757_v60 = vld [vmem:[#allocation5 + $0x9a4] sm:$0xf0] }
  0xd5   :  { %v7884_v15 = vld [vmem:[#allocation5 + $0xc60] sm:$0xf0]  ;;  %v7794_v61 = vld [vmem:[#allocation5 + $0xb88] sm:$0xf]  ;;  %v7539_v1 = vor.u32 %v9757_v60, %v7538_v59 }
  0xd6   :  { %v9768_v25 = vld [vmem:[#allocation5 + $0xa04] sm:$0xf]  ;;  %v7887_v27 = vor.u32 %v9840_v13, %v7884_v15  ;;  %3060 = vmatpush.bf16.msrb.mxu0 %v7631_v24  ;;  %v9821_v62 = vld [vmem:[#allocation5 + $0xba4] sm:$0xf0] }
  0xd7   :  { %v7596_v26 = vld [vmem:[#allocation5 + $0xa20] sm:$0xf0]  ;;  %3086 = vmatpush.bf16.msrb.mxu2 %v6355_v28  ;;  %v6994_v2 = vld [vmem:[#allocation5 + $0x548] sm:$0xf]  ;;  %v7795_v5 = vor.u32 %v9821_v62, %v7794_v61 }
  0xd8   :  { %v9832_v29 = vld [vmem:[#allocation5 + $0xc04] sm:$0xf]  ;;  %v7599_v42 = vor.u32 %v9768_v25, %v7596_v26  ;;  %3073 = vmatpush.bf16.msrb.mxu1 %v7887_v27  ;;  %3099 = vmatpush.bf16.msrb.mxu3 %v6611_v32  ;;  %v9621_v3 = vld [vmem:[#allocation5 + $0x564] sm:$0xf0] }
  0xd9   :  { %v7852_v30 = vld [vmem:[#allocation5 + $0xc20] sm:$0xf0]  ;;  %v7250_v4 = vld [vmem:[#allocation5 + $0x748] sm:$0xf]  ;;  %v6995_v11 = vor.u32 %v9621_v3, %v6994_v2 }
  0xda   :  { %v7855_v46 = vor.u32 %v9832_v29, %v7852_v30  ;;  %3061 = vmatpush.bf16.msrb.mxu0 %v7599_v42  ;;  %v9685_v6 = vld [vmem:[#allocation5 + $0x764] sm:$0xf0] }
  0xdb   :  { %3087 = vmatpush.bf16.msrb.mxu2 %v6323_v47  ;;  %v7506_v7 = vld [vmem:[#allocation5 + $0x948] sm:$0xf]  ;;  %v7251_v12 = vor.u32 %v9685_v6, %v7250_v4 }
  0xdc   :  { %3074 = vmatpush.bf16.msrb.mxu1 %v7855_v46  ;;  %3100 = vmatpush.bf16.msrb.mxu3 %v6579_v50  ;;  %v9749_v8 = vld [vmem:[#allocation5 + $0x964] sm:$0xf0] }
  0xdd   :  { %3062 = vmatmul.bf16.vlgmr.msrb.gmra.mxu0 %v10621_v41  ;;  %v7762_v9 = vld [vmem:[#allocation5 + $0xb48] sm:$0xf]  ;;  %v7507_v13 = vor.u32 %v9749_v8, %v7506_v7 }
  0xde   :  { %3106 = vmatpush.bf16.msra.mxu0 %v7059_v51  ;;  %v9813_v10 = vld [vmem:[#allocation5 + $0xb64] sm:$0xf0]  ;;  %3088 = vmatmul.bf16.vlgmr.msrb.gmra.mxu2 %v10607_v19 }
  0xdf   :  { %3132 = vmatpush.bf16.msra.mxu2 %v7571_v53  ;;  %3075 = vmatmul.bf16.vlgmr.msrb.gmra.mxu1 %v10617_v37  ;;  %v6962_v14 = vld [vmem:[#allocation5 + $0x508] sm:$0xf]  ;;  %v7763_v17 = vor.u32 %v9813_v10, %v7762_v9 }
  0xe0   :  { %3119 = vmatpush.bf16.msra.mxu1 %v7315_v52  ;;  %3145 = vmatpush.bf16.msra.mxu3 %v7827_v57  ;;  %v9613_v15 = vld [vmem:[#allocation5 + $0x524] sm:$0xf0] }
  0xe1   :  { %3101 = vmatmul.bf16.vlgmr.msrb.gmra.mxu3 %v10611_v22  ;;  %v7218_v16 = vld [vmem:[#allocation5 + $0x708] sm:$0xf]  ;;  %v6963_v27 = vor.u32 %v9613_v15, %v6962_v14 }
  0xe2   :  { %3107 = vmatpush.bf16.msra.mxu0 %v7027_v63  ;;  %v9677_v21 = vld [vmem:[#allocation5 + $0x724] sm:$0xf0] }
  0xe3   :  { %3133 = vmatpush.bf16.msra.mxu2 %v7539_v1  ;;  %v7474_v23 = vld [vmem:[#allocation5 + $0x908] sm:$0xf]  ;;  %v7219_v28 = vor.u32 %v9677_v21, %v7218_v16  ;;  %v9505_v16 = vld [vmem:[#allocation5 + $0x1cc] sm:$0xf] }
  0xe4   :  { %3120 = vmatpush.bf16.msra.mxu1 %v7283_v0  ;;  %3146 = vmatpush.bf16.msra.mxu3 %v7795_v5  ;;  %v9741_v24 = vld [vmem:[#allocation5 + $0x924] sm:$0xf0]  ;;  %v6548_v21 = vld [vmem:[#allocation5 + $0x1e8] sm:$0xf0] }
  0xe5   :  { %v7730_v25 = vld [vmem:[#allocation5 + $0xb08] sm:$0xf]  ;;  %v7475_v29 = vor.u32 %v9741_v24, %v7474_v23  ;;  %v9569_v23 = vld [vmem:[#allocation5 + $0x3cc] sm:$0xf] }
  0xe6   :  { %v9805_v26 = vld [vmem:[#allocation5 + $0xb24] sm:$0xf0]  ;;  %3108 = vmatpush.bf16.msra.mxu0 %v6995_v11  ;;  %v6804_v24 = vld [vmem:[#allocation5 + $0x3e8] sm:$0xf0] }
  0xe7   :  { %3134 = vmatpush.bf16.msra.mxu2 %v7507_v13  ;;  %v6930_v30 = vld [vmem:[#allocation5 + $0x4c8] sm:$0xf]  ;;  %v7731_v33 = vor.u32 %v9805_v26, %v7730_v25 }
  0xe8   :  { %3121 = vmatpush.bf16.msra.mxu1 %v7251_v12  ;;  %v9605_v31 = vld [vmem:[#allocation5 + $0x4e4] sm:$0xf0]  ;;  %3147 = vmatpush.bf16.msra.mxu3 %v7763_v17 }
  0xe9   :  { %v7186_v32 = vld [vmem:[#allocation5 + $0x6c8] sm:$0xf]  ;;  %v6931_v42 = vor.u32 %v9605_v31, %v6930_v30  ;;  %v6551_v31 = vor.u32 %v9505_v16, %v6548_v21  ;;  %v9601_v16 = vld [vmem:[#allocation5 + $0x4cc] sm:$0xf] }
  0xea   :  { %v9669_v34 = vld [vmem:[#allocation5 + $0x6e4] sm:$0xf0]  ;;  %3109 = vmatpush.bf16.msra.mxu0 %v6963_v27  ;;  %v9633_v27 = vld [vmem:[#allocation5 + $0x5cc] sm:$0xf] }
  0xeb   :  { %v7442_v35 = vld [vmem:[#allocation5 + $0x8c8] sm:$0xf]  ;;  %3135 = vmatpush.bf16.msra.mxu2 %v7475_v29  ;;  %v7187_v43 = vor.u32 %v9669_v34, %v7186_v32  ;;  %v6807_v32 = vor.u32 %v9569_v23, %v6804_v24 }
  0xec   :  { %v9733_v36 = vld [vmem:[#allocation5 + $0x8e4] sm:$0xf0]  ;;  %3122 = vmatpush.bf16.msra.mxu1 %v7219_v28  ;;  %3148 = vmatpush.bf16.msra.mxu3 %v7731_v33  ;;  %v7060_v28 = vld [vmem:[#allocation5 + $0x5e8] sm:$0xf0] }
  0xed   :  { %v7698_v38 = vld [vmem:[#allocation5 + $0xac8] sm:$0xf]  ;;  %v7443_v44 = vor.u32 %v9733_v36, %v7442_v35  ;;  %v9497_v35 = vld [vmem:[#allocation5 + $0x18c] sm:$0xf]  ;;  %v7063_v36 = vor.u32 %v9633_v27, %v7060_v28 }
  0xee   :  { %v9797_v39 = vld [vmem:[#allocation5 + $0xae4] sm:$0xf0]  ;;  %3110 = vmatpush.bf16.msra.mxu0 %v6931_v42  ;;  %v6772_v42 = vld [vmem:[#allocation5 + $0x3a8] sm:$0xf0] }
  0xef   :  { %v6898_v45 = vld [vmem:[#allocation5 + $0x488] sm:$0xf]  ;;  %v7699_v48 = vor.u32 %v9797_v39, %v7698_v38  ;;  %3136 = vmatpush.bf16.msra.mxu2 %v7443_v44  ;;  %v6516_v38 = vld [vmem:[#allocation5 + $0x1a8] sm:$0xf0] }
  0xf0   :  { %v9597_v46 = vld [vmem:[#allocation5 + $0x4a4] sm:$0xf0]  ;;  %3123 = vmatpush.bf16.msra.mxu1 %v7187_v43  ;;  %v9561_v39 = vld [vmem:[#allocation5 + $0x38c] sm:$0xf] }
  0xf1   :  { %v7154_v47 = vld [vmem:[#allocation5 + $0x688] sm:$0xf]  ;;  %v6899_v54 = vor.u32 %v9597_v46, %v6898_v45  ;;  %3149 = vmatpush.bf16.msra.mxu3 %v7699_v48  ;;  %v9625_v43 = vld [vmem:[#allocation5 + $0x58c] sm:$0xf]  ;;  %v6519_v46 = vor.u32 %v9497_v35, %v6516_v38 }
  0xf2   :  { %v9661_v49 = vld [vmem:[#allocation5 + $0x6a4] sm:$0xf0]  ;;  %v7028_v44 = vld [vmem:[#allocation5 + $0x5a8] sm:$0xf0] }
  0xf3   :  { %v7410_v50 = vld [vmem:[#allocation5 + $0x888] sm:$0xf]  ;;  %v7155_v55 = vor.u32 %v9661_v49, %v7154_v47  ;;  %3111 = vmatpush.bf16.msra.mxu0 %v6899_v54  ;;  %v6775_v47 = vor.u32 %v9561_v39, %v6772_v42  ;;  %v6740_v54 = vld [vmem:[#allocation5 + $0x368] sm:$0xf0] }
  0xf4   :  { %v9725_v51 = vld [vmem:[#allocation5 + $0x8a4] sm:$0xf0]  ;;  %v9465_v27 = vld [vmem:[#allocation5 + $0x8c] sm:$0xf] }
  0xf5   :  { %v7666_v52 = vld [vmem:[#allocation5 + $0xa88] sm:$0xf]  ;;  %v7411_v56 = vor.u32 %v9725_v51, %v7410_v50  ;;  %3124 = vmatpush.bf16.msra.mxu1 %v7155_v55  ;;  %v9489_v50 = vld [vmem:[#allocation5 + $0x14c] sm:$0xf]  ;;  %v7031_v51 = vor.u32 %v9625_v43, %v7028_v44 }
  0xf6   :  { %v9789_v53 = vld [vmem:[#allocation5 + $0xaa4] sm:$0xf0]  ;;  %v9617_v55 = vld [vmem:[#allocation5 + $0x54c] sm:$0xf] }
  0xf7   :  { %v6866_v57 = vld [vmem:[#allocation5 + $0x448] sm:$0xf]  ;;  %v7667_v60 = vor.u32 %v9789_v53, %v7666_v52  ;;  %3137 = vmatpush.bf16.msra.mxu2 %v7411_v56  ;;  %v6484_v52 = vld [vmem:[#allocation5 + $0x168] sm:$0xf0] }
  0xf8   :  { %v9589_v58 = vld [vmem:[#allocation5 + $0x464] sm:$0xf0]  ;;  %v9553_v53 = vld [vmem:[#allocation5 + $0x34c] sm:$0xf] }
  0xf9   :  { %v7122_v59 = vld [vmem:[#allocation5 + $0x648] sm:$0xf]  ;;  %v6867_v2 = vor.u32 %v9589_v58, %v6866_v57  ;;  %3150 = vmatpush.bf16.msra.mxu3 %v7667_v60  ;;  %v6996_v56 = vld [vmem:[#allocation5 + $0x568] sm:$0xf0]  ;;  %v6487_v58 = vor.u32 %v9489_v50, %v6484_v52 }
  0xfa   :  { %v9653_v61 = vld [vmem:[#allocation5 + $0x664] sm:$0xf0]  ;;  %v9457_v44 = vld [vmem:[#allocation5 + $0x4c] sm:$0xf] }
  0xfb   :  { %v7378_v62 = vld [vmem:[#allocation5 + $0x848] sm:$0xf]  ;;  %v7123_v5 = vor.u32 %v9653_v61, %v7122_v59  ;;  %3112 = vmatpush.bf16.msra.mxu0 %v6867_v2  ;;  %v6743_v59 = vor.u32 %v9553_v53, %v6740_v54  ;;  %v6708_v2 = vld [vmem:[#allocation5 + $0x328] sm:$0xf0] }
  0xfc   :  { %v9717_v63 = vld [vmem:[#allocation5 + $0x864] sm:$0xf0]  ;;  %v6612_v50 = vld [vmem:[#allocation5 + $0x268] sm:$0xf0] }
  0xfd   :  { %v7634_v0 = vld [vmem:[#allocation5 + $0xa48] sm:$0xf]  ;;  %v7379_v6 = vor.u32 %v9717_v63, %v7378_v62  ;;  %3125 = vmatpush.bf16.msra.mxu1 %v7123_v5  ;;  %v9481_v62 = vld [vmem:[#allocation5 + $0x10c] sm:$0xf]  ;;  %v6999_v63 = vor.u32 %v9617_v55, %v6996_v56 }
  0xfe   :  { %v9781_v1 = vld [vmem:[#allocation5 + $0xa64] sm:$0xf0]  ;;  %v6868_v52 = vld [vmem:[#allocation5 + $0x468] sm:$0xf0] }
  0xff   :  { %v6834_v3 = vld [vmem:[#allocation5 + $0x408] sm:$0xf]  ;;  %v7635_v10 = vor.u32 %v9781_v1, %v7634_v0  ;;  %3138 = vmatpush.bf16.msra.mxu2 %v7379_v6  ;;  %v6452_v0 = vld [vmem:[#allocation5 + $0x128] sm:$0xf0] }
 0x100   :  { %v9581_v4 = vld [vmem:[#allocation5 + $0x424] sm:$0xf0]  ;;  %v9545_v1 = vld [vmem:[#allocation5 + $0x30c] sm:$0xf] }
 0x101   :  { %v7090_v7 = vld [vmem:[#allocation5 + $0x608] sm:$0xf]  ;;  %v6835_v17 = vor.u32 %v9581_v4, %v6834_v3  ;;  %3151 = vmatpush.bf16.msra.mxu3 %v7635_v10  ;;  %v9609_v3 = vld [vmem:[#allocation5 + $0x50c] sm:$0xf] }
 0x102   :  { %v9645_v8 = vld [vmem:[#allocation5 + $0x624] sm:$0xf0]  ;;  %v6964_v4 = vld [vmem:[#allocation5 + $0x528] sm:$0xf0] }
 0x103   :  { %v7346_v9 = vld [vmem:[#allocation5 + $0x808] sm:$0xf]  ;;  %v7091_v25 = vor.u32 %v9645_v8, %v7090_v7  ;;  %3113 = vmatpush.bf16.msra.mxu0 %v6835_v17  ;;  %v6455_v7 = vor.u32 %v9481_v62, %v6452_v0  ;;  %v6711_v8 = vor.u32 %v9545_v1, %v6708_v2  ;;  %v9473_v10 = vld [vmem:[#allocation5 + $0xcc] sm:$0xf]  ;;  %v2933_v62 = vpop.f32.mrf.mxu2 }
 0x104   :  { %v9709_v11 = vld [vmem:[#allocation5 + $0x824] sm:$0xf0]  ;;  %v6932_v17 = vld [vmem:[#allocation5 + $0x4e8] sm:$0xf0] }
 0x105   :  { %v7602_v12 = vld [vmem:[#allocation5 + $0xa08] sm:$0xf]  ;;  %v7347_v26 = vor.u32 %v9709_v11, %v7346_v9  ;;  %3126 = vmatpush.bf16.msra.mxu1 %v7091_v25  ;;  %v6420_v11 = vld [vmem:[#allocation5 + $0xe8] sm:$0xf0] }
 0x106   :  { %v9773_v13 = vld [vmem:[#allocation5 + $0xa24] sm:$0xf0]  ;;  %3114 = vmatmul.bf16.vlgmr.msra.gmra.mxu0 %v10605_v18  ;;  %v6423_v24 = vor.u32 %v9473_v10, %v6420_v11  ;;  %v6580_v0 = vld [vmem:[#allocation5 + $0x228] sm:$0xf0] }
 0x107   :  { %v8082_v14 = vld [vmem:[#allocation5 + $0xdc8] sm:$0xf]  ;;  %v7603_v29 = vor.u32 %v9773_v13, %v7602_v12  ;;  %3139 = vmatpush.bf16.msra.mxu2 %v7347_v26  ;;  %v6967_v12 = vor.u32 %v9609_v3, %v6964_v4  ;;  %v9537_v13 = vld [vmem:[#allocation5 + $0x2cc] sm:$0xf]  ;;  %v2946_v4 = vpop.f32.mrf.mxu3 }
 0x108   :  { %v9893_v15 = vld [vmem:[#allocation5 + $0xde4] sm:$0xf0]  ;;  %3127 = vmatmul.bf16.vlgmr.msra.gmra.mxu1 %v10609_v20  ;;  %v9577_v1 = vld [vmem:[#allocation5 + $0x40c] sm:$0xf] }
 0x109   :  { %v8083_v30 = vor.u32 %v9893_v15, %v8082_v14  ;;  %v8050_v33 = vld [vmem:[#allocation5 + $0xd88] sm:$0xf]  ;;  %3152 = vmatpush.bf16.msra.mxu3 %v7603_v29  ;;  %3171 = vmatpush.bf16.msrb.mxu1 %v6551_v31  ;;  %v6676_v14 = vld [vmem:[#allocation5 + $0x2e8] sm:$0xf0]  ;;  %v10639_v15 = vld [vmem:[#allocation7] sm:$0xff]  ;;  %v6935_v29 = vor.u32 %v9601_v16, %v6932_v17 }
 0x10a   :  { %v9885_v34 = vld [vmem:[#allocation5 + $0xda4] sm:$0xf0]  ;;  %3140 = vmatmul.bf16.vlgmr.msra.gmra.mxu2 %v10619_v40  ;;  %v6679_v25 = vor.u32 %v9537_v13, %v6676_v14  ;;  %v617_v28 = vperm.slane %v10639_v15, 0  ;;  %v9529_v31 = vld [vmem:[#allocation5 + $0x28c] sm:$0xf] }
 0x10b   :  { %3158 = vmatpush.bf16.msrb.mxu0 %v8083_v30  ;;  %v8051_v45 = vor.u32 %v9885_v34, %v8050_v33  ;;  %3184 = vmatpush.bf16.msrb.mxu2 %v6807_v32  ;;  %v8018_v48 = vld [vmem:[#allocation5 + $0xd48] sm:$0xf]  ;;  %v6388_v30 = vld [vmem:[#allocation5 + $0xa8] sm:$0xf0] }
 0x10c   :  { %v9877_v49 = vld [vmem:[#allocation5 + $0xd64] sm:$0xf0]  ;;  %3153 = vmatmul.bf16.vlgmr.msra.gmra.mxu3 %v10621_v41  ;;  %v6644_v32 = vld [vmem:[#allocation5 + $0x2a8] sm:$0xf0]  ;;  %v6391_v38 = vor.u32 %v9465_v27, %v6388_v30 }
 0x10d   :  { %3197 = vmatpush.bf16.msrb.mxu3 %v7063_v36  ;;  %v8019_v57 = vor.u32 %v9877_v49, %v8018_v48  ;;  %3172 = vmatpush.bf16.msrb.mxu1 %v6519_v46  ;;  %v7986_v60 = vld [vmem:[#allocation5 + $0xd08] sm:$0xf]  ;;  %v9593_v33 = vld [vmem:[#allocation5 + $0x48c] sm:$0xf]  ;;  %v2907_v36 = vpop.f32.mrf.mxu0  ;;  %v6647_v39 = vor.u32 %v9529_v31, %v6644_v32  ;;  %v2920_v46 = vpop.f32.mrf.mxu1 }
 0x10e   :  { %v9869_v61 = vld [vmem:[#allocation5 + $0xd24] sm:$0xf0]  ;;  %v6900_v34 = vld [vmem:[#allocation5 + $0x4a8] sm:$0xf0] }
 0x10f   :  { %3159 = vmatpush.bf16.msrb.mxu0 %v8051_v45  ;;  %3185 = vmatpush.bf16.msrb.mxu2 %v6775_v47  ;;  %v7987_v5 = vor.u32 %v9869_v61, %v7986_v60  ;;  %v7954_v6 = vld [vmem:[#allocation5 + $0xcc8] sm:$0xf]  ;;  %v2908_v45 = vadd.f32 %v2907_v36, %v617_v28  ;;  %v6903_v47 = vor.u32 %v9593_v33, %v6900_v34  ;;  %v6356_v48 = vld [vmem:[#allocation5 + $0x68] sm:$0xf0] }
 0x110   :  { %v9861_v9 = vld [vmem:[#allocation5 + $0xce4] sm:$0xf0]  ;;  %v9521_v49 = vld [vmem:[#allocation5 + $0x24c] sm:$0xf] }
 0x111   :  { %3198 = vmatpush.bf16.msrb.mxu3 %v7031_v51  ;;  %3173 = vmatpush.bf16.msrb.mxu1 %v6487_v58  ;;  %v7955_v21 = vor.u32 %v9861_v9, %v7954_v6  ;;  %v7922_v23 = vld [vmem:[#allocation5 + $0xc88] sm:$0xf]  ;;  %v9585_v51 = vld [vmem:[#allocation5 + $0x44c] sm:$0xf]  ;;  %v2921_v53 = vadd.f32 %v2920_v46, %v2908_v45  ;;  %v6615_v58 = vor.u32 %v9521_v49, %v6612_v50 }
 0x112   :  { %v9853_v26 = vld [vmem:[#allocation5 + $0xca4] sm:$0xf0]  ;;  %v6324_v60 = vld [vmem:[#allocation5 + $0x28] sm:$0xf0] }
 0x113   :  { %3160 = vmatpush.bf16.msrb.mxu0 %v8019_v57  ;;  %3186 = vmatpush.bf16.msrb.mxu2 %v6743_v59  ;;  %v7923_v35 = vor.u32 %v9853_v26, %v7922_v23  ;;  %v7890_v42 = vld [vmem:[#allocation5 + $0xc48] sm:$0xf]  ;;  %v6359_v57 = vor.u32 %v9457_v44, %v6356_v48  ;;  %v9449_v59 = vld [vmem:[#allocation5 + $0xc] sm:$0xf]  ;;  %v2934_v3 = vadd.f32 %v2933_v62, %v2921_v53 }
 0x114   :  { %v9845_v43 = vld [vmem:[#allocation5 + $0xc64] sm:$0xf0]  ;;  %v9513_v61 = vld [vmem:[#allocation5 + $0x20c] sm:$0xf]  ;;  %v6327_v14 = vor.u32 %v9449_v59, %v6324_v60 }
 0x115   :  { %3199 = vmatpush.bf16.msrb.mxu3 %v6999_v63  ;;  %3174 = vmatpush.bf16.msrb.mxu1 %v6455_v7  ;;  %v7891_v54 = vor.u32 %v9845_v43, %v7890_v42  ;;  %v7858_v55 = vld [vmem:[#allocation5 + $0xc08] sm:$0xf]  ;;  %v6871_v63 = vor.u32 %v9585_v51, %v6868_v52  ;;  %v6836_v2 = vld [vmem:[#allocation5 + $0x428] sm:$0xf0]  ;;  %v2909_v13 = vpop.f32.mrf.mxu0  ;;  %v6583_v16 = vor.u32 %v9513_v61, %v6580_v0  ;;  %v2922_v23 = vpop.f32.mrf.mxu1 }
 0x116   :  { %v9837_v56 = vld [vmem:[#allocation5 + $0xc24] sm:$0xf0]  ;;  %v7316_v6 = vld [vmem:[#allocation5 + $0x7e8] sm:$0xf0]  ;;  %v2948_v42 = vpop.f32.mrf.mxu3 }
 0x117   :  { %3161 = vmatpush.bf16.msrb.mxu0 %v7987_v5  ;;  %3187 = vmatpush.bf16.msrb.mxu2 %v6711_v8  ;;  %v9697_v5 = vld [vmem:[#allocation5 + $0x7cc] sm:$0xf]  ;;  %v7859_v8 = vor.u32 %v9837_v56, %v7858_v55 }
 0x118   :  { %v9761_v7 = vld [vmem:[#allocation5 + $0x9cc] sm:$0xf] }
 0x119   :  { %3200 = vmatpush.bf16.msrb.mxu3 %v6967_v12  ;;  %3175 = vmatpush.bf16.msrb.mxu1 %v6423_v24  ;;  %v7572_v9 = vld [vmem:[#allocation5 + $0x9e8] sm:$0xf0]  ;;  %v10642_v12 = vadd.f32 %v2946_v4, %v2934_v3  ;;  %v6839_v24 = vor.u32 %v9577_v1, %v6836_v2 }
 0x11a   :  { %v9825_v10 = vld [vmem:[#allocation5 + $0xbcc] sm:$0xf]  ;;  %v7575_v26 = vor.u32 %v9761_v7, %v7572_v9 }
 0x11b   :  { %3162 = vmatpush.bf16.msrb.mxu0 %v7955_v21  ;;  %3188 = vmatpush.bf16.msrb.mxu2 %v6679_v25  ;;  %v7828_v11 = vld [vmem:[#allocation5 + $0xbe8] sm:$0xf0]  ;;  %v7319_v25 = vor.u32 %v9697_v5, %v7316_v6 }
 0x11c   :  { %v9889_v17 = vld [vmem:[#allocation5 + $0xdcc] sm:$0xf]  ;;  %v7831_v27 = vor.u32 %v9825_v10, %v7828_v11 }
 0x11d   :  { %3201 = vmatpush.bf16.msrb.mxu3 %v6935_v29  ;;  %3176 = vmatpush.bf16.msrb.mxu1 %v6391_v38  ;;  %v8084_v21 = vld [vmem:[#allocation5 + $0xde8] sm:$0xf0]  ;;  %v2935_v38 = vpop.f32.mrf.mxu2  ;;  %v2959_v3 = vpop.f32.mrf.mxu0 }
 0x11e   :  { %v9689_v28 = vld [vmem:[#allocation5 + $0x78c] sm:$0xf]  ;;  %v8087_v31 = vor.u32 %v9889_v17, %v8084_v21  ;;  %v2972_v4 = vpop.f32.mrf.mxu1  ;;  %v2960_v10 = vadd.f32 %v2959_v3, %v10642_v12  ;;  %v10651_v38 = vpop.f32.mrf.mxu3 }
 0x11f   :  { %3163 = vmatpush.bf16.msrb.mxu0 %v7923_v35  ;;  %3189 = vmatpush.bf16.msrb.mxu2 %v6647_v39  ;;  %v7284_v29 = vld [vmem:[#allocation5 + $0x7a8] sm:$0xf0] }
 0x120   :  { %v9753_v30 = vld [vmem:[#allocation5 + $0x98c] sm:$0xf]  ;;  %v7287_v39 = vor.u32 %v9689_v28, %v7284_v29  ;;  %v2973_v23 = vadd.f32 %v2972_v4, %v2960_v10  ;;  %v6554_v4 = vld [vmem:[#allocation5 + $0x1d0] sm:$0xf] }
 0x121   :  { %3202 = vmatpush.bf16.msrb.mxu3 %v6903_v47  ;;  %3177 = vmatpush.bf16.msrb.mxu1 %v6359_v57  ;;  %v7540_v32 = vld [vmem:[#allocation5 + $0x9a8] sm:$0xf0]  ;;  %v7066_v10 = vld [vmem:[#allocation5 + $0x5d0] sm:$0xf] }
 0x122   :  { %v9817_v33 = vld [vmem:[#allocation5 + $0xb8c] sm:$0xf]  ;;  %v7543_v43 = vor.u32 %v9753_v30, %v7540_v32 }
 0x123   :  { %3164 = vmatpush.bf16.msrb.mxu0 %v7891_v54  ;;  %3190 = vmatpush.bf16.msrb.mxu2 %v6615_v58  ;;  %v7796_v34 = vld [vmem:[#allocation5 + $0xba8] sm:$0xf0] }
 0x124   :  { %v9881_v35 = vld [vmem:[#allocation5 + $0xd8c] sm:$0xf]  ;;  %v7799_v44 = vor.u32 %v9817_v33, %v7796_v34 }
 0x125   :  { %3203 = vmatpush.bf16.msrb.mxu3 %v6871_v63  ;;  %3178 = vmatpush.bf16.msrb.mxu1 %v6327_v14  ;;  %v8052_v36 = vld [vmem:[#allocation5 + $0xda8] sm:$0xf0]  ;;  %v2985_v30 = vpop.f32.mrf.mxu2  ;;  %v2961_v42 = vpop.f32.mrf.mxu0 }
 0x126   :  { %v9681_v45 = vld [vmem:[#allocation5 + $0x74c] sm:$0xf]  ;;  %v8055_v48 = vor.u32 %v9881_v35, %v8052_v36  ;;  %v10649_v34 = vadd.f32 %v2985_v30, %v2973_v23  ;;  %v9566_v30 = vld [vmem:[#allocation5 + $0x3ac] sm:$0xf0] }
 0x127   :  { %3165 = vmatpush.bf16.msrb.mxu0 %v7859_v8  ;;  %3191 = vmatpush.bf16.msrb.mxu2 %v6583_v16  ;;  %v7252_v46 = vld [vmem:[#allocation5 + $0x768] sm:$0xf0] }
 0x128   :  { %v9745_v47 = vld [vmem:[#allocation5 + $0x94c] sm:$0xf]  ;;  %v7255_v54 = vor.u32 %v9681_v45, %v7252_v46  ;;  %3179 = vmatmul.bf16.vlgmr.msrb.gmra.mxu1 %v10607_v19 }
 0x129   :  { %3204 = vmatpush.bf16.msrb.mxu3 %v6839_v24  ;;  %3223 = vmatpush.bf16.msra.mxu1 %v7575_v26  ;;  %v7508_v49 = vld [vmem:[#allocation5 + $0x968] sm:$0xf0] }
 0x12a   :  { %3166 = vmatmul.bf16.vlgmr.msrb.gmra.mxu0 %v10617_v37  ;;  %v9809_v50 = vld [vmem:[#allocation5 + $0xb4c] sm:$0xf]  ;;  %3192 = vmatmul.bf16.vlgmr.msrb.gmra.mxu2 %v10611_v22  ;;  %v7511_v55 = vor.u32 %v9745_v47, %v7508_v49 }
 0x12b   :  { %3210 = vmatpush.bf16.msra.mxu0 %v7319_v25  ;;  %3236 = vmatpush.bf16.msra.mxu2 %v7831_v27  ;;  %v7764_v51 = vld [vmem:[#allocation5 + $0xb68] sm:$0xf0] }
 0x12c   :  { %v9873_v52 = vld [vmem:[#allocation5 + $0xd4c] sm:$0xf]  ;;  %3205 = vmatmul.bf16.vlgmr.msrb.gmra.mxu3 %v10605_v18  ;;  %v7767_v56 = vor.u32 %v9809_v50, %v7764_v51 }
 0x12d   :  { %3249 = vmatpush.bf16.msra.mxu3 %v8087_v31  ;;  %v8020_v53 = vld [vmem:[#allocation5 + $0xd68] sm:$0xf0]  ;;  %3224 = vmatpush.bf16.msra.mxu1 %v7543_v43  ;;  %v2974_v43 = vpop.f32.mrf.mxu1 }
 0x12e   :  { %v9673_v57 = vld [vmem:[#allocation5 + $0x70c] sm:$0xf]  ;;  %v8023_v60 = vor.u32 %v9873_v52, %v8020_v53  ;;  %v9494_v43 = vld [vmem:[#allocation5 + $0x16c] sm:$0xf0] }
 0x12f   :  { %3211 = vmatpush.bf16.msra.mxu0 %v7287_v39  ;;  %3237 = vmatpush.bf16.msra.mxu2 %v7799_v44  ;;  %v7220_v58 = vld [vmem:[#allocation5 + $0x728] sm:$0xf0] }
 0x130   :  { %v9737_v59 = vld [vmem:[#allocation5 + $0x90c] sm:$0xf]  ;;  %v7223_v2 = vor.u32 %v9673_v57, %v7220_v58 }
 0x131   :  { %3250 = vmatpush.bf16.msra.mxu3 %v8055_v48  ;;  %v7476_v61 = vld [vmem:[#allocation5 + $0x928] sm:$0xf0]  ;;  %3225 = vmatpush.bf16.msra.mxu1 %v7511_v55 }
 0x132   :  { %v9801_v62 = vld [vmem:[#allocation5 + $0xb0c] sm:$0xf]  ;;  %v7479_v5 = vor.u32 %v9737_v59, %v7476_v61 }
 0x133   :  { %v7732_v63 = vld [vmem:[#allocation5 + $0xb28] sm:$0xf0]  ;;  %3212 = vmatpush.bf16.msra.mxu0 %v7255_v54  ;;  %3238 = vmatpush.bf16.msra.mxu2 %v7767_v56 }
 0x134   :  { %v9865_v0 = vld [vmem:[#allocation5 + $0xd0c] sm:$0xf]  ;;  %v7735_v6 = vor.u32 %v9801_v62, %v7732_v63  ;;  %v2987_v63 = vpop.f32.mrf.mxu2 }
 0x135   :  { %v7988_v1 = vld [vmem:[#allocation5 + $0xd28] sm:$0xf0]  ;;  %3251 = vmatpush.bf16.msra.mxu3 %v8023_v60  ;;  %3226 = vmatpush.bf16.msra.mxu1 %v7479_v5  ;;  %v9510_v5 = vld [vmem:[#allocation5 + $0x1ec] sm:$0xf0] }
 0x136   :  { %v9665_v7 = vld [vmem:[#allocation5 + $0x6cc] sm:$0xf]  ;;  %v7991_v11 = vor.u32 %v9865_v0, %v7988_v1  ;;  %v6555_v23 = vor.u32 %v9510_v5, %v6554_v4  ;;  %v7226_v63 = vld [vmem:[#allocation5 + $0x710] sm:$0xf] }
 0x137   :  { %v7188_v8 = vld [vmem:[#allocation5 + $0x6e8] sm:$0xf0]  ;;  %3213 = vmatpush.bf16.msra.mxu0 %v7223_v2  ;;  %3239 = vmatpush.bf16.msra.mxu2 %v7735_v6  ;;  %v6810_v6 = vld [vmem:[#allocation5 + $0x3d0] sm:$0xf] }
 0x138   :  { %v9729_v9 = vld [vmem:[#allocation5 + $0x8cc] sm:$0xf]  ;;  %v7191_v24 = vor.u32 %v9665_v7, %v7188_v8  ;;  %v3000_v7 = vpop.f32.mrf.mxu3  ;;  %v6426_v5 = vld [vmem:[#allocation5 + $0xd0] sm:$0xf] }
 0x139   :  { %v7444_v13 = vld [vmem:[#allocation5 + $0x8e8] sm:$0xf0]  ;;  %3252 = vmatpush.bf16.msra.mxu3 %v7991_v11  ;;  %v9638_v11 = vld [vmem:[#allocation5 + $0x5ec] sm:$0xf0] }
 0x13a   :  { %v9793_v14 = vld [vmem:[#allocation5 + $0xacc] sm:$0xf]  ;;  %v7447_v25 = vor.u32 %v9729_v9, %v7444_v13  ;;  %v9574_v9 = vld [vmem:[#allocation5 + $0x3ec] sm:$0xf0] }
 0x13b   :  { %v7700_v16 = vld [vmem:[#allocation5 + $0xae8] sm:$0xf0]  ;;  %3214 = vmatpush.bf16.msra.mxu0 %v7191_v24  ;;  %v6811_v24 = vor.u32 %v9574_v9, %v6810_v6  ;;  %v9478_v6 = vld [vmem:[#allocation5 + $0xec] sm:$0xf0] }
 0x13c   :  { %v9857_v17 = vld [vmem:[#allocation5 + $0xccc] sm:$0xf]  ;;  %v7703_v26 = vor.u32 %v9793_v14, %v7700_v16  ;;  %3227 = vmatpush.bf16.msra.mxu1 %v7447_v25  ;;  %v7322_v16 = vld [vmem:[#allocation5 + $0x7d0] sm:$0xf]  ;;  %v7067_v25 = vor.u32 %v9638_v11, %v7066_v10 }
 0x13d   :  { %v7956_v21 = vld [vmem:[#allocation5 + $0xce8] sm:$0xf0]  ;;  %v9542_v10 = vld [vmem:[#allocation5 + $0x2ec] sm:$0xf0] }
 0x13e   :  { %v9657_v27 = vld [vmem:[#allocation5 + $0x68c] sm:$0xf]  ;;  %v7959_v12 = vor.u32 %v9857_v17, %v7956_v21  ;;  %3240 = vmatpush.bf16.msra.mxu2 %v7703_v26  ;;  %v9702_v17 = vld [vmem:[#allocation5 + $0x7ec] sm:$0xf0] }
 0x13f   :  { %v7156_v28 = vld [vmem:[#allocation5 + $0x6a8] sm:$0xf0]  ;;  %v6522_v26 = vld [vmem:[#allocation5 + $0x190] sm:$0xf] }
 0x140   :  { %v9721_v29 = vld [vmem:[#allocation5 + $0x88c] sm:$0xf]  ;;  %v7159_v39 = vor.u32 %v9657_v27, %v7156_v28  ;;  %3253 = vmatpush.bf16.msra.mxu3 %v7959_v12  ;;  %v9502_v27 = vld [vmem:[#allocation5 + $0x1ac] sm:$0xf0] }
 0x141   :  { %v7412_v31 = vld [vmem:[#allocation5 + $0x8a8] sm:$0xf0]  ;;  %v6778_v28 = vld [vmem:[#allocation5 + $0x390] sm:$0xf] }
 0x142   :  { %v9785_v32 = vld [vmem:[#allocation5 + $0xa8c] sm:$0xf]  ;;  %v7415_v44 = vor.u32 %v9721_v29, %v7412_v31  ;;  %3215 = vmatpush.bf16.msra.mxu0 %v7159_v39  ;;  %v7323_v29 = vor.u32 %v9702_v17, %v7322_v16  ;;  %v7034_v12 = vld [vmem:[#allocation5 + $0x590] sm:$0xf]  ;;  %v6779_v39 = vor.u32 %v9566_v30, %v6778_v28  ;;  %v3037_v28 = vpop.f32.mrf.mxu2 }
 0x143   :  { %v7668_v33 = vld [vmem:[#allocation5 + $0xaa8] sm:$0xf0]  ;;  %v9630_v31 = vld [vmem:[#allocation5 + $0x5ac] sm:$0xf0] }
 0x144   :  { %v9849_v35 = vld [vmem:[#allocation5 + $0xc8c] sm:$0xf]  ;;  %v7671_v45 = vor.u32 %v9785_v32, %v7668_v33  ;;  %3228 = vmatpush.bf16.msra.mxu1 %v7415_v44  ;;  %v7290_v32 = vld [vmem:[#allocation5 + $0x790] sm:$0xf]  ;;  %v7035_v42 = vor.u32 %v9630_v31, %v7034_v12 }
 0x145   :  { %v7924_v36 = vld [vmem:[#allocation5 + $0xca8] sm:$0xf0]  ;;  %v9694_v33 = vld [vmem:[#allocation5 + $0x7ac] sm:$0xf0] }
 0x146   :  { %v9649_v46 = vld [vmem:[#allocation5 + $0x64c] sm:$0xf]  ;;  %v7927_v49 = vor.u32 %v9849_v35, %v7924_v36  ;;  %3241 = vmatpush.bf16.msra.mxu2 %v7671_v45  ;;  %v6523_v35 = vor.u32 %v9502_v27, %v6522_v26  ;;  %v6490_v36 = vld [vmem:[#allocation5 + $0x150] sm:$0xf]  ;;  %v618_v45 = vperm.slane %v10639_v15, 1 }
 0x147   :  { %v7124_v47 = vld [vmem:[#allocation5 + $0x668] sm:$0xf0]  ;;  %v6746_v44 = vld [vmem:[#allocation5 + $0x350] sm:$0xf] }
 0x148   :  { %v9713_v48 = vld [vmem:[#allocation5 + $0x84c] sm:$0xf]  ;;  %v7127_v55 = vor.u32 %v9649_v46, %v7124_v47  ;;  %3254 = vmatpush.bf16.msra.mxu3 %v7927_v49  ;;  %v7291_v46 = vor.u32 %v9694_v33, %v7290_v32  ;;  %v9558_v47 = vld [vmem:[#allocation5 + $0x36c] sm:$0xf0]  ;;  %v3050_v33 = vpop.f32.mrf.mxu3 }
 0x149   :  { %v7380_v50 = vld [vmem:[#allocation5 + $0x868] sm:$0xf0]  ;;  %v9622_v49 = vld [vmem:[#allocation5 + $0x56c] sm:$0xf0] }
 0x14a   :  { %v9777_v51 = vld [vmem:[#allocation5 + $0xa4c] sm:$0xf]  ;;  %v7383_v58 = vor.u32 %v9713_v48, %v7380_v50  ;;  %3216 = vmatpush.bf16.msra.mxu0 %v7127_v55  ;;  %v7002_v48 = vld [vmem:[#allocation5 + $0x550] sm:$0xf]  ;;  %v2999_v55 = vadd.f32 %v10651_v38, %v618_v45 }
 0x14b   :  { %v7636_v52 = vld [vmem:[#allocation5 + $0xa68] sm:$0xf0]  ;;  %v7258_v50 = vld [vmem:[#allocation5 + $0x750] sm:$0xf] }
 0x14c   :  { %v9841_v53 = vld [vmem:[#allocation5 + $0xc4c] sm:$0xf]  ;;  %v7639_v59 = vor.u32 %v9777_v51, %v7636_v52  ;;  %3229 = vmatpush.bf16.msra.mxu1 %v7383_v58  ;;  %v9686_v51 = vld [vmem:[#allocation5 + $0x76c] sm:$0xf0]  ;;  %v6491_v52 = vor.u32 %v9494_v43, %v6490_v36 }
 0x14d   :  { %v7892_v54 = vld [vmem:[#allocation5 + $0xc68] sm:$0xf0]  ;;  %v6714_v58 = vld [vmem:[#allocation5 + $0x310] sm:$0xf] }
 0x14e   :  { %v9641_v56 = vld [vmem:[#allocation5 + $0x60c] sm:$0xf]  ;;  %v7895_v0 = vor.u32 %v9841_v53, %v7892_v54  ;;  %3242 = vmatpush.bf16.msra.mxu2 %v7639_v59  ;;  %v6747_v53 = vor.u32 %v9558_v47, %v6746_v44  ;;  %v7003_v54 = vor.u32 %v9622_v49, %v7002_v48  ;;  %v7259_v59 = vor.u32 %v9686_v51, %v7258_v50  ;;  %v6682_v38 = vld [vmem:[#allocation5 + $0x2d0] sm:$0xf] }
 0x14f   :  { %v7092_v57 = vld [vmem:[#allocation5 + $0x628] sm:$0xf0]  ;;  %v6938_v11 = vld [vmem:[#allocation5 + $0x4d0] sm:$0xf] }
 0x150   :  { %v9705_v60 = vld [vmem:[#allocation5 + $0x80c] sm:$0xf]  ;;  %v7095_v8 = vor.u32 %v9641_v56, %v7092_v57  ;;  %3255 = vmatpush.bf16.msra.mxu3 %v7895_v0  ;;  %v6458_v56 = vld [vmem:[#allocation5 + $0x110] sm:$0xf] }
 0x151   :  { %v7348_v61 = vld [vmem:[#allocation5 + $0x828] sm:$0xf0]  ;;  %v9486_v57 = vld [vmem:[#allocation5 + $0x12c] sm:$0xf0] }
 0x152   :  { %v9769_v62 = vld [vmem:[#allocation5 + $0xa0c] sm:$0xf]  ;;  %v7351_v13 = vor.u32 %v9705_v60, %v7348_v61  ;;  %3217 = vmatpush.bf16.msra.mxu0 %v7095_v8  ;;  %v9550_v60 = vld [vmem:[#allocation5 + $0x32c] sm:$0xf0]  ;;  %v3024_v8 = vpop.f32.mrf.mxu1 }
 0x153   :  { %v7604_v1 = vld [vmem:[#allocation5 + $0xa28] sm:$0xf0]  ;;  %v6970_v61 = vld [vmem:[#allocation5 + $0x510] sm:$0xf] }
 0x154   :  { %v9833_v2 = vld [vmem:[#allocation5 + $0xc0c] sm:$0xf]  ;;  %v7607_v14 = vor.u32 %v9769_v62, %v7604_v1  ;;  %3230 = vmatpush.bf16.msra.mxu1 %v7351_v13  ;;  %v9614_v62 = vld [vmem:[#allocation5 + $0x52c] sm:$0xf0]  ;;  %v6459_v1 = vor.u32 %v9486_v57, %v6458_v56 }
 0x155   :  { %v7860_v3 = vld [vmem:[#allocation5 + $0xc28] sm:$0xf0]  ;;  %3218 = vmatmul.bf16.vlgmr.msra.gmra.mxu0 %v10609_v20  ;;  %v9678_v0 = vld [vmem:[#allocation5 + $0x72c] sm:$0xf0]  ;;  %v6971_v4 = vor.u32 %v9614_v62, %v6970_v61 }
 0x156   :  { %v7863_v21 = vor.u32 %v9833_v2, %v7860_v3  ;;  %3243 = vmatpush.bf16.msra.mxu2 %v7607_v14  ;;  %3262 = vmatpush.bf16.msrb.mxu0 %v6555_v23  ;;  %v3011_v2 = vpop.f32.mrf.mxu0  ;;  %v6715_v3 = vor.u32 %v9550_v60, %v6714_v58  ;;  %v7227_v9 = vor.u32 %v9678_v0, %v7226_v63  ;;  %v9606_v13 = vld [vmem:[#allocation5 + $0x4ec] sm:$0xf0]  ;;  %v3039_v0 = vpop.f32.mrf.mxu2 }
 0x157   :  { %3231 = vmatmul.bf16.vlgmr.msra.gmra.mxu1 %v10619_v40  ;;  %v3012_v7 = vadd.f32 %v3011_v2, %v2999_v55  ;;  %v7194_v14 = vld [vmem:[#allocation5 + $0x6d0] sm:$0xf]  ;;  %v6683_v23 = vor.u32 %v9542_v10, %v6682_v38  ;;  %v6460_v0 = vld [vmem:[#allocation5 + $0x130] sm:$0xf0] }
 0x158   :  { %3256 = vmatpush.bf16.msra.mxu3 %v7863_v21  ;;  %3275 = vmatpush.bf16.msrb.mxu1 %v6811_v24  ;;  %v9670_v16 = vld [vmem:[#allocation5 + $0x6ec] sm:$0xf0]  ;;  %v6427_v21 = vor.u32 %v9478_v6, %v6426_v5  ;;  %v6939_v24 = vor.u32 %v9606_v13, %v6938_v11  ;;  %v3052_v5 = vpop.f32.mrf.mxu3 }
 0x159   :  { %3244 = vmatmul.bf16.vlgmr.msra.gmra.mxu2 %v10621_v41  ;;  %v3025_v17 = vadd.f32 %v3024_v8, %v3012_v7  ;;  %v9470_v26 = vld [vmem:[#allocation5 + $0xac] sm:$0xf0] }
 0x15a   :  { %3288 = vmatpush.bf16.msrb.mxu2 %v7067_v25  ;;  %3263 = vmatpush.bf16.msrb.mxu0 %v6523_v35  ;;  %v6394_v25 = vld [vmem:[#allocation5 + $0x90] sm:$0xf]  ;;  %v3026_v49 = vpop.f32.mrf.mxu1 }
 0x15b   :  { %3257 = vmatmul.bf16.vlgmr.msra.gmra.mxu3 %v10617_v37  ;;  %v6650_v27 = vld [vmem:[#allocation5 + $0x290] sm:$0xf]  ;;  %v3038_v32 = vadd.f32 %v3037_v28, %v3025_v17  ;;  %v6556_v17 = vld [vmem:[#allocation5 + $0x1f0] sm:$0xf0] }
 0x15c   :  { %3301 = vmatpush.bf16.msrb.mxu3 %v7323_v29  ;;  %3276 = vmatpush.bf16.msrb.mxu1 %v6779_v39  ;;  %v7195_v29 = vor.u32 %v9670_v16, %v7194_v14  ;;  %v9534_v30 = vld [vmem:[#allocation5 + $0x2ac] sm:$0xf0]  ;;  %v6395_v39 = vor.u32 %v9470_v26, %v6394_v25  ;;  %v9506_v16 = vld [vmem:[#allocation5 + $0x1d4] sm:$0xf] }
 0x15d   :  { %v6906_v12 = vld [vmem:[#allocation5 + $0x490] sm:$0xf]  ;;  %v6651_v44 = vor.u32 %v9534_v30, %v6650_v27 }
 0x15e   :  { %3289 = vmatpush.bf16.msrb.mxu2 %v7035_v42  ;;  %3264 = vmatpush.bf16.msrb.mxu0 %v6491_v52  ;;  %v9598_v31 = vld [vmem:[#allocation5 + $0x4ac] sm:$0xf0]  ;;  %v10659_v42 = vadd.f32 %v3050_v33, %v3038_v32  ;;  %v3013_v43 = vpop.f32.mrf.mxu0  ;;  %v9498_v32 = vld [vmem:[#allocation5 + $0x194] sm:$0xf] }
 0x15f   :  { %v7162_v35 = vld [vmem:[#allocation5 + $0x690] sm:$0xf]  ;;  %v6907_v45 = vor.u32 %v9598_v31, %v6906_v12  ;;  %v6524_v33 = vld [vmem:[#allocation5 + $0x1b0] sm:$0xf0] }
 0x160   :  { %3302 = vmatpush.bf16.msrb.mxu3 %v7291_v46  ;;  %3277 = vmatpush.bf16.msrb.mxu1 %v6747_v53  ;;  %v9662_v36 = vld [vmem:[#allocation5 + $0x6ac] sm:$0xf0] }
 0x161   :  { %v6362_v46 = vld [vmem:[#allocation5 + $0x50] sm:$0xf]  ;;  %v7163_v50 = vor.u32 %v9662_v36, %v7162_v35 }
 0x162   :  { %3290 = vmatpush.bf16.msrb.mxu2 %v7003_v54  ;;  %3265 = vmatpush.bf16.msrb.mxu0 %v6459_v1  ;;  %v9462_v47 = vld [vmem:[#allocation5 + $0x6c] sm:$0xf0] }
 0x163   :  { %v6618_v48 = vld [vmem:[#allocation5 + $0x250] sm:$0xf]  ;;  %v6363_v56 = vor.u32 %v9462_v47, %v6362_v46  ;;  %v6527_v46 = vor.u32 %v9498_v32, %v6524_v33  ;;  %v6396_v32 = vld [vmem:[#allocation5 + $0xb0] sm:$0xf0] }
 0x164   :  { %3303 = vmatpush.bf16.msrb.mxu3 %v7259_v59  ;;  %3278 = vmatpush.bf16.msrb.mxu1 %v6715_v3  ;;  %v9526_v51 = vld [vmem:[#allocation5 + $0x26c] sm:$0xf0] }
 0x165   :  { %v6874_v52 = vld [vmem:[#allocation5 + $0x450] sm:$0xf]  ;;  %v6619_v59 = vor.u32 %v9526_v51, %v6618_v48  ;;  %v6492_v51 = vld [vmem:[#allocation5 + $0x170] sm:$0xf0] }
 0x166   :  { %3291 = vmatpush.bf16.msrb.mxu2 %v6971_v4  ;;  %3266 = vmatpush.bf16.msrb.mxu0 %v6427_v21  ;;  %v9590_v53 = vld [vmem:[#allocation5 + $0x46c] sm:$0xf0] }
 0x167   :  { %v7130_v54 = vld [vmem:[#allocation5 + $0x650] sm:$0xf]  ;;  %v6875_v60 = vor.u32 %v9590_v53, %v6874_v52 }
 0x168   :  { %3304 = vmatpush.bf16.msrb.mxu3 %v7227_v9  ;;  %3279 = vmatpush.bf16.msrb.mxu1 %v6683_v23  ;;  %v9654_v55 = vld [vmem:[#allocation5 + $0x66c] sm:$0xf0] }
 0x169   :  { %v6330_v57 = vld [vmem:[#allocation5 + $0x10] sm:$0xf]  ;;  %v7131_v1 = vor.u32 %v9654_v55, %v7130_v54 }
 0x16a   :  { %3292 = vmatpush.bf16.msrb.mxu2 %v6939_v24  ;;  %3267 = vmatpush.bf16.msrb.mxu0 %v6395_v39  ;;  %v9454_v58 = vld [vmem:[#allocation5 + $0x2c] sm:$0xf0] }
 0x16b   :  { %v6586_v61 = vld [vmem:[#allocation5 + $0x210] sm:$0xf]  ;;  %v6331_v8 = vor.u32 %v9454_v58, %v6330_v57 }
 0x16c   :  { %3305 = vmatpush.bf16.msrb.mxu3 %v7195_v29  ;;  %3280 = vmatpush.bf16.msrb.mxu1 %v6651_v44  ;;  %v9518_v62 = vld [vmem:[#allocation5 + $0x22c] sm:$0xf0]  ;;  %v6559_v29 = vor.u32 %v9506_v16, %v6556_v17  ;;  %v6428_v16 = vld [vmem:[#allocation5 + $0xf0] sm:$0xf0] }
 0x16d   :  { %v6842_v63 = vld [vmem:[#allocation5 + $0x410] sm:$0xf]  ;;  %v6587_v13 = vor.u32 %v9518_v62, %v6586_v61  ;;  %v3063_v62 = vpop.f32.mrf.mxu0 }
 0x16e   :  { %3293 = vmatpush.bf16.msrb.mxu2 %v6907_v45  ;;  %v9582_v2 = vld [vmem:[#allocation5 + $0x42c] sm:$0xf0]  ;;  %3268 = vmatpush.bf16.msrb.mxu0 %v6363_v56 }
 0x16f   :  { %v7098_v3 = vld [vmem:[#allocation5 + $0x610] sm:$0xf]  ;;  %v6843_v14 = vor.u32 %v9582_v2, %v6842_v63  ;;  %v9482_v63 = vld [vmem:[#allocation5 + $0x114] sm:$0xf] }
 0x170   :  { %3306 = vmatpush.bf16.msrb.mxu3 %v7163_v50  ;;  %v9646_v4 = vld [vmem:[#allocation5 + $0x62c] sm:$0xf0]  ;;  %3281 = vmatpush.bf16.msrb.mxu1 %v6619_v59  ;;  %v9490_v50 = vld [vmem:[#allocation5 + $0x154] sm:$0xf] }
 0x171   :  { %v7578_v6 = vld [vmem:[#allocation5 + $0x9d0] sm:$0xf]  ;;  %v7099_v21 = vor.u32 %v9646_v4, %v7098_v3  ;;  %v6495_v58 = vor.u32 %v9490_v50, %v6492_v51  ;;  %v3076_v3 = vpop.f32.mrf.mxu1 }
 0x172   :  { %v9766_v38 = vld [vmem:[#allocation5 + $0x9ec] sm:$0xf0]  ;;  %3294 = vmatpush.bf16.msrb.mxu2 %v6875_v60  ;;  %3269 = vmatpush.bf16.msrb.mxu0 %v6331_v8  ;;  %v6463_v8 = vor.u32 %v9482_v63, %v6460_v0 }
 0x173   :  { %v7834_v7 = vld [vmem:[#allocation5 + $0xbd0] sm:$0xf]  ;;  %v7579_v23 = vor.u32 %v9766_v38, %v7578_v6 }
 0x174   :  { %v9830_v9 = vld [vmem:[#allocation5 + $0xbec] sm:$0xf0]  ;;  %3307 = vmatpush.bf16.msrb.mxu3 %v7131_v1  ;;  %3282 = vmatpush.bf16.msrb.mxu1 %v6587_v13  ;;  %v3064_v1 = vadd.f32 %v3063_v62, %v10659_v42  ;;  %v619_v42 = vperm.slane %v10639_v15, 2 }
 0x175   :  { %v8090_v10 = vld [vmem:[#allocation5 + $0xdd0] sm:$0xf]  ;;  %v7835_v24 = vor.u32 %v9830_v9, %v7834_v7  ;;  %3270 = vmatmul.bf16.vlgmr.msrb.gmra.mxu0 %v10607_v19  ;;  %v3065_v15 = vpop.f32.mrf.mxu0 }
 0x176   :  { %v9894_v11 = vld [vmem:[#allocation5 + $0xdec] sm:$0xf0]  ;;  %3295 = vmatpush.bf16.msrb.mxu2 %v6843_v14  ;;  %3314 = vmatpush.bf16.msra.mxu0 %v7579_v23  ;;  %v10666_v9 = vadd.f32 %v3076_v3, %v3064_v1  ;;  %v9474_v14 = vld [vmem:[#allocation5 + $0xd4] sm:$0xf] }
 0x177   :  { %v8091_v25 = vor.u32 %v9894_v11, %v8090_v10  ;;  %v7546_v26 = vld [vmem:[#allocation5 + $0x990] sm:$0xf]  ;;  %3283 = vmatmul.bf16.vlgmr.msrb.gmra.mxu1 %v10611_v22  ;;  %v9450_v1 = vld [vmem:[#allocation5 + $0x14] sm:$0xf] }
 0x178   :  { %v9758_v27 = vld [vmem:[#allocation5 + $0x9ac] sm:$0xf0]  ;;  %3308 = vmatpush.bf16.msrb.mxu3 %v7099_v21  ;;  %3327 = vmatpush.bf16.msra.mxu1 %v7835_v24 }
 0x179   :  { %v7802_v28 = vld [vmem:[#allocation5 + $0xb90] sm:$0xf]  ;;  %v7547_v35 = vor.u32 %v9758_v27, %v7546_v26  ;;  %3296 = vmatmul.bf16.vlgmr.msrb.gmra.mxu2 %v10605_v18  ;;  %v6431_v27 = vor.u32 %v9474_v14, %v6428_v16  ;;  %v9762_v16 = vld [vmem:[#allocation5 + $0x9d4] sm:$0xf] }
 0x17a   :  { %v9822_v30 = vld [vmem:[#allocation5 + $0xbac] sm:$0xf0]  ;;  %3340 = vmatpush.bf16.msra.mxu2 %v8091_v25 }
 0x17b   :  { %v8058_v12 = vld [vmem:[#allocation5 + $0xd90] sm:$0xf]  ;;  %v7803_v36 = vor.u32 %v9822_v30, %v7802_v28  ;;  %3309 = vmatmul.bf16.vlgmr.msrb.gmra.mxu3 %v10609_v20  ;;  %3315 = vmatpush.bf16.msra.mxu0 %v7547_v35  ;;  %v3102_v35 = vpop.f32.mrf.mxu3 }
 0x17c   :  { %v9886_v31 = vld [vmem:[#allocation5 + $0xdac] sm:$0xf0]  ;;  %3353 = vmatpush.bf16.msra.mxu3 %v6559_v29 }
 0x17d   :  { %v8059_v39 = vor.u32 %v9886_v31, %v8058_v12  ;;  %v7514_v43 = vld [vmem:[#allocation5 + $0x950] sm:$0xf]  ;;  %3328 = vmatpush.bf16.msra.mxu1 %v7803_v36  ;;  %v3089_v12 = vpop.f32.mrf.mxu2  ;;  %v9466_v31 = vld [vmem:[#allocation5 + $0x94] sm:$0xf] }
 0x17e   :  { %v9750_v44 = vld [vmem:[#allocation5 + $0x96c] sm:$0xf0]  ;;  %v3090_v33 = vadd.f32 %v3089_v12, %v619_v42  ;;  %v7580_v42 = vld [vmem:[#allocation5 + $0x9f0] sm:$0xf0] }
 0x17f   :  { %v7770_v45 = vld [vmem:[#allocation5 + $0xb50] sm:$0xf]  ;;  %v7515_v52 = vor.u32 %v9750_v44, %v7514_v43  ;;  %3341 = vmatpush.bf16.msra.mxu2 %v8059_v39  ;;  %v3078_v39 = vpop.f32.mrf.mxu1  ;;  %v7292_v12 = vld [vmem:[#allocation5 + $0x7b0] sm:$0xf0] }
 0x180   :  { %v9814_v47 = vld [vmem:[#allocation5 + $0xb6c] sm:$0xf0]  ;;  %3354 = vmatpush.bf16.msra.mxu3 %v6527_v46  ;;  %v6748_v39 = vld [vmem:[#allocation5 + $0x370] sm:$0xf0] }
 0x181   :  { %v8026_v48 = vld [vmem:[#allocation5 + $0xd50] sm:$0xf]  ;;  %v7771_v53 = vor.u32 %v9814_v47, %v7770_v45  ;;  %3316 = vmatpush.bf16.msra.mxu0 %v7515_v52 }
 0x182   :  { %v9878_v49 = vld [vmem:[#allocation5 + $0xd6c] sm:$0xf0] }
 0x183   :  { %v8027_v54 = vor.u32 %v9878_v49, %v8026_v48  ;;  %v7482_v55 = vld [vmem:[#allocation5 + $0x910] sm:$0xf]  ;;  %3329 = vmatpush.bf16.msra.mxu1 %v7771_v53  ;;  %v10669_v48 = vadd.f32 %v3102_v35, %v3090_v33  ;;  %v6399_v49 = vor.u32 %v9466_v31, %v6396_v32  ;;  %v9458_v53 = vld [vmem:[#allocation5 + $0x54] sm:$0xf] }
 0x184   :  { %v9742_v56 = vld [vmem:[#allocation5 + $0x92c] sm:$0xf0]  ;;  %3355 = vmatpush.bf16.msra.mxu3 %v6495_v58  ;;  %v9754_v31 = vld [vmem:[#allocation5 + $0x994] sm:$0xf] }
 0x185   :  { %v7738_v57 = vld [vmem:[#allocation5 + $0xb10] sm:$0xf]  ;;  %v7483_v2 = vor.u32 %v9742_v56, %v7482_v55  ;;  %3342 = vmatpush.bf16.msra.mxu2 %v8027_v54  ;;  %v6364_v54 = vld [vmem:[#allocation5 + $0x70] sm:$0xf0]  ;;  %v3091_v3 = vpop.f32.mrf.mxu2 }
 0x186   :  { %v9806_v59 = vld [vmem:[#allocation5 + $0xb2c] sm:$0xf0]  ;;  %v6367_v63 = vor.u32 %v9458_v53, %v6364_v54  ;;  %v7548_v32 = vld [vmem:[#allocation5 + $0x9b0] sm:$0xf0] }
 0x187   :  { %v7994_v60 = vld [vmem:[#allocation5 + $0xd10] sm:$0xf]  ;;  %v7739_v4 = vor.u32 %v9806_v59, %v7738_v57  ;;  %3317 = vmatpush.bf16.msra.mxu0 %v7483_v2  ;;  %v6332_v2 = vld [vmem:[#allocation5 + $0x30] sm:$0xf0] }
 0x188   :  { %v9870_v61 = vld [vmem:[#allocation5 + $0xd2c] sm:$0xf0]  ;;  %3356 = vmatpush.bf16.msra.mxu3 %v6463_v8  ;;  %v7068_v8 = vld [vmem:[#allocation5 + $0x5f0] sm:$0xf0] }
 0x189   :  { %v7995_v5 = vor.u32 %v9870_v61, %v7994_v60  ;;  %v7450_v6 = vld [vmem:[#allocation5 + $0x8d0] sm:$0xf]  ;;  %3330 = vmatpush.bf16.msra.mxu1 %v7739_v4  ;;  %v9570_v4 = vld [vmem:[#allocation5 + $0x3d4] sm:$0xf] }
 0x18a   :  { %v9734_v38 = vld [vmem:[#allocation5 + $0x8ec] sm:$0xf0]  ;;  %v9546_v54 = vld [vmem:[#allocation5 + $0x314] sm:$0xf] }
 0x18b   :  { %v7706_v7 = vld [vmem:[#allocation5 + $0xad0] sm:$0xf]  ;;  %v7451_v17 = vor.u32 %v9734_v38, %v7450_v6  ;;  %3343 = vmatpush.bf16.msra.mxu2 %v7995_v5  ;;  %v6812_v5 = vld [vmem:[#allocation5 + $0x3f0] sm:$0xf0]  ;;  %v3104_v38 = vpop.f32.mrf.mxu3 }
 0x18c   :  { %v9798_v10 = vld [vmem:[#allocation5 + $0xaec] sm:$0xf0]  ;;  %3357 = vmatpush.bf16.msra.mxu3 %v6431_v27  ;;  %v9634_v6 = vld [vmem:[#allocation5 + $0x5d4] sm:$0xf]  ;;  %v3128_v38 = vpop.f32.mrf.mxu1 }
 0x18d   :  { %v7962_v11 = vld [vmem:[#allocation5 + $0xcd0] sm:$0xf]  ;;  %v7707_v21 = vor.u32 %v9798_v10, %v7706_v7  ;;  %3318 = vmatpush.bf16.msra.mxu0 %v7451_v17  ;;  %v9698_v10 = vld [vmem:[#allocation5 + $0x7d4] sm:$0xf]  ;;  %v6335_v17 = vor.u32 %v9450_v1, %v6332_v2 }
 0x18e   :  { %v9862_v13 = vld [vmem:[#allocation5 + $0xcec] sm:$0xf0]  ;;  %v9626_v27 = vld [vmem:[#allocation5 + $0x594] sm:$0xf] }
 0x18f   :  { %v7963_v23 = vor.u32 %v9862_v13, %v7962_v11  ;;  %v7418_v24 = vld [vmem:[#allocation5 + $0x890] sm:$0xf]  ;;  %3331 = vmatpush.bf16.msra.mxu1 %v7707_v21  ;;  %v7324_v11 = vld [vmem:[#allocation5 + $0x7f0] sm:$0xf0]  ;;  %v6815_v21 = vor.u32 %v9570_v4, %v6812_v5 }
 0x190   :  { %v9726_v25 = vld [vmem:[#allocation5 + $0x8ac] sm:$0xf0]  ;;  %3358 = vmatpush.bf16.msra.mxu3 %v6399_v49  ;;  %v9746_v49 = vld [vmem:[#allocation5 + $0x954] sm:$0xf] }
 0x191   :  { %v7674_v26 = vld [vmem:[#allocation5 + $0xa90] sm:$0xf]  ;;  %v7419_v36 = vor.u32 %v9726_v25, %v7418_v24  ;;  %3344 = vmatpush.bf16.msra.mxu2 %v7963_v23  ;;  %v7071_v23 = vor.u32 %v9634_v6, %v7068_v8  ;;  %v7327_v24 = vor.u32 %v9698_v10, %v7324_v11  ;;  %v9562_v25 = vld [vmem:[#allocation5 + $0x394] sm:$0xf] }
 0x192   :  { %v9790_v28 = vld [vmem:[#allocation5 + $0xaac] sm:$0xf0]  ;;  %v9538_v3 = vld [vmem:[#allocation5 + $0x2d4] sm:$0xf] }
 0x193   :  { %v7930_v29 = vld [vmem:[#allocation5 + $0xc90] sm:$0xf]  ;;  %v7675_v43 = vor.u32 %v9790_v28, %v7674_v26  ;;  %3319 = vmatpush.bf16.msra.mxu0 %v7419_v36  ;;  %v6780_v26 = vld [vmem:[#allocation5 + $0x3b0] sm:$0xf0]  ;;  %v7583_v28 = vor.u32 %v9762_v16, %v7580_v42 }
 0x194   :  { %v9854_v30 = vld [vmem:[#allocation5 + $0xcac] sm:$0xf0]  ;;  %3359 = vmatpush.bf16.msra.mxu3 %v6367_v63  ;;  %v6783_v33 = vor.u32 %v9562_v25, %v6780_v26  ;;  %v9554_v36 = vld [vmem:[#allocation5 + $0x354] sm:$0xf]  ;;  %v3141_v26 = vpop.f32.mrf.mxu2 }
 0x195   :  { %v7931_v44 = vor.u32 %v9854_v30, %v7930_v29  ;;  %v7386_v45 = vld [vmem:[#allocation5 + $0x850] sm:$0xf]  ;;  %3332 = vmatpush.bf16.msra.mxu1 %v7675_v43  ;;  %v7036_v29 = vld [vmem:[#allocation5 + $0x5b0] sm:$0xf0] }
 0x196   :  { %v9718_v46 = vld [vmem:[#allocation5 + $0x86c] sm:$0xf0]  ;;  %v9690_v30 = vld [vmem:[#allocation5 + $0x794] sm:$0xf]  ;;  %v7039_v35 = vor.u32 %v9626_v27, %v7036_v29 }
 0x197   :  { %v7642_v47 = vld [vmem:[#allocation5 + $0xa50] sm:$0xf]  ;;  %v7387_v55 = vor.u32 %v9718_v46, %v7386_v45  ;;  %3345 = vmatpush.bf16.msra.mxu2 %v7931_v44  ;;  %v7295_v15 = vor.u32 %v9690_v30, %v7292_v12  ;;  %v9618_v43 = vld [vmem:[#allocation5 + $0x554] sm:$0xf]  ;;  %v7551_v44 = vor.u32 %v9754_v31, %v7548_v32  ;;  %v3154_v12 = vpop.f32.mrf.mxu3 }
 0x198   :  { %v9782_v50 = vld [vmem:[#allocation5 + $0xa6c] sm:$0xf0]  ;;  %3360 = vmatpush.bf16.msra.mxu3 %v6335_v17  ;;  %v7004_v45 = vld [vmem:[#allocation5 + $0x570] sm:$0xf0] }
 0x199   :  { %v7898_v51 = vld [vmem:[#allocation5 + $0xc50] sm:$0xf]  ;;  %v7643_v58 = vor.u32 %v9782_v50, %v7642_v47  ;;  %3320 = vmatpush.bf16.msra.mxu0 %v7387_v55  ;;  %v9682_v46 = vld [vmem:[#allocation5 + $0x754] sm:$0xf] }
 0x19a   :  { %v9846_v52 = vld [vmem:[#allocation5 + $0xc6c] sm:$0xf0]  ;;  %v7260_v47 = vld [vmem:[#allocation5 + $0x770] sm:$0xf0] }
 0x19b   :  { %v7354_v56 = vld [vmem:[#allocation5 + $0x810] sm:$0xf]  ;;  %v7899_v59 = vor.u32 %v9846_v52, %v7898_v51  ;;  %3333 = vmatpush.bf16.msra.mxu1 %v7643_v58  ;;  %v7516_v50 = vld [vmem:[#allocation5 + $0x970] sm:$0xf0]  ;;  %v6751_v51 = vor.u32 %v9554_v36, %v6748_v39  ;;  %3361 = vmatmul.bf16.vlgmr.msra.gmra.mxu3 %v10607_v19  ;;  %v7007_v52 = vor.u32 %v9618_v43, %v7004_v45 }
 0x19c   :  { %v9710_v57 = vld [vmem:[#allocation5 + $0x82c] sm:$0xf0]  ;;  %3405 = vmatpush.bf16.msrb.mxu3 %v7583_v28  ;;  %v7263_v53 = vor.u32 %v9682_v46, %v7260_v47  ;;  %v6716_v55 = vld [vmem:[#allocation5 + $0x330] sm:$0xf0]  ;;  %v3130_v46 = vpop.f32.mrf.mxu1 }
 0x19d   :  { %v7610_v60 = vld [vmem:[#allocation5 + $0xa10] sm:$0xf]  ;;  %v7355_v7 = vor.u32 %v9710_v57, %v7354_v56  ;;  %3346 = vmatpush.bf16.msra.mxu2 %v7899_v59  ;;  %v9610_v56 = vld [vmem:[#allocation5 + $0x514] sm:$0xf]  ;;  %v7519_v57 = vor.u32 %v9746_v49, %v7516_v50  ;;  %v6719_v63 = vor.u32 %v9546_v54, %v6716_v55  ;;  %v9495_v46 = vld [vmem:[#allocation5 + $0x174] sm:$0xf0] }
 0x19e   :  { %v9774_v61 = vld [vmem:[#allocation5 + $0xa2c] sm:$0xf0]  ;;  %v6972_v58 = vld [vmem:[#allocation5 + $0x530] sm:$0xf0] }
 0x19f   :  { %v7866_v62 = vld [vmem:[#allocation5 + $0xc10] sm:$0xf]  ;;  %v7611_v13 = vor.u32 %v9774_v61, %v7610_v60  ;;  %3321 = vmatpush.bf16.msra.mxu0 %v7355_v7  ;;  %v9674_v59 = vld [vmem:[#allocation5 + $0x714] sm:$0xf]  ;;  %v6975_v1 = vor.u32 %v9610_v56, %v6972_v58 }
 0x1a0   :  { %v9838_v0 = vld [vmem:[#allocation5 + $0xc2c] sm:$0xf0]  ;;  %3406 = vmatpush.bf16.msrb.mxu3 %v7551_v44  ;;  %v7228_v60 = vld [vmem:[#allocation5 + $0x730] sm:$0xf0] }
 0x1a1   :  { %v7867_v14 = vor.u32 %v9838_v0, %v7866_v62  ;;  %3334 = vmatpush.bf16.msra.mxu1 %v7611_v13  ;;  %v9738_v61 = vld [vmem:[#allocation5 + $0x914] sm:$0xf]  ;;  %v3115_v0 = vpop.f32.mrf.mxu0  ;;  %v7231_v2 = vor.u32 %v9674_v59, %v7228_v60 }
 0x1a2   :  { %3322 = vmatmul.bf16.vlgmr.msra.gmra.mxu0 %v10619_v40  ;;  %v7484_v62 = vld [vmem:[#allocation5 + $0x930] sm:$0xf0]  ;;  %v3116_v6 = vadd.f32 %v3115_v0, %v10669_v48 }
 0x1a3   :  { %3347 = vmatpush.bf16.msra.mxu2 %v7867_v14  ;;  %3366 = vmatpush.bf16.msrb.mxu0 %v6815_v21  ;;  %v6684_v4 = vld [vmem:[#allocation5 + $0x2f0] sm:$0xf0]  ;;  %v7487_v7 = vor.u32 %v9738_v61, %v7484_v62  ;;  %v3143_v62 = vpop.f32.mrf.mxu2 }
 0x1a4   :  { %3335 = vmatmul.bf16.vlgmr.msra.gmra.mxu1 %v10621_v41  ;;  %v9602_v5 = vld [vmem:[#allocation5 + $0x4d4] sm:$0xf]  ;;  %3407 = vmatpush.bf16.msrb.mxu3 %v7519_v57  ;;  %v3129_v16 = vadd.f32 %v3128_v38, %v3116_v6  ;;  %v6687_v42 = vor.u32 %v9538_v3, %v6684_v4  ;;  %v3156_v3 = vpop.f32.mrf.mxu3  ;;  %v9551_v62 = vld [vmem:[#allocation5 + $0x334] sm:$0xf0] }
 0x1a5   :  { %3379 = vmatpush.bf16.msrb.mxu1 %v7071_v23  ;;  %v6940_v8 = vld [vmem:[#allocation5 + $0x4f0] sm:$0xf0] }
 0x1a6   :  { %3348 = vmatmul.bf16.vlgmr.msra.gmra.mxu2 %v10617_v37  ;;  %v9666_v10 = vld [vmem:[#allocation5 + $0x6d4] sm:$0xf]  ;;  %v6943_v17 = vor.u32 %v9602_v5, %v6940_v8  ;;  %v3142_v30 = vadd.f32 %v3141_v26, %v3129_v16  ;;  %v6562_v8 = vld [vmem:[#allocation5 + $0x1d8] sm:$0xf] }
 0x1a7   :  { %3392 = vmatpush.bf16.msrb.mxu2 %v7327_v24  ;;  %3367 = vmatpush.bf16.msrb.mxu0 %v6783_v33  ;;  %v7196_v11 = vld [vmem:[#allocation5 + $0x6f0] sm:$0xf0]  ;;  %v9575_v16 = vld [vmem:[#allocation5 + $0x3f4] sm:$0xf0] }
 0x1a8   :  { %v9730_v13 = vld [vmem:[#allocation5 + $0x8d4] sm:$0xf]  ;;  %v7199_v21 = vor.u32 %v9666_v10, %v7196_v11  ;;  %3408 = vmatpush.bf16.msrb.mxu3 %v7487_v7  ;;  %v9511_v10 = vld [vmem:[#allocation5 + $0x1f4] sm:$0xf0] }
 0x1a9   :  { %3380 = vmatpush.bf16.msrb.mxu1 %v7039_v35  ;;  %v7452_v14 = vld [vmem:[#allocation5 + $0x8f0] sm:$0xf0]  ;;  %v10676_v35 = vadd.f32 %v3154_v12, %v3142_v30  ;;  %v6786_v30 = vld [vmem:[#allocation5 + $0x398] sm:$0xf] }
 0x1aa   :  { %v9530_v23 = vld [vmem:[#allocation5 + $0x294] sm:$0xf]  ;;  %v7455_v48 = vor.u32 %v9730_v13, %v7452_v14  ;;  %v6818_v14 = vld [vmem:[#allocation5 + $0x3d8] sm:$0xf] }
 0x1ab   :  { %3393 = vmatpush.bf16.msrb.mxu2 %v7295_v15  ;;  %3368 = vmatpush.bf16.msrb.mxu0 %v6751_v51  ;;  %v6652_v24 = vld [vmem:[#allocation5 + $0x2b0] sm:$0xf0]  ;;  %v3117_v15 = vpop.f32.mrf.mxu0  ;;  %v9567_v12 = vld [vmem:[#allocation5 + $0x3b4] sm:$0xf0] }
 0x1ac   :  { %v9594_v25 = vld [vmem:[#allocation5 + $0x494] sm:$0xf]  ;;  %v6655_v33 = vor.u32 %v9530_v23, %v6652_v24  ;;  %3409 = vmatpush.bf16.msrb.mxu3 %v7455_v48  ;;  %v6563_v23 = vor.u32 %v9511_v10, %v6562_v8  ;;  %v6819_v48 = vor.u32 %v9575_v16, %v6818_v14  ;;  %v6690_v14 = vld [vmem:[#allocation5 + $0x2d8] sm:$0xf] }
 0x1ad   :  { %3381 = vmatpush.bf16.msrb.mxu1 %v7007_v52  ;;  %v6908_v27 = vld [vmem:[#allocation5 + $0x4b0] sm:$0xf0]  ;;  %v9543_v16 = vld [vmem:[#allocation5 + $0x2f4] sm:$0xf0] }
 0x1ae   :  { %v9658_v28 = vld [vmem:[#allocation5 + $0x694] sm:$0xf]  ;;  %v6911_v36 = vor.u32 %v9594_v25, %v6908_v27 }
 0x1af   :  { %3394 = vmatpush.bf16.msrb.mxu2 %v7263_v53  ;;  %3369 = vmatpush.bf16.msrb.mxu0 %v6719_v63  ;;  %v7164_v29 = vld [vmem:[#allocation5 + $0x6b0] sm:$0xf0] }
 0x1b0   :  { %v9722_v31 = vld [vmem:[#allocation5 + $0x894] sm:$0xf]  ;;  %v7167_v39 = vor.u32 %v9658_v28, %v7164_v29  ;;  %v6530_v28 = vld [vmem:[#allocation5 + $0x198] sm:$0xf] }
 0x1b1   :  { %3382 = vmatpush.bf16.msrb.mxu1 %v6975_v1  ;;  %v7420_v32 = vld [vmem:[#allocation5 + $0x8b0] sm:$0xf0]  ;;  %v9503_v29 = vld [vmem:[#allocation5 + $0x1b4] sm:$0xf0] }
 0x1b2   :  { %v9522_v43 = vld [vmem:[#allocation5 + $0x254] sm:$0xf]  ;;  %v7423_v47 = vor.u32 %v9722_v31, %v7420_v32 }
 0x1b3   :  { %3395 = vmatpush.bf16.msrb.mxu2 %v7231_v2  ;;  %3370 = vmatpush.bf16.msrb.mxu0 %v6687_v42  ;;  %v6620_v44 = vld [vmem:[#allocation5 + $0x270] sm:$0xf0] }
 0x1b4   :  { %v9586_v45 = vld [vmem:[#allocation5 + $0x454] sm:$0xf]  ;;  %v6623_v54 = vor.u32 %v9522_v43, %v6620_v44  ;;  %3410 = vmatpush.bf16.msrb.mxu3 %v7423_v47  ;;  %v6787_v43 = vor.u32 %v9567_v12, %v6786_v30  ;;  %v6754_v47 = vld [vmem:[#allocation5 + $0x358] sm:$0xf]  ;;  %v3206_v30 = vpop.f32.mrf.mxu3 }
 0x1b5   :  { %3383 = vmatpush.bf16.msrb.mxu1 %v6943_v17  ;;  %v6876_v49 = vld [vmem:[#allocation5 + $0x470] sm:$0xf0]  ;;  %v6658_v12 = vld [vmem:[#allocation5 + $0x298] sm:$0xf] }
 0x1b6   :  { %v9650_v50 = vld [vmem:[#allocation5 + $0x654] sm:$0xf]  ;;  %v6879_v57 = vor.u32 %v9586_v45, %v6876_v49  ;;  %v6498_v45 = vld [vmem:[#allocation5 + $0x158] sm:$0xf] }
 0x1b7   :  { %3396 = vmatpush.bf16.msrb.mxu2 %v7199_v21  ;;  %v7132_v51 = vld [vmem:[#allocation5 + $0x670] sm:$0xf0]  ;;  %3371 = vmatpush.bf16.msrb.mxu0 %v6655_v33  ;;  %v6531_v33 = vor.u32 %v9503_v29, %v6530_v28  ;;  %v9559_v49 = vld [vmem:[#allocation5 + $0x374] sm:$0xf0]  ;;  %v3193_v29 = vpop.f32.mrf.mxu2 }
 0x1b8   :  { %v9714_v52 = vld [vmem:[#allocation5 + $0x854] sm:$0xf]  ;;  %v7135_v58 = vor.u32 %v9650_v50, %v7132_v51  ;;  %v9471_v28 = vld [vmem:[#allocation5 + $0xb4] sm:$0xf0] }
 0x1b9   :  { %v7388_v53 = vld [vmem:[#allocation5 + $0x870] sm:$0xf0]  ;;  %3384 = vmatpush.bf16.msrb.mxu1 %v6911_v36 }
 0x1ba   :  { %v9514_v55 = vld [vmem:[#allocation5 + $0x214] sm:$0xf]  ;;  %v7391_v63 = vor.u32 %v9714_v52, %v7388_v53  ;;  %v6499_v52 = vor.u32 %v9495_v46, %v6498_v45 }
 0x1bb   :  { %v6588_v56 = vld [vmem:[#allocation5 + $0x230] sm:$0xf0]  ;;  %3397 = vmatpush.bf16.msrb.mxu2 %v7167_v39  ;;  %3372 = vmatpush.bf16.msrb.mxu0 %v6623_v54 }
 0x1bc   :  { %v9578_v59 = vld [vmem:[#allocation5 + $0x414] sm:$0xf]  ;;  %v6591_v38 = vor.u32 %v9514_v55, %v6588_v56  ;;  %3411 = vmatpush.bf16.msrb.mxu3 %v7391_v63  ;;  %v6755_v56 = vor.u32 %v9559_v49, %v6754_v47  ;;  %v10682_v63 = vld [vmem:[#allocation7] sm:$0xff] }
 0x1bd   :  { %v6844_v60 = vld [vmem:[#allocation5 + $0x430] sm:$0xf0]  ;;  %3385 = vmatpush.bf16.msrb.mxu1 %v6879_v57 }
 0x1be   :  { %v9642_v61 = vld [vmem:[#allocation5 + $0x614] sm:$0xf]  ;;  %v6847_v11 = vor.u32 %v9578_v59, %v6844_v60  ;;  %v9487_v59 = vld [vmem:[#allocation5 + $0x134] sm:$0xf0]  ;;  %v3167_v60 = vpop.f32.mrf.mxu0 }
 0x1bf   :  { %v7100_v0 = vld [vmem:[#allocation5 + $0x630] sm:$0xf0]  ;;  %3398 = vmatpush.bf16.msrb.mxu2 %v7135_v58  ;;  %3373 = vmatpush.bf16.msrb.mxu0 %v6591_v38  ;;  %v6466_v58 = vld [vmem:[#allocation5 + $0x118] sm:$0xf] }
 0x1c0   :  { %v9706_v1 = vld [vmem:[#allocation5 + $0x814] sm:$0xf]  ;;  %v7103_v13 = vor.u32 %v9642_v61, %v7100_v0  ;;  %v6722_v61 = vld [vmem:[#allocation5 + $0x318] sm:$0xf]  ;;  %v620_v0 = vperm.slane %v10682_v63, 3 }
 0x1c1   :  { %v7356_v2 = vld [vmem:[#allocation5 + $0x830] sm:$0xf0]  ;;  %3386 = vmatpush.bf16.msrb.mxu1 %v6847_v11  ;;  %v6723_v8 = vor.u32 %v9551_v62, %v6722_v61  ;;  %v6434_v11 = vld [vmem:[#allocation5 + $0xd8] sm:$0xf] }
 0x1c2   :  { %v9826_v4 = vld [vmem:[#allocation5 + $0xbd4] sm:$0xf]  ;;  %v7359_v42 = vor.u32 %v9706_v1, %v7356_v2  ;;  %3374 = vmatmul.bf16.vlgmr.msrb.gmra.mxu0 %v10611_v22  ;;  %v10686_v1 = vadd.f32 %v3167_v60, %v10676_v35  ;;  %v6338_v62 = vld [vmem:[#allocation5 + $0x18] sm:$0xf] }
 0x1c3   :  { %v7836_v5 = vld [vmem:[#allocation5 + $0xbf0] sm:$0xf0]  ;;  %3399 = vmatpush.bf16.msrb.mxu2 %v7103_v13  ;;  %v9479_v13 = vld [vmem:[#allocation5 + $0xf4] sm:$0xf0] }
 0x1c4   :  { %v9890_v6 = vld [vmem:[#allocation5 + $0xdd4] sm:$0xf]  ;;  %v7839_v17 = vor.u32 %v9826_v4, %v7836_v5  ;;  %3412 = vmatpush.bf16.msrb.mxu3 %v7359_v42  ;;  %3387 = vmatmul.bf16.vlgmr.msrb.gmra.mxu1 %v10605_v18  ;;  %v6467_v4 = vor.u32 %v9487_v59, %v6466_v58 }
 0x1c5   :  { %v8092_v7 = vld [vmem:[#allocation5 + $0xdf0] sm:$0xf0] }
 0x1c6   :  { %v8095_v21 = vor.u32 %v9890_v6, %v8092_v7  ;;  %v9818_v24 = vld [vmem:[#allocation5 + $0xb94] sm:$0xf]  ;;  %3418 = vmatpush.bf16.msra.mxu0 %v7839_v17  ;;  %3400 = vmatmul.bf16.vlgmr.msrb.gmra.mxu2 %v10609_v20  ;;  %v3180_v7 = vpop.f32.mrf.mxu1 }
 0x1c7   :  { %v7804_v25 = vld [vmem:[#allocation5 + $0xbb0] sm:$0xf0]  ;;  %3444 = vmatpush.bf16.msra.mxu2 %v6563_v23  ;;  %3413 = vmatmul.bf16.vlgmr.msrb.gmra.mxu3 %v10619_v40  ;;  %v3181_v42 = vadd.f32 %v3180_v7, %v620_v0  ;;  %v9639_v7 = vld [vmem:[#allocation5 + $0x5f4] sm:$0xf0] }
 0x1c8   :  { %v9882_v26 = vld [vmem:[#allocation5 + $0xd94] sm:$0xf]  ;;  %v7807_v31 = vor.u32 %v9818_v24, %v7804_v25  ;;  %3431 = vmatpush.bf16.msra.mxu1 %v8095_v21  ;;  %3457 = vmatpush.bf16.msra.mxu3 %v6819_v48  ;;  %v6435_v21 = vor.u32 %v9479_v13, %v6434_v11  ;;  %v9703_v11 = vld [vmem:[#allocation5 + $0x7f4] sm:$0xf0] }
 0x1c9   :  { %v8060_v27 = vld [vmem:[#allocation5 + $0xdb0] sm:$0xf0]  ;;  %v7586_v13 = vld [vmem:[#allocation5 + $0x9d8] sm:$0xf] }
 0x1ca   :  { %v8063_v32 = vor.u32 %v9882_v26, %v8060_v27  ;;  %v9810_v15 = vld [vmem:[#allocation5 + $0xb54] sm:$0xf]  ;;  %3419 = vmatpush.bf16.msra.mxu0 %v7807_v31  ;;  %v6691_v26 = vor.u32 %v9543_v16, %v6690_v14  ;;  %v6402_v27 = vld [vmem:[#allocation5 + $0x98] sm:$0xf] }
 0x1cb   :  { %v7772_v36 = vld [vmem:[#allocation5 + $0xb70] sm:$0xf0]  ;;  %3445 = vmatpush.bf16.msra.mxu2 %v6531_v33  ;;  %v9535_v31 = vld [vmem:[#allocation5 + $0x2b4] sm:$0xf0]  ;;  %v3169_v33 = vpop.f32.mrf.mxu0 }
 0x1cc   :  { %v9874_v39 = vld [vmem:[#allocation5 + $0xd54] sm:$0xf]  ;;  %v7775_v50 = vor.u32 %v9810_v15, %v7772_v36  ;;  %3432 = vmatpush.bf16.msra.mxu1 %v8063_v32  ;;  %3458 = vmatpush.bf16.msra.mxu3 %v6787_v43  ;;  %v3194_v32 = vadd.f32 %v3193_v29, %v3181_v42  ;;  %v6659_v49 = vor.u32 %v9535_v31, %v6658_v12  ;;  %v9767_v14 = vld [vmem:[#allocation5 + $0x9f4] sm:$0xf0] }
 0x1cd   :  { %v8028_v44 = vld [vmem:[#allocation5 + $0xd70] sm:$0xf0]  ;;  %v9695_v29 = vld [vmem:[#allocation5 + $0x7b4] sm:$0xf0] }
 0x1ce   :  { %v8031_v51 = vor.u32 %v9874_v39, %v8028_v44  ;;  %v9802_v53 = vld [vmem:[#allocation5 + $0xb14] sm:$0xf]  ;;  %3420 = vmatpush.bf16.msra.mxu0 %v7775_v50  ;;  %v6403_v39 = vor.u32 %v9471_v28, %v6402_v27  ;;  %v10688_v46 = vadd.f32 %v3206_v30, %v3194_v32  ;;  %v3182_v47 = vpop.f32.mrf.mxu1  ;;  %v7298_v27 = vld [vmem:[#allocation5 + $0x798] sm:$0xf] }
 0x1cf   :  { %v7740_v54 = vld [vmem:[#allocation5 + $0xb30] sm:$0xf0]  ;;  %3446 = vmatpush.bf16.msra.mxu2 %v6499_v52  ;;  %v9463_v52 = vld [vmem:[#allocation5 + $0x74] sm:$0xf0] }
 0x1d0   :  { %v9866_v55 = vld [vmem:[#allocation5 + $0xd14] sm:$0xf]  ;;  %v7743_v2 = vor.u32 %v9802_v53, %v7740_v54  ;;  %3433 = vmatpush.bf16.msra.mxu1 %v8031_v51  ;;  %3459 = vmatpush.bf16.msra.mxu3 %v6755_v56  ;;  %v6370_v51 = vld [vmem:[#allocation5 + $0x58] sm:$0xf] }
 0x1d1   :  { %v7996_v57 = vld [vmem:[#allocation5 + $0xd30] sm:$0xf0]  ;;  %v6626_v53 = vld [vmem:[#allocation5 + $0x258] sm:$0xf]  ;;  %v6371_v59 = vor.u32 %v9463_v52, %v6370_v51 }
 0x1d2   :  { %v7999_v3 = vor.u32 %v9866_v55, %v7996_v57  ;;  %v9794_v5 = vld [vmem:[#allocation5 + $0xad4] sm:$0xf]  ;;  %3421 = vmatpush.bf16.msra.mxu0 %v7743_v2  ;;  %v9527_v54 = vld [vmem:[#allocation5 + $0x274] sm:$0xf0] }
 0x1d3   :  { %v7708_v6 = vld [vmem:[#allocation5 + $0xaf0] sm:$0xf0]  ;;  %3447 = vmatpush.bf16.msra.mxu2 %v6467_v4  ;;  %v6627_v0 = vor.u32 %v9527_v54, %v6626_v53  ;;  %v9455_v2 = vld [vmem:[#allocation5 + $0x34] sm:$0xf0] }
 0x1d4   :  { %v9858_v38 = vld [vmem:[#allocation5 + $0xcd4] sm:$0xf]  ;;  %v7711_v35 = vor.u32 %v9794_v5, %v7708_v6  ;;  %3434 = vmatpush.bf16.msra.mxu1 %v7999_v3  ;;  %3460 = vmatpush.bf16.msra.mxu3 %v6723_v8  ;;  %v6594_v3 = vld [vmem:[#allocation5 + $0x218] sm:$0xf]  ;;  %v3195_v5 = vpop.f32.mrf.mxu2  ;;  %v3208_v6 = vpop.f32.mrf.mxu3  ;;  %v6339_v42 = vor.u32 %v9455_v2, %v6338_v62 }
 0x1d5   :  { %v7964_v10 = vld [vmem:[#allocation5 + $0xcf0] sm:$0xf0]  ;;  %v9519_v4 = vld [vmem:[#allocation5 + $0x234] sm:$0xf0] }
 0x1d6   :  { %v7967_v17 = vor.u32 %v9858_v38, %v7964_v10  ;;  %v9786_v23 = vld [vmem:[#allocation5 + $0xa94] sm:$0xf]  ;;  %3422 = vmatpush.bf16.msra.mxu0 %v7711_v35  ;;  %v7074_v38 = vld [vmem:[#allocation5 + $0x5d8] sm:$0xf] }
 0x1d7   :  { %v7676_v24 = vld [vmem:[#allocation5 + $0xab0] sm:$0xf0]  ;;  %3448 = vmatpush.bf16.msra.mxu2 %v6435_v21  ;;  %v7330_v8 = vld [vmem:[#allocation5 + $0x7d8] sm:$0xf]  ;;  %v6595_v21 = vor.u32 %v9519_v4, %v6594_v3  ;;  %v3219_v4 = vpop.f32.mrf.mxu0 }
 0x1d8   :  { %v9850_v25 = vld [vmem:[#allocation5 + $0xc94] sm:$0xf]  ;;  %v7679_v15 = vor.u32 %v9786_v23, %v7676_v24  ;;  %3435 = vmatpush.bf16.msra.mxu1 %v7967_v17  ;;  %3461 = vmatpush.bf16.msra.mxu3 %v6691_v26  ;;  %v7842_v35 = vld [vmem:[#allocation5 + $0xbd8] sm:$0xf]  ;;  %v7075_v23 = vor.u32 %v9639_v7, %v7074_v38  ;;  %v7331_v24 = vor.u32 %v9703_v11, %v7330_v8  ;;  %v3232_v11 = vpop.f32.mrf.mxu1 }
 0x1d9   :  { %v7932_v48 = vld [vmem:[#allocation5 + $0xcb0] sm:$0xf0]  ;;  %v9831_v17 = vld [vmem:[#allocation5 + $0xbf4] sm:$0xf0] }
 0x1da   :  { %v7935_v36 = vor.u32 %v9850_v25, %v7932_v48  ;;  %v9778_v43 = vld [vmem:[#allocation5 + $0xa54] sm:$0xf]  ;;  %3423 = vmatpush.bf16.msra.mxu0 %v7679_v15  ;;  %v7587_v25 = vor.u32 %v9767_v14, %v7586_v13  ;;  %v7042_v26 = vld [vmem:[#allocation5 + $0x598] sm:$0xf]  ;;  %v7843_v28 = vor.u32 %v9831_v17, %v7842_v35  ;;  %v7299_v15 = vor.u32 %v9695_v29, %v7298_v27 }
 0x1db   :  { %v7644_v44 = vld [vmem:[#allocation5 + $0xa70] sm:$0xf0]  ;;  %3449 = vmatpush.bf16.msra.mxu2 %v6403_v39  ;;  %v9631_v48 = vld [vmem:[#allocation5 + $0x5b4] sm:$0xf0] }
 0x1dc   :  { %v9842_v45 = vld [vmem:[#allocation5 + $0xc54] sm:$0xf]  ;;  %v7647_v55 = vor.u32 %v9778_v43, %v7644_v44  ;;  %3436 = vmatpush.bf16.msra.mxu1 %v7935_v36  ;;  %3462 = vmatpush.bf16.msra.mxu3 %v6659_v49  ;;  %v7554_v30 = vld [vmem:[#allocation5 + $0x998] sm:$0xf]  ;;  %v7043_v33 = vor.u32 %v9631_v48, %v7042_v26 }
 0x1dd   :  { %v7900_v50 = vld [vmem:[#allocation5 + $0xc70] sm:$0xf0]  ;;  %v9759_v12 = vld [vmem:[#allocation5 + $0x9b4] sm:$0xf0] }
 0x1de   :  { %v9770_v56 = vld [vmem:[#allocation5 + $0xa14] sm:$0xf]  ;;  %v7903_v58 = vor.u32 %v9842_v45, %v7900_v50  ;;  %3424 = vmatpush.bf16.msra.mxu0 %v7647_v55  ;;  %v7810_v31 = vld [vmem:[#allocation5 + $0xb98] sm:$0xf]  ;;  %v7555_v36 = vor.u32 %v9759_v12, %v7554_v30 }
 0x1df   :  { %v7612_v57 = vld [vmem:[#allocation5 + $0xa30] sm:$0xf0]  ;;  %3450 = vmatpush.bf16.msra.mxu2 %v6371_v59  ;;  %v9823_v32 = vld [vmem:[#allocation5 + $0xbb4] sm:$0xf0] }
 0x1e0   :  { %v9834_v60 = vld [vmem:[#allocation5 + $0xc14] sm:$0xf]  ;;  %v7615_v10 = vor.u32 %v9770_v56, %v7612_v57  ;;  %3437 = vmatpush.bf16.msra.mxu1 %v7903_v58  ;;  %3463 = vmatpush.bf16.msra.mxu3 %v6627_v0  ;;  %v7010_v39 = vld [vmem:[#allocation5 + $0x558] sm:$0xf]  ;;  %v7811_v45 = vor.u32 %v9823_v32, %v7810_v31  ;;  %v3258_v32 = vpop.f32.mrf.mxu3 }
 0x1e1   :  { %v7868_v61 = vld [vmem:[#allocation5 + $0xc30] sm:$0xf0]  ;;  %v9623_v43 = vld [vmem:[#allocation5 + $0x574] sm:$0xf0] }
 0x1e2   :  { %v7871_v16 = vor.u32 %v9834_v60, %v7868_v61  ;;  %3425 = vmatpush.bf16.msra.mxu0 %v7615_v10  ;;  %v7266_v44 = vld [vmem:[#allocation5 + $0x758] sm:$0xf]  ;;  %v7011_v53 = vor.u32 %v9623_v43, %v7010_v39  ;;  %v3220_v10 = vadd.f32 %v3219_v4, %v10688_v46  ;;  %v3221_v43 = vpop.f32.mrf.mxu0 }
 0x1e3   :  { %3451 = vmatpush.bf16.msra.mxu2 %v6339_v42  ;;  %v9687_v47 = vld [vmem:[#allocation5 + $0x774] sm:$0xf0] }
 0x1e4   :  { %3438 = vmatpush.bf16.msra.mxu1 %v7871_v16  ;;  %3464 = vmatpush.bf16.msra.mxu3 %v6595_v21  ;;  %v7522_v49 = vld [vmem:[#allocation5 + $0x958] sm:$0xf]  ;;  %v7267_v54 = vor.u32 %v9687_v47, %v7266_v44  ;;  %v3233_v21 = vadd.f32 %v3232_v11, %v3220_v10 }
 0x1e5   :  { %3426 = vmatmul.bf16.vlgmr.msra.gmra.mxu0 %v10621_v41  ;;  %v9751_v50 = vld [vmem:[#allocation5 + $0x974] sm:$0xf0] }
 0x1e6   :  { %3470 = vmatpush.bf16.msrb.mxu0 %v7075_v23  ;;  %v7778_v51 = vld [vmem:[#allocation5 + $0xb58] sm:$0xf]  ;;  %3452 = vmatmul.bf16.vlgmr.msra.gmra.mxu2 %v10607_v19  ;;  %v7523_v55 = vor.u32 %v9751_v50, %v7522_v49 }
 0x1e7   :  { %3496 = vmatpush.bf16.msrb.mxu2 %v7587_v25  ;;  %3439 = vmatmul.bf16.vlgmr.msra.gmra.mxu1 %v10617_v37  ;;  %v9815_v52 = vld [vmem:[#allocation5 + $0xb74] sm:$0xf0] }
 0x1e8   :  { %3483 = vmatpush.bf16.msrb.mxu1 %v7331_v24  ;;  %3509 = vmatpush.bf16.msrb.mxu3 %v7843_v28  ;;  %v6978_v56 = vld [vmem:[#allocation5 + $0x518] sm:$0xf]  ;;  %v7779_v59 = vor.u32 %v9815_v52, %v7778_v51  ;;  %v3245_v28 = vpop.f32.mrf.mxu2  ;;  %v3234_v51 = vpop.f32.mrf.mxu1 }
 0x1e9   :  { %3465 = vmatmul.bf16.vlgmr.msra.gmra.mxu3 %v10611_v22  ;;  %v9615_v57 = vld [vmem:[#allocation5 + $0x534] sm:$0xf0]  ;;  %v3246_v31 = vadd.f32 %v3245_v28, %v3233_v21  ;;  %v6500_v51 = vld [vmem:[#allocation5 + $0x178] sm:$0xf0] }
 0x1ea   :  { %3471 = vmatpush.bf16.msrb.mxu0 %v7043_v33  ;;  %v7234_v58 = vld [vmem:[#allocation5 + $0x718] sm:$0xf]  ;;  %v6979_v3 = vor.u32 %v9615_v57, %v6978_v56 }
 0x1eb   :  { %3497 = vmatpush.bf16.msrb.mxu2 %v7555_v36  ;;  %v9679_v60 = vld [vmem:[#allocation5 + $0x734] sm:$0xf0]  ;;  %v10695_v39 = vadd.f32 %v3258_v32, %v3246_v31  ;;  %v9563_v31 = vld [vmem:[#allocation5 + $0x39c] sm:$0xf] }
 0x1ec   :  { %3484 = vmatpush.bf16.msrb.mxu1 %v7299_v15  ;;  %3510 = vmatpush.bf16.msrb.mxu3 %v7811_v45  ;;  %v7490_v61 = vld [vmem:[#allocation5 + $0x918] sm:$0xf]  ;;  %v7235_v5 = vor.u32 %v9679_v60, %v7234_v58  ;;  %v6788_v32 = vld [vmem:[#allocation5 + $0x3b8] sm:$0xf0] }
 0x1ed   :  { %v9743_v62 = vld [vmem:[#allocation5 + $0x934] sm:$0xf0] }
 0x1ee   :  { %v7746_v0 = vld [vmem:[#allocation5 + $0xb18] sm:$0xf]  ;;  %3472 = vmatpush.bf16.msrb.mxu0 %v7011_v53  ;;  %v7491_v6 = vor.u32 %v9743_v62, %v7490_v61 }
 0x1ef   :  { %v9807_v2 = vld [vmem:[#allocation5 + $0xb34] sm:$0xf0]  ;;  %3498 = vmatpush.bf16.msrb.mxu2 %v7523_v55 }
 0x1f0   :  { %3485 = vmatpush.bf16.msrb.mxu1 %v7267_v54  ;;  %v6946_v38 = vld [vmem:[#allocation5 + $0x4d8] sm:$0xf]  ;;  %3511 = vmatpush.bf16.msrb.mxu3 %v7779_v59  ;;  %v7747_v13 = vor.u32 %v9807_v2, %v7746_v0  ;;  %v3247_v4 = vpop.f32.mrf.mxu2 }
 0x1f1   :  { %v9607_v7 = vld [vmem:[#allocation5 + $0x4f4] sm:$0xf0]  ;;  %v6724_v4 = vld [vmem:[#allocation5 + $0x338] sm:$0xf0] }
 0x1f2   :  { %v7202_v8 = vld [vmem:[#allocation5 + $0x6d8] sm:$0xf]  ;;  %3473 = vmatpush.bf16.msrb.mxu0 %v6979_v3  ;;  %v6947_v23 = vor.u32 %v9607_v7, %v6946_v38 }
 0x1f3   :  { %v9671_v14 = vld [vmem:[#allocation5 + $0x6f4] sm:$0xf0]  ;;  %3499 = vmatpush.bf16.msrb.mxu2 %v7491_v6 }
 0x1f4   :  { %v7458_v16 = vld [vmem:[#allocation5 + $0x8d8] sm:$0xf]  ;;  %3486 = vmatpush.bf16.msrb.mxu1 %v7235_v5  ;;  %v7203_v24 = vor.u32 %v9671_v14, %v7202_v8  ;;  %3512 = vmatpush.bf16.msrb.mxu3 %v7747_v13  ;;  %v3260_v8 = vpop.f32.mrf.mxu3  ;;  %v9507_v13 = vld [vmem:[#allocation5 + $0x1dc] sm:$0xf] }
 0x1f5   :  { %v9735_v42 = vld [vmem:[#allocation5 + $0x8f4] sm:$0xf0] }
 0x1f6   :  { %v7714_v35 = vld [vmem:[#allocation5 + $0xad8] sm:$0xf]  ;;  %v7459_v25 = vor.u32 %v9735_v42, %v7458_v16  ;;  %3474 = vmatpush.bf16.msrb.mxu0 %v6947_v23  ;;  %v6564_v16 = vld [vmem:[#allocation5 + $0x1f8] sm:$0xf0] }
 0x1f7   :  { %v9799_v17 = vld [vmem:[#allocation5 + $0xaf4] sm:$0xf0]  ;;  %v9571_v42 = vld [vmem:[#allocation5 + $0x3dc] sm:$0xf] }
 0x1f8   :  { %v6914_v26 = vld [vmem:[#allocation5 + $0x498] sm:$0xf]  ;;  %v7715_v46 = vor.u32 %v9799_v17, %v7714_v35  ;;  %3487 = vmatpush.bf16.msrb.mxu1 %v7203_v24  ;;  %3500 = vmatpush.bf16.msrb.mxu2 %v7459_v25  ;;  %v6820_v35 = vld [vmem:[#allocation5 + $0x3f8] sm:$0xf0] }
 0x1f9   :  { %v9599_v48 = vld [vmem:[#allocation5 + $0x4b4] sm:$0xf0]  ;;  %v9635_v23 = vld [vmem:[#allocation5 + $0x5dc] sm:$0xf] }
 0x1fa   :  { %v7170_v27 = vld [vmem:[#allocation5 + $0x698] sm:$0xf]  ;;  %v6915_v36 = vor.u32 %v9599_v48, %v6914_v26  ;;  %3513 = vmatpush.bf16.msrb.mxu3 %v7715_v46  ;;  %v7076_v24 = vld [vmem:[#allocation5 + $0x5f8] sm:$0xf0]  ;;  %v6567_v48 = vor.u32 %v9507_v13, %v6564_v16 }
 0x1fb   :  { %v9663_v29 = vld [vmem:[#allocation5 + $0x6b4] sm:$0xf0] }
 0x1fc   :  { %v7426_v30 = vld [vmem:[#allocation5 + $0x898] sm:$0xf]  ;;  %v7171_v44 = vor.u32 %v9663_v29, %v7170_v27  ;;  %3475 = vmatpush.bf16.msrb.mxu0 %v6915_v36  ;;  %v6823_v27 = vor.u32 %v9571_v42, %v6820_v35  ;;  %v9499_v29 = vld [vmem:[#allocation5 + $0x19c] sm:$0xf]  ;;  %v3284_v42 = vpop.f32.mrf.mxu1 }
 0x1fd   :  { %v9727_v12 = vld [vmem:[#allocation5 + $0x8b4] sm:$0xf0]  ;;  %v6436_v35 = vld [vmem:[#allocation5 + $0xf8] sm:$0xf0] }
 0x1fe   :  { %v7682_v33 = vld [vmem:[#allocation5 + $0xa98] sm:$0xf]  ;;  %v7427_v45 = vor.u32 %v9727_v12, %v7426_v30  ;;  %3488 = vmatpush.bf16.msrb.mxu1 %v7171_v44  ;;  %v7079_v30 = vor.u32 %v9635_v23, %v7076_v24  ;;  %v6532_v12 = vld [vmem:[#allocation5 + $0x1b8] sm:$0xf0]  ;;  %v6791_v44 = vor.u32 %v9563_v31, %v6788_v32 }
 0x1ff   :  { %v9791_v15 = vld [vmem:[#allocation5 + $0xab4] sm:$0xf0]  ;;  %v6535_v43 = vor.u32 %v9499_v29, %v6532_v12  ;;  %v9603_v23 = vld [vmem:[#allocation5 + $0x4dc] sm:$0xf] }
 0x200   :  { %v6882_v47 = vld [vmem:[#allocation5 + $0x458] sm:$0xf]  ;;  %v7683_v52 = vor.u32 %v9791_v15, %v7682_v33  ;;  %3501 = vmatpush.bf16.msrb.mxu2 %v7427_v45  ;;  %v9627_v33 = vld [vmem:[#allocation5 + $0x59c] sm:$0xf] }
 0x201   :  { %v9591_v49 = vld [vmem:[#allocation5 + $0x474] sm:$0xf0]  ;;  %v7044_v15 = vld [vmem:[#allocation5 + $0x5b8] sm:$0xf0] }
 0x202   :  { %v7138_v50 = vld [vmem:[#allocation5 + $0x658] sm:$0xf]  ;;  %v6883_v58 = vor.u32 %v9591_v49, %v6882_v47  ;;  %3514 = vmatpush.bf16.msrb.mxu3 %v7683_v52  ;;  %v9491_v49 = vld [vmem:[#allocation5 + $0x15c] sm:$0xf] }
 0x203   :  { %v9655_v53 = vld [vmem:[#allocation5 + $0x674] sm:$0xf0]  ;;  %v9555_v52 = vld [vmem:[#allocation5 + $0x35c] sm:$0xf] }
 0x204   :  { %v7394_v54 = vld [vmem:[#allocation5 + $0x858] sm:$0xf]  ;;  %v7139_v61 = vor.u32 %v9655_v53, %v7138_v50  ;;  %3476 = vmatpush.bf16.msrb.mxu0 %v6883_v58  ;;  %v7047_v50 = vor.u32 %v9627_v33, %v7044_v15  ;;  %v6756_v53 = vld [vmem:[#allocation5 + $0x378] sm:$0xf0]  ;;  %v6503_v58 = vor.u32 %v9491_v49, %v6500_v51 }
 0x205   :  { %v9719_v55 = vld [vmem:[#allocation5 + $0x874] sm:$0xf0]  ;;  %v6948_v24 = vld [vmem:[#allocation5 + $0x4f8] sm:$0xf0] }
 0x206   :  { %v7650_v56 = vld [vmem:[#allocation5 + $0xa58] sm:$0xf]  ;;  %v7395_v62 = vor.u32 %v9719_v55, %v7394_v54  ;;  %3489 = vmatpush.bf16.msrb.mxu1 %v7139_v61  ;;  %v9619_v54 = vld [vmem:[#allocation5 + $0x55c] sm:$0xf]  ;;  %v6951_v12 = vor.u32 %v9603_v23, %v6948_v24 }
 0x207   :  { %v9783_v57 = vld [vmem:[#allocation5 + $0xa74] sm:$0xf0]  ;;  %v7012_v55 = vld [vmem:[#allocation5 + $0x578] sm:$0xf0] }
 0x208   :  { %v6850_v59 = vld [vmem:[#allocation5 + $0x418] sm:$0xf]  ;;  %v7651_v5 = vor.u32 %v9783_v57, %v7650_v56  ;;  %3502 = vmatpush.bf16.msrb.mxu2 %v7395_v62  ;;  %v9483_v61 = vld [vmem:[#allocation5 + $0x11c] sm:$0xf]  ;;  %v621_v62 = vperm.slane %v10682_v63, 4 }
 0x209   :  { %v9583_v60 = vld [vmem:[#allocation5 + $0x434] sm:$0xf0]  ;;  %v9467_v29 = vld [vmem:[#allocation5 + $0x9c] sm:$0xf] }
 0x20a   :  { %v7106_v0 = vld [vmem:[#allocation5 + $0x618] sm:$0xf]  ;;  %v6851_v14 = vor.u32 %v9583_v60, %v6850_v59  ;;  %3515 = vmatpush.bf16.msrb.mxu3 %v7651_v5  ;;  %v6759_v59 = vor.u32 %v9555_v52, %v6756_v53  ;;  %v9611_v5 = vld [vmem:[#allocation5 + $0x51c] sm:$0xf] }
 0x20b   :  { %v9647_v2 = vld [vmem:[#allocation5 + $0x634] sm:$0xf0]  ;;  %v6404_v31 = vld [vmem:[#allocation5 + $0xb8] sm:$0xf0] }
 0x20c   :  { %v7362_v3 = vld [vmem:[#allocation5 + $0x818] sm:$0xf]  ;;  %v7107_v17 = vor.u32 %v9647_v2, %v7106_v0  ;;  %3477 = vmatpush.bf16.msrb.mxu0 %v6851_v14  ;;  %v7015_v0 = vor.u32 %v9619_v54, %v7012_v55  ;;  %v6468_v2 = vld [vmem:[#allocation5 + $0x138] sm:$0xf0]  ;;  %v3286_v55 = vpop.f32.mrf.mxu1 }
 0x20d   :  { %v9711_v6 = vld [vmem:[#allocation5 + $0x834] sm:$0xf0]  ;;  %v6471_v8 = vor.u32 %v9483_v61, %v6468_v2  ;;  %v9475_v14 = vld [vmem:[#allocation5 + $0xdc] sm:$0xf] }
 0x20e   :  { %v7618_v38 = vld [vmem:[#allocation5 + $0xa18] sm:$0xf]  ;;  %v7363_v21 = vor.u32 %v9711_v6, %v7362_v3  ;;  %3490 = vmatpush.bf16.msrb.mxu1 %v7107_v17  ;;  %v9547_v3 = vld [vmem:[#allocation5 + $0x31c] sm:$0xf] }
 0x20f   :  { %v9775_v7 = vld [vmem:[#allocation5 + $0xa34] sm:$0xf0]  ;;  %3478 = vmatmul.bf16.vlgmr.msrb.gmra.mxu0 %v10605_v18  ;;  %v6980_v6 = vld [vmem:[#allocation5 + $0x538] sm:$0xf0] }
 0x210   :  { %v8098_v10 = vld [vmem:[#allocation5 + $0xdd8] sm:$0xf]  ;;  %v7619_v25 = vor.u32 %v9775_v7, %v7618_v38  ;;  %3503 = vmatpush.bf16.msrb.mxu2 %v7363_v21  ;;  %v3271_v7 = vpop.f32.mrf.mxu0  ;;  %v6983_v63 = vor.u32 %v9611_v5, %v6980_v6  ;;  %v9539_v17 = vld [vmem:[#allocation5 + $0x2dc] sm:$0xf] }
 0x211   :  { %v9895_v11 = vld [vmem:[#allocation5 + $0xdf4] sm:$0xf0]  ;;  %3491 = vmatmul.bf16.vlgmr.msrb.gmra.mxu1 %v10609_v20  ;;  %v3272_v16 = vadd.f32 %v3271_v7, %v621_v62  ;;  %v6692_v21 = vld [vmem:[#allocation5 + $0x2f8] sm:$0xf0] }
 0x212   :  { %v8099_v26 = vor.u32 %v9895_v11, %v8098_v10  ;;  %v8066_v28 = vld [vmem:[#allocation5 + $0xd98] sm:$0xf]  ;;  %3516 = vmatpush.bf16.msrb.mxu3 %v7619_v25  ;;  %3535 = vmatpush.bf16.msra.mxu1 %v6567_v48  ;;  %v6727_v10 = vor.u32 %v9547_v3, %v6724_v4  ;;  %v6439_v48 = vor.u32 %v9475_v14, %v6436_v35  ;;  %v9531_v32 = vld [vmem:[#allocation5 + $0x29c] sm:$0xf] }
 0x213   :  { %v9887_v46 = vld [vmem:[#allocation5 + $0xdb4] sm:$0xf0]  ;;  %3504 = vmatmul.bf16.vlgmr.msrb.gmra.mxu2 %v10619_v40  ;;  %v3285_v25 = vadd.f32 %v3284_v42, %v3272_v16  ;;  %v6660_v33 = vld [vmem:[#allocation5 + $0x2b8] sm:$0xf0] }
 0x214   :  { %3522 = vmatpush.bf16.msra.mxu0 %v8099_v26  ;;  %v8067_v36 = vor.u32 %v9887_v46, %v8066_v28  ;;  %3548 = vmatpush.bf16.msra.mxu2 %v6823_v27  ;;  %v8034_v45 = vld [vmem:[#allocation5 + $0xd58] sm:$0xf]  ;;  %v6695_v27 = vor.u32 %v9539_v17, %v6692_v21  ;;  %v6663_v51 = vor.u32 %v9531_v32, %v6660_v33  ;;  %v9459_v54 = vld [vmem:[#allocation5 + $0x5c] sm:$0xf] }
 0x215   :  { %v9879_v47 = vld [vmem:[#allocation5 + $0xd74] sm:$0xf0]  ;;  %3517 = vmatmul.bf16.vlgmr.msrb.gmra.mxu3 %v10621_v41  ;;  %v6884_v61 = vld [vmem:[#allocation5 + $0x478] sm:$0xf0] }
 0x216   :  { %3561 = vmatpush.bf16.msra.mxu3 %v7079_v30  ;;  %v8035_v56 = vor.u32 %v9879_v47, %v8034_v45  ;;  %v8002_v57 = vld [vmem:[#allocation5 + $0xd18] sm:$0xf]  ;;  %3536 = vmatpush.bf16.msra.mxu1 %v6535_v43  ;;  %v3297_v30 = vpop.f32.mrf.mxu2  ;;  %v9595_v43 = vld [vmem:[#allocation5 + $0x49c] sm:$0xf] }
 0x217   :  { %v9871_v60 = vld [vmem:[#allocation5 + $0xd34] sm:$0xf0]  ;;  %v3298_v15 = vadd.f32 %v3297_v30, %v3285_v25  ;;  %v9451_v5 = vld [vmem:[#allocation5 + $0x1c] sm:$0xf] }
 0x218   :  { %3523 = vmatpush.bf16.msra.mxu0 %v8067_v36  ;;  %3549 = vmatpush.bf16.msra.mxu2 %v6791_v44  ;;  %v8003_v38 = vor.u32 %v9871_v60, %v8002_v57  ;;  %v7970_v11 = vld [vmem:[#allocation5 + $0xcd8] sm:$0xf]  ;;  %v3310_v36 = vpop.f32.mrf.mxu3  ;;  %v6916_v44 = vld [vmem:[#allocation5 + $0x4b8] sm:$0xf0]  ;;  %v3273_v49 = vpop.f32.mrf.mxu0 }
 0x219   :  { %v9863_v13 = vld [vmem:[#allocation5 + $0xcf4] sm:$0xf0]  ;;  %v10702_v47 = vadd.f32 %v3310_v36, %v3298_v15  ;;  %v6372_v57 = vld [vmem:[#allocation5 + $0x78] sm:$0xf0] }
 0x21a   :  { %3562 = vmatpush.bf16.msra.mxu3 %v7047_v50  ;;  %3537 = vmatpush.bf16.msra.mxu1 %v6503_v58  ;;  %v7971_v26 = vor.u32 %v9863_v13, %v7970_v11  ;;  %v7938_v28 = vld [vmem:[#allocation5 + $0xc98] sm:$0xf]  ;;  %v6407_v50 = vor.u32 %v9467_v29, %v6404_v31  ;;  %v9523_v58 = vld [vmem:[#allocation5 + $0x25c] sm:$0xf]  ;;  %v6375_v3 = vor.u32 %v9459_v54, %v6372_v57 }
 0x21b   :  { %v9855_v46 = vld [vmem:[#allocation5 + $0xcb4] sm:$0xf0]  ;;  %v9587_v60 = vld [vmem:[#allocation5 + $0x45c] sm:$0xf] }
 0x21c   :  { %3524 = vmatpush.bf16.msra.mxu0 %v8035_v56  ;;  %3550 = vmatpush.bf16.msra.mxu2 %v6759_v59  ;;  %v7939_v45 = vor.u32 %v9855_v46, %v7938_v28  ;;  %v7906_v52 = vld [vmem:[#allocation5 + $0xc58] sm:$0xf]  ;;  %v6919_v56 = vor.u32 %v9595_v43, %v6916_v44  ;;  %v6628_v59 = vld [vmem:[#allocation5 + $0x278] sm:$0xf0] }
 0x21d   :  { %v9847_v53 = vld [vmem:[#allocation5 + $0xc74] sm:$0xf0]  ;;  %v6631_v4 = vor.u32 %v9523_v58, %v6628_v59  ;;  %v6340_v6 = vld [vmem:[#allocation5 + $0x38] sm:$0xf0] }
 0x21e   :  { %3563 = vmatpush.bf16.msra.mxu3 %v7015_v0  ;;  %3538 = vmatpush.bf16.msra.mxu1 %v6471_v8  ;;  %v7907_v62 = vor.u32 %v9847_v53, %v7906_v52  ;;  %v7874_v0 = vld [vmem:[#allocation5 + $0xc18] sm:$0xf]  ;;  %v3299_v7 = vpop.f32.mrf.mxu2  ;;  %v6887_v8 = vor.u32 %v9587_v60, %v6884_v61  ;;  %v9579_v11 = vld [vmem:[#allocation5 + $0x41c] sm:$0xf]  ;;  %v6343_v24 = vor.u32 %v9451_v5, %v6340_v6 }
 0x21f   :  { %v9839_v2 = vld [vmem:[#allocation5 + $0xc34] sm:$0xf0]  ;;  %v6852_v13 = vld [vmem:[#allocation5 + $0x438] sm:$0xf0] }
 0x220   :  { %3525 = vmatpush.bf16.msra.mxu0 %v8003_v38  ;;  %3551 = vmatpush.bf16.msra.mxu2 %v6727_v10  ;;  %v9515_v38 = vld [vmem:[#allocation5 + $0x21c] sm:$0xf]  ;;  %v3312_v14 = vpop.f32.mrf.mxu3  ;;  %v7875_v35 = vor.u32 %v9839_v2, %v7874_v0 }
 0x221   :  { %v6596_v10 = vld [vmem:[#allocation5 + $0x238] sm:$0xf0] }
 0x222   :  { %3564 = vmatpush.bf16.msra.mxu3 %v6983_v63  ;;  %3539 = vmatpush.bf16.msra.mxu1 %v6439_v48  ;;  %v9699_v16 = vld [vmem:[#allocation5 + $0x7dc] sm:$0xf]  ;;  %v6599_v25 = vor.u32 %v9515_v38, %v6596_v10  ;;  %v3336_v10 = vpop.f32.mrf.mxu1 }
 0x223   :  { %v7332_v42 = vld [vmem:[#allocation5 + $0x7f8] sm:$0xf0] }
 0x224   :  { %3526 = vmatpush.bf16.msra.mxu0 %v7971_v26  ;;  %3552 = vmatpush.bf16.msra.mxu2 %v6695_v27  ;;  %v9763_v63 = vld [vmem:[#allocation5 + $0x9dc] sm:$0xf]  ;;  %v6855_v27 = vor.u32 %v9579_v11, %v6852_v13  ;;  %v7335_v28 = vor.u32 %v9699_v16, %v7332_v42 }
 0x225   :  { %v7588_v17 = vld [vmem:[#allocation5 + $0x9f8] sm:$0xf0] }
 0x226   :  { %3565 = vmatpush.bf16.msra.mxu3 %v6951_v12  ;;  %3540 = vmatpush.bf16.msra.mxu1 %v6407_v50  ;;  %v9827_v21 = vld [vmem:[#allocation5 + $0xbdc] sm:$0xf]  ;;  %v7591_v46 = vor.u32 %v9763_v63, %v7588_v17 }
 0x227   :  { %v7844_v23 = vld [vmem:[#allocation5 + $0xbf8] sm:$0xf0] }
 0x228   :  { %3527 = vmatpush.bf16.msra.mxu0 %v7939_v45  ;;  %3553 = vmatpush.bf16.msra.mxu2 %v6663_v51  ;;  %v9891_v26 = vld [vmem:[#allocation5 + $0xddc] sm:$0xf]  ;;  %v7847_v29 = vor.u32 %v9827_v21, %v7844_v23 }
 0x229   :  { %v8100_v48 = vld [vmem:[#allocation5 + $0xdf8] sm:$0xf0] }
 0x22a   :  { %3566 = vmatpush.bf16.msra.mxu3 %v6919_v56  ;;  %3541 = vmatpush.bf16.msra.mxu1 %v6375_v3  ;;  %v9691_v30 = vld [vmem:[#allocation5 + $0x79c] sm:$0xf]  ;;  %v8103_v32 = vor.u32 %v9891_v26, %v8100_v48 }
 0x22b   :  { %v7300_v12 = vld [vmem:[#allocation5 + $0x7b8] sm:$0xf0] }
 0x22c   :  { %3528 = vmatpush.bf16.msra.mxu0 %v7907_v62  ;;  %3554 = vmatpush.bf16.msra.mxu2 %v6631_v4  ;;  %v9755_v31 = vld [vmem:[#allocation5 + $0x99c] sm:$0xf]  ;;  %v7303_v45 = vor.u32 %v9691_v30, %v7300_v12  ;;  %v3349_v30 = vpop.f32.mrf.mxu2 }
 0x22d   :  { %v7556_v33 = vld [vmem:[#allocation5 + $0x9b8] sm:$0xf0] }
 0x22e   :  { %3567 = vmatpush.bf16.msra.mxu3 %v6887_v8  ;;  %v9819_v15 = vld [vmem:[#allocation5 + $0xb9c] sm:$0xf]  ;;  %3542 = vmatpush.bf16.msra.mxu1 %v6343_v24  ;;  %v7559_v49 = vor.u32 %v9755_v31, %v7556_v33  ;;  %v3323_v8 = vpop.f32.mrf.mxu0 }
 0x22f   :  { %v7812_v36 = vld [vmem:[#allocation5 + $0xbb8] sm:$0xf0]  ;;  %v3324_v42 = vadd.f32 %v3323_v8, %v10702_v47 }
 0x230   :  { %3529 = vmatpush.bf16.msra.mxu0 %v7875_v35  ;;  %3555 = vmatpush.bf16.msra.mxu2 %v6599_v25  ;;  %v9883_v43 = vld [vmem:[#allocation5 + $0xd9c] sm:$0xf]  ;;  %v7815_v50 = vor.u32 %v9819_v15, %v7812_v36 }
 0x231   :  { %v8068_v44 = vld [vmem:[#allocation5 + $0xdb8] sm:$0xf0]  ;;  %3543 = vmatmul.bf16.vlgmr.msra.gmra.mxu1 %v10607_v19  ;;  %v3337_v25 = vadd.f32 %v3336_v10, %v3324_v42  ;;  %v8218_v10 = vld [vmem:[#allocation8 + $0xe0] sm:$0xf] }
 0x232   :  { %3568 = vmatpush.bf16.msra.mxu3 %v6855_v27  ;;  %3587 = vmatpush.bf16.msrb.mxu1 %v7591_v46  ;;  %v9683_v51 = vld [vmem:[#allocation5 + $0x75c] sm:$0xf]  ;;  %v8071_v54 = vor.u32 %v9883_v43, %v8068_v44  ;;  %v10711_v43 = vpop.f32.mrf.mxu3  ;;  %v8474_v42 = vld [vmem:[#allocation8 + $0x2e0] sm:$0xf] }
 0x233   :  { %v7268_v52 = vld [vmem:[#allocation5 + $0x778] sm:$0xf0]  ;;  %3530 = vmatmul.bf16.vlgmr.msra.gmra.mxu0 %v10617_v37  ;;  %3556 = vmatmul.bf16.vlgmr.msra.gmra.mxu2 %v10611_v22  ;;  %v10709_v33 = vadd.f32 %v3349_v30, %v3337_v25  ;;  %v9954_v30 = vld [vmem:[#allocation8 + $0x1cc] sm:$0xf0] }
 0x234   :  { %3574 = vmatpush.bf16.msrb.mxu0 %v7335_v28  ;;  %3600 = vmatpush.bf16.msrb.mxu2 %v7847_v29  ;;  %v9747_v53 = vld [vmem:[#allocation5 + $0x95c] sm:$0xf]  ;;  %v7271_v60 = vor.u32 %v9683_v51, %v7268_v52 }
 0x235   :  { %v7524_v55 = vld [vmem:[#allocation5 + $0x978] sm:$0xf0]  ;;  %3569 = vmatmul.bf16.vlgmr.msra.gmra.mxu3 %v10605_v18 }
 0x236   :  { %3613 = vmatpush.bf16.msrb.mxu3 %v8103_v32  ;;  %v9811_v56 = vld [vmem:[#allocation5 + $0xb5c] sm:$0xf]  ;;  %3588 = vmatpush.bf16.msrb.mxu1 %v7559_v49  ;;  %v7527_v61 = vor.u32 %v9747_v53, %v7524_v55  ;;  %v3338_v49 = vpop.f32.mrf.mxu1 }
 0x237   :  { %v7780_v57 = vld [vmem:[#allocation5 + $0xb78] sm:$0xf0]  ;;  %v9918_v49 = vld [vmem:[#allocation8 + $0xac] sm:$0xf0] }
 0x238   :  { %v9875_v58 = vld [vmem:[#allocation5 + $0xd5c] sm:$0xf]  ;;  %3575 = vmatpush.bf16.msrb.mxu0 %v7303_v45  ;;  %3601 = vmatpush.bf16.msrb.mxu2 %v7815_v50  ;;  %v7783_v62 = vor.u32 %v9811_v56, %v7780_v57  ;;  %v3325_v45 = vpop.f32.mrf.mxu0 }
 0x239   :  { %v8036_v59 = vld [vmem:[#allocation5 + $0xd78] sm:$0xf0]  ;;  %v8186_v45 = vld [vmem:[#allocation8 + $0xa0] sm:$0xf] }
 0x23a   :  { %v9675_v0 = vld [vmem:[#allocation5 + $0x71c] sm:$0xf]  ;;  %3614 = vmatpush.bf16.msrb.mxu3 %v8071_v54  ;;  %v8039_v4 = vor.u32 %v9875_v58, %v8036_v59  ;;  %3589 = vmatpush.bf16.msrb.mxu1 %v7527_v61 }
 0x23b   :  { %v7236_v2 = vld [vmem:[#allocation5 + $0x738] sm:$0xf0] }
 0x23c   :  { %v9739_v3 = vld [vmem:[#allocation5 + $0x91c] sm:$0xf]  ;;  %3576 = vmatpush.bf16.msrb.mxu0 %v7271_v60  ;;  %v7239_v18 = vor.u32 %v9675_v0, %v7236_v2  ;;  %3602 = vmatpush.bf16.msrb.mxu2 %v7783_v62 }
 0x23d   :  { %v7492_v5 = vld [vmem:[#allocation5 + $0x938] sm:$0xf0] }
 0x23e   :  { %v9803_v6 = vld [vmem:[#allocation5 + $0xb1c] sm:$0xf]  ;;  %v7495_v19 = vor.u32 %v9739_v3, %v7492_v5  ;;  %3615 = vmatpush.bf16.msrb.mxu3 %v8039_v4 }
 0x23f   :  { %v7748_v22 = vld [vmem:[#allocation5 + $0xb38] sm:$0xf0] }
 0x240   :  { %v9867_v38 = vld [vmem:[#allocation5 + $0xd1c] sm:$0xf]  ;;  %v7751_v11 = vor.u32 %v9803_v6, %v7748_v22  ;;  %3577 = vmatpush.bf16.msrb.mxu0 %v7239_v18  ;;  %3590 = vmatpush.bf16.msrb.mxu1 %v7495_v19  ;;  %v3351_v22 = vpop.f32.mrf.mxu2  ;;  %v9926_v19 = vld [vmem:[#allocation8 + $0xec] sm:$0xf0] }
 0x241   :  { %v8004_v7 = vld [vmem:[#allocation5 + $0xd38] sm:$0xf0]  ;;  %v8219_v25 = vor.u32 %v9926_v19, %v8218_v10  ;;  %v8154_v22 = vld [vmem:[#allocation8 + $0x60] sm:$0xf]  ;;  %v9942_v10 = vld [vmem:[#allocation8 + $0x16c] sm:$0xf0] }
 0x242   :  { %v9667_v13 = vld [vmem:[#allocation5 + $0x6dc] sm:$0xf]  ;;  %v8007_v63 = vor.u32 %v9867_v38, %v8004_v7  ;;  %3603 = vmatpush.bf16.msrb.mxu2 %v7751_v11  ;;  %v8346_v11 = vld [vmem:[#allocation8 + $0x1e0] sm:$0xf] }
 0x243   :  { %v7204_v14 = vld [vmem:[#allocation5 + $0x6f8] sm:$0xf0]  ;;  %v8410_v19 = vld [vmem:[#allocation8 + $0x260] sm:$0xf] }
 0x244   :  { %v9731_v16 = vld [vmem:[#allocation5 + $0x8dc] sm:$0xf]  ;;  %v7207_v26 = vor.u32 %v9667_v13, %v7204_v14  ;;  %3616 = vmatpush.bf16.msrb.mxu3 %v8007_v63  ;;  %v3364_v13 = vpop.f32.mrf.mxu3  ;;  %v9990_v63 = vld [vmem:[#allocation8 + $0x2ec] sm:$0xf0] }
 0x245   :  { %v7460_v35 = vld [vmem:[#allocation5 + $0x8f8] sm:$0xf0]  ;;  %v8538_v13 = vld [vmem:[#allocation8 + $0x360] sm:$0xf] }
 0x246   :  { %v9795_v17 = vld [vmem:[#allocation5 + $0xadc] sm:$0xf]  ;;  %v7463_v48 = vor.u32 %v9731_v16, %v7460_v35  ;;  %3578 = vmatpush.bf16.msrb.mxu0 %v7207_v26  ;;  %v9958_v16 = vld [vmem:[#allocation8 + $0x1ec] sm:$0xf0] }
 0x247   :  { %v7716_v21 = vld [vmem:[#allocation5 + $0xaf8] sm:$0xf0]  ;;  %v8347_v26 = vor.u32 %v9958_v16, %v8346_v11  ;;  %v9974_v11 = vld [vmem:[#allocation8 + $0x26c] sm:$0xf0] }
 0x248   :  { %v9859_v23 = vld [vmem:[#allocation5 + $0xcdc] sm:$0xf]  ;;  %v7719_v27 = vor.u32 %v9795_v17, %v7716_v21  ;;  %3591 = vmatpush.bf16.msrb.mxu1 %v7463_v48  ;;  %v8602_v21 = vld [vmem:[#allocation8 + $0x3e0] sm:$0xf]  ;;  %v8475_v48 = vor.u32 %v9990_v63, %v8474_v42  ;;  %v8411_v63 = vor.u32 %v9974_v11, %v8410_v19  ;;  %v10728_v19 = vld [vmem:[#allocation7] sm:$0xff] }
 0x249   :  { %v7972_v24 = vld [vmem:[#allocation5 + $0xcf8] sm:$0xf0]  ;;  %v622_v11 = vperm.slane %v10728_v19, 5 }
 0x24a   :  { %v9659_v28 = vld [vmem:[#allocation5 + $0x69c] sm:$0xf]  ;;  %v7975_v47 = vor.u32 %v9859_v23, %v7972_v24  ;;  %3604 = vmatpush.bf16.msrb.mxu2 %v7719_v27  ;;  %v10022_v23 = vld [vmem:[#allocation8 + $0x3ec] sm:$0xf0]  ;;  %v8202_v27 = vld [vmem:[#allocation8 + $0xc0] sm:$0xf] }
 0x24b   :  { %v7172_v46 = vld [vmem:[#allocation5 + $0x6b8] sm:$0xf0] }
 0x24c   :  { %v9723_v29 = vld [vmem:[#allocation5 + $0x89c] sm:$0xf]  ;;  %v7175_v44 = vor.u32 %v9659_v28, %v7172_v46  ;;  %3617 = vmatpush.bf16.msrb.mxu3 %v7975_v47  ;;  %v9922_v28 = vld [vmem:[#allocation8 + $0xcc] sm:$0xf0]  ;;  %v8330_v46 = vld [vmem:[#allocation8 + $0x1c0] sm:$0xf] }
 0x24d   :  { %v7428_v12 = vld [vmem:[#allocation5 + $0x8b8] sm:$0xf0]  ;;  %v8458_v47 = vld [vmem:[#allocation8 + $0x2c0] sm:$0xf] }
 0x24e   :  { %v9787_v31 = vld [vmem:[#allocation5 + $0xa9c] sm:$0xf]  ;;  %v7431_v50 = vor.u32 %v9723_v29, %v7428_v12  ;;  %3579 = vmatpush.bf16.msrb.mxu0 %v7175_v44  ;;  %v8603_v29 = vor.u32 %v10022_v23, %v8602_v21  ;;  %v9986_v12 = vld [vmem:[#allocation8 + $0x2cc] sm:$0xf0]  ;;  %v8266_v21 = vld [vmem:[#allocation8 + $0x140] sm:$0xf]  ;;  %v10721_v23 = vpop.f32.mrf.mxu2 }
 0x24f   :  { %v7684_v32 = vld [vmem:[#allocation5 + $0xab8] sm:$0xf0]  ;;  %v8459_v44 = vor.u32 %v9986_v12, %v8458_v47 }
 0x250   :  { %v9851_v15 = vld [vmem:[#allocation5 + $0xc9c] sm:$0xf]  ;;  %v7687_v51 = vor.u32 %v9787_v31, %v7684_v32  ;;  %3592 = vmatpush.bf16.msrb.mxu1 %v7431_v50  ;;  %v8586_v31 = vld [vmem:[#allocation8 + $0x3c0] sm:$0xf]  ;;  %v10018_v32 = vld [vmem:[#allocation8 + $0x3cc] sm:$0xf0] }
 0x251   :  { %v7940_v36 = vld [vmem:[#allocation5 + $0xcb8] sm:$0xf0]  ;;  %v8314_v50 = vld [vmem:[#allocation8 + $0x1a0] sm:$0xf] }
 0x252   :  { %v9651_v52 = vld [vmem:[#allocation5 + $0x65c] sm:$0xf]  ;;  %v7943_v55 = vor.u32 %v9851_v15, %v7940_v36  ;;  %3605 = vmatpush.bf16.msrb.mxu2 %v7687_v51  ;;  %v8203_v15 = vor.u32 %v9922_v28, %v8202_v27  ;;  %v8331_v36 = vor.u32 %v9954_v30, %v8330_v46  ;;  %v8587_v51 = vor.u32 %v10018_v32, %v8586_v31  ;;  %v10723_v27 = vpop.f32.mrf.mxu3  ;;  %v8522_v28 = vld [vmem:[#allocation8 + $0x340] sm:$0xf]  ;;  %v10002_v46 = vld [vmem:[#allocation8 + $0x34c] sm:$0xf0] }
 0x253   :  { %v7140_v53 = vld [vmem:[#allocation5 + $0x678] sm:$0xf0]  ;;  %v8122_v31 = vld [vmem:[#allocation8 + $0x20] sm:$0xf]  ;;  %v9902_v32 = vld [vmem:[#allocation8 + $0x2c] sm:$0xf0] }
 0x254   :  { %v9715_v54 = vld [vmem:[#allocation5 + $0x85c] sm:$0xf]  ;;  %v7143_v61 = vor.u32 %v9651_v52, %v7140_v53  ;;  %3618 = vmatpush.bf16.msrb.mxu3 %v7943_v55  ;;  %v9950_v52 = vld [vmem:[#allocation8 + $0x1ac] sm:$0xf0]  ;;  %v8442_v53 = vld [vmem:[#allocation8 + $0x2a0] sm:$0xf] }
 0x255   :  { %v7396_v56 = vld [vmem:[#allocation5 + $0x878] sm:$0xf0]  ;;  %v8570_v55 = vld [vmem:[#allocation8 + $0x3a0] sm:$0xf] }
 0x256   :  { %v9779_v57 = vld [vmem:[#allocation5 + $0xa5c] sm:$0xf]  ;;  %v7399_v2 = vor.u32 %v9715_v54, %v7396_v56  ;;  %3580 = vmatpush.bf16.msrb.mxu0 %v7143_v61  ;;  %v9982_v54 = vld [vmem:[#allocation8 + $0x2ac] sm:$0xf0]  ;;  %v8298_v61 = vld [vmem:[#allocation8 + $0x180] sm:$0xf] }
 0x257   :  { %v7652_v58 = vld [vmem:[#allocation5 + $0xa78] sm:$0xf0]  ;;  %v10014_v56 = vld [vmem:[#allocation8 + $0x3ac] sm:$0xf0] }
 0x258   :  { %v9843_v59 = vld [vmem:[#allocation5 + $0xc5c] sm:$0xf]  ;;  %v7655_v3 = vor.u32 %v9779_v57, %v7652_v58  ;;  %3593 = vmatpush.bf16.msrb.mxu1 %v7399_v2  ;;  %v8187_v57 = vor.u32 %v9918_v49, %v8186_v45  ;;  %v8315_v58 = vor.u32 %v9950_v52, %v8314_v50  ;;  %v8426_v2 = vld [vmem:[#allocation8 + $0x280] sm:$0xf]  ;;  %v9934_v45 = vld [vmem:[#allocation8 + $0x12c] sm:$0xf0] }
 0x259   :  { %v7908_v60 = vld [vmem:[#allocation5 + $0xc78] sm:$0xf0]  ;;  %v8378_v49 = vld [vmem:[#allocation8 + $0x220] sm:$0xf]  ;;  %v9966_v50 = vld [vmem:[#allocation8 + $0x22c] sm:$0xf0] }
 0x25a   :  { %v9643_v62 = vld [vmem:[#allocation5 + $0x61c] sm:$0xf]  ;;  %v7911_v38 = vor.u32 %v9843_v59, %v7908_v60  ;;  %3606 = vmatpush.bf16.msrb.mxu2 %v7655_v3  ;;  %v8443_v59 = vor.u32 %v9982_v54, %v8442_v53  ;;  %v8170_v60 = vld [vmem:[#allocation8 + $0x80] sm:$0xf]  ;;  %v9998_v52 = vld [vmem:[#allocation8 + $0x32c] sm:$0xf0]  ;;  %v8123_v53 = vor.u32 %v9902_v32, %v8122_v31 }
 0x25b   :  { %v7108_v0 = vld [vmem:[#allocation5 + $0x638] sm:$0xf0]  ;;  %v8554_v3 = vld [vmem:[#allocation8 + $0x380] sm:$0xf]  ;;  %v10078_v32 = vld [vmem:[#allocation8 + $0x5ac] sm:$0xf0] }
 0x25c   :  { %v9707_v4 = vld [vmem:[#allocation5 + $0x81c] sm:$0xf]  ;;  %v7111_v14 = vor.u32 %v9643_v62, %v7108_v0  ;;  %3619 = vmatpush.bf16.msrb.mxu3 %v7911_v38  ;;  %v8571_v62 = vor.u32 %v10014_v56, %v8570_v55  ;;  %v9946_v0 = vld [vmem:[#allocation8 + $0x18c] sm:$0xf0]  ;;  %v8106_v54 = vld [vmem:[#allocation8] sm:$0xf]  ;;  %v8379_v56 = vor.u32 %v9966_v50, %v8378_v49 }
 0x25d   :  { %v7364_v5 = vld [vmem:[#allocation5 + $0x838] sm:$0xf0]  ;;  %v9910_v38 = vld [vmem:[#allocation8 + $0x6c] sm:$0xf0]  ;;  %v8826_v31 = vld [vmem:[#allocation8 + $0x5a0] sm:$0xf] }
 0x25e   :  { %v9771_v6 = vld [vmem:[#allocation5 + $0xa1c] sm:$0xf]  ;;  %v7367_v35 = vor.u32 %v9707_v4, %v7364_v5  ;;  %3581 = vmatpush.bf16.msrb.mxu0 %v7111_v14  ;;  %v10717_v5 = vpop.f32.mrf.mxu0  ;;  %v10006_v14 = vld [vmem:[#allocation8 + $0x36c] sm:$0xf0]  ;;  %v8155_v16 = vor.u32 %v9910_v38, %v8154_v22  ;;  %v3626_v22 = vmax.f32 %v10649_v34, 0.0  ;;  %v3627_v38 = vmax.f32 %v10666_v9, 0.0 }
 0x25f   :  { %v7620_v7 = vld [vmem:[#allocation5 + $0xa38] sm:$0xf0]  ;;  %v10050_v9 = vld [vmem:[#allocation8 + $0x4cc] sm:$0xf0]  ;;  %v8827_v49 = vor.u32 %v10078_v32, %v8826_v31  ;;  %v8682_v50 = vld [vmem:[#allocation8 + $0x480] sm:$0xf] }
 0x260   :  { %v9835_v18 = vld [vmem:[#allocation5 + $0xc1c] sm:$0xf]  ;;  %v7623_v17 = vor.u32 %v9771_v6, %v7620_v7  ;;  %3594 = vmatpush.bf16.msrb.mxu1 %v7367_v35  ;;  %v8282_v7 = vld [vmem:[#allocation8 + $0x160] sm:$0xf]  ;;  %v10150_v31 = vld [vmem:[#allocation8 + $0x7ec] sm:$0xf0] }
 0x261   :  { %v7876_v8 = vld [vmem:[#allocation5 + $0xc38] sm:$0xf0]  ;;  %3582 = vmatmul.bf16.vlgmr.msrb.gmra.mxu0 %v10609_v20  ;;  %v9914_v20 = vld [vmem:[#allocation8 + $0x8c] sm:$0xf0]  ;;  %v8283_v42 = vor.u32 %v9942_v10, %v8282_v7  ;;  %v8138_v35 = vld [vmem:[#allocation8 + $0x40] sm:$0xf] }
 0x262   :  { %v7879_v24 = vor.u32 %v9835_v18, %v7876_v8  ;;  %3607 = vmatpush.bf16.msrb.mxu2 %v7623_v17  ;;  %5188 = vmatpush.bf16.msra.mxu0 %v8219_v25  ;;  %v8171_v4 = vor.u32 %v9914_v20, %v8170_v60  ;;  %v10719_v18 = vpop.f32.mrf.mxu1  ;;  %v9906_v17 = vld [vmem:[#allocation8 + $0x4c] sm:$0xf0]  ;;  %v3403_v60 = vpop.f32.mrf.mxu2  ;;  %v3628_v10 = vmax.f32 %v10686_v1, 0.0  ;;  %v10734_v1 = vpack.c.bf16 %v3627_v38, %v3627_v38 }
 0x263   :  { %3595 = vmatmul.bf16.vlgmr.msrb.gmra.mxu1 %v10619_v40  ;;  %v9978_v40 = vld [vmem:[#allocation8 + $0x28c] sm:$0xf0] }
 0x264   :  { %3620 = vmatpush.bf16.msrb.mxu3 %v7879_v24  ;;  %5201 = vmatpush.bf16.msra.mxu1 %v8347_v26  ;;  %v8427_v6 = vor.u32 %v9978_v40, %v8426_v2  ;;  %v8539_v24 = vor.u32 %v10006_v14, %v8538_v13  ;;  %v9938_v25 = vld [vmem:[#allocation8 + $0x14c] sm:$0xf0]  ;;  %v8394_v26 = vld [vmem:[#allocation8 + $0x240] sm:$0xf]  ;;  %v3416_v2 = vpop.f32.mrf.mxu3 }
 0x265   :  { %3608 = vmatmul.bf16.vlgmr.msrb.gmra.mxu2 %v10621_v41  ;;  %v10010_v41 = vld [vmem:[#allocation8 + $0x38c] sm:$0xf0]  ;;  %v8267_v47 = vor.u32 %v9938_v25, %v8266_v21 }
 0x266   :  { %5214 = vmatpush.bf16.msra.mxu2 %v8475_v48  ;;  %5189 = vmatpush.bf16.msra.mxu0 %v8203_v15  ;;  %v8555_v8 = vor.u32 %v10010_v41, %v8554_v3  ;;  %v9970_v48 = vld [vmem:[#allocation8 + $0x24c] sm:$0xf0]  ;;  %v3377_v30 = vpop.f32.mrf.mxu0  ;;  %v8250_v15 = vld [vmem:[#allocation8 + $0x120] sm:$0xf] }
 0x267   :  { %3621 = vmatmul.bf16.vlgmr.msrb.gmra.mxu3 %v10617_v37  ;;  %v8299_v37 = vor.u32 %v9946_v0, %v8298_v61  ;;  %v8395_v12 = vor.u32 %v9970_v48, %v8394_v26  ;;  %v8251_v55 = vor.u32 %v9934_v45, %v8250_v15  ;;  %v8362_v61 = vld [vmem:[#allocation8 + $0x200] sm:$0xf]  ;;  %v9994_v40 = vld [vmem:[#allocation8 + $0x30c] sm:$0xf0]  ;;  %v10736_v26 = vpack.c.bf16 %v3628_v10, %v3628_v10 }
 0x268   :  { %5227 = vmatpush.bf16.msra.mxu3 %v8603_v29  ;;  %5202 = vmatpush.bf16.msra.mxu1 %v8331_v36  ;;  %v8139_v29 = vor.u32 %v9906_v17, %v8138_v35  ;;  %v8490_v0 = vld [vmem:[#allocation8 + $0x300] sm:$0xf]  ;;  %v10054_v41 = vld [vmem:[#allocation8 + $0x4ec] sm:$0xf0]  ;;  %v3363_v48 = vadd.f32 %v10711_v43, %v622_v11 }
 0x269   :  { %v8730_v3 = vld [vmem:[#allocation8 + $0x4e0] sm:$0xf]  ;;  %v8491_v13 = vor.u32 %v9994_v40, %v8490_v0  ;;  %v10082_v21 = vld [vmem:[#allocation8 + $0x5cc] sm:$0xf0] }
 0x26a   :  { %5215 = vmatpush.bf16.msra.mxu2 %v8459_v44  ;;  %5190 = vmatpush.bf16.msra.mxu0 %v8187_v57  ;;  %v3390_v36 = vpop.f32.mrf.mxu1  ;;  %v8523_v44 = vor.u32 %v10002_v46, %v8522_v28  ;;  %v9898_v57 = vld [vmem:[#allocation8 + $0xc] sm:$0xf0]  ;;  %v8731_v14 = vor.u32 %v10054_v41, %v8730_v3  ;;  %v8714_v35 = vld [vmem:[#allocation8 + $0x4c0] sm:$0xf]  ;;  %v3376_v15 = vadd.f32 %v10717_v5, %v3363_v48 }
 0x26b   :  { %v8842_v17 = vld [vmem:[#allocation8 + $0x5c0] sm:$0xf]  ;;  %v10114_v46 = vld [vmem:[#allocation8 + $0x6cc] sm:$0xf0] }
 0x26c   :  { %5228 = vmatpush.bf16.msra.mxu3 %v8587_v51  ;;  %5203 = vmatpush.bf16.msra.mxu1 %v8315_v58  ;;  %v8506_v51 = vld [vmem:[#allocation8 + $0x320] sm:$0xf]  ;;  %v8843_v30 = vor.u32 %v10082_v21, %v8842_v17  ;;  %v10110_v45 = vld [vmem:[#allocation8 + $0x6ac] sm:$0xf0]  ;;  %v10750_v10 = vpop.f32.mrf.mxu3 }
 0x26d   :  { %v8234_v58 = vld [vmem:[#allocation8 + $0x100] sm:$0xf]  ;;  %v8507_v20 = vor.u32 %v9998_v52, %v8506_v51  ;;  %v10042_v51 = vld [vmem:[#allocation8 + $0x48c] sm:$0xf0] }
 0x26e   :  { %5216 = vmatpush.bf16.msra.mxu2 %v8443_v59  ;;  %5191 = vmatpush.bf16.msra.mxu0 %v8171_v4  ;;  %v9930_v59 = vld [vmem:[#allocation8 + $0x10c] sm:$0xf0]  ;;  %v8107_v4 = vor.u32 %v9898_v57, %v8106_v54  ;;  %v8970_v28 = vld [vmem:[#allocation8 + $0x6c0] sm:$0xf]  ;;  %v3427_v54 = vpop.f32.mrf.mxu0  ;;  %v8683_v57 = vor.u32 %v10042_v51, %v8682_v50  ;;  %v9956_v50 = vld [vmem:[#allocation8 + $0x1e4] sm:$0xf] }
 0x26f   :  { %v8235_v7 = vor.u32 %v9930_v59, %v8234_v58  ;;  %v8971_v43 = vor.u32 %v10114_v46, %v8970_v28  ;;  %v8810_v52 = vld [vmem:[#allocation8 + $0x580] sm:$0xf]  ;;  %v10106_v5 = vld [vmem:[#allocation8 + $0x68c] sm:$0xf0]  ;;  %v8348_v51 = vld [vmem:[#allocation8 + $0x1f0] sm:$0xf0] }
 0x270   :  { %5229 = vmatpush.bf16.msra.mxu3 %v8571_v62  ;;  %5204 = vmatpush.bf16.msra.mxu1 %v8299_v37  ;;  %v9962_v62 = vld [vmem:[#allocation8 + $0x20c] sm:$0xf0]  ;;  %v8858_v37 = vld [vmem:[#allocation8 + $0x5e0] sm:$0xf] }
 0x271   :  { %v8938_v59 = vld [vmem:[#allocation8 + $0x680] sm:$0xf]  ;;  %v10070_v0 = vld [vmem:[#allocation8 + $0x56c] sm:$0xf0] }
 0x272   :  { %5217 = vmatpush.bf16.msra.mxu2 %v8427_v6  ;;  %5192 = vmatpush.bf16.msra.mxu0 %v8155_v16  ;;  %v10086_v6 = vld [vmem:[#allocation8 + $0x5ec] sm:$0xf0]  ;;  %v8986_v16 = vld [vmem:[#allocation8 + $0x6e0] sm:$0xf]  ;;  %v3440_v58 = vpop.f32.mrf.mxu1  ;;  %v8939_v2 = vor.u32 %v10106_v5, %v8938_v59  ;;  %v8476_v5 = vld [vmem:[#allocation8 + $0x2f0] sm:$0xf0] }
 0x273   :  { %v8859_v34 = vor.u32 %v10086_v6, %v8858_v37  ;;  %v8922_v41 = vld [vmem:[#allocation8 + $0x660] sm:$0xf]  ;;  %v10034_v6 = vld [vmem:[#allocation8 + $0x44c] sm:$0xf0] }
 0x274   :  { %5230 = vmatpush.bf16.msra.mxu3 %v8555_v8  ;;  %5205 = vmatpush.bf16.msra.mxu1 %v8283_v42  ;;  %v8363_v8 = vor.u32 %v9962_v62, %v8362_v61  ;;  %v10118_v42 = vld [vmem:[#allocation8 + $0x6ec] sm:$0xf0]  ;;  %v8794_v62 = vld [vmem:[#allocation8 + $0x560] sm:$0xf] }
 0x275   :  { %v8987_v25 = vor.u32 %v10118_v42, %v8986_v16  ;;  %v10038_v61 = vld [vmem:[#allocation8 + $0x46c] sm:$0xf0]  ;;  %v8650_v37 = vld [vmem:[#allocation8 + $0x440] sm:$0xf] }
 0x276   :  { %5218 = vmatpush.bf16.msra.mxu2 %v8411_v63  ;;  %5193 = vmatpush.bf16.msra.mxu0 %v8139_v29  ;;  %v3629_v63 = vmax.f32 %v10695_v39, 0.0  ;;  %v8715_v39 = vor.u32 %v10050_v9, %v8714_v35  ;;  %v10066_v38 = vld [vmem:[#allocation8 + $0x54c] sm:$0xf0]  ;;  %v3429_v11 = vpop.f32.mrf.mxu0  ;;  %v8762_v17 = vld [vmem:[#allocation8 + $0x520] sm:$0xf] }
 0x277   :  { %v10098_v16 = vld [vmem:[#allocation8 + $0x64c] sm:$0xf0]  ;;  %v8890_v46 = vld [vmem:[#allocation8 + $0x620] sm:$0xf] }
 0x278   :  { %5231 = vmatpush.bf16.msra.mxu3 %v8539_v24  ;;  %5206 = vmatpush.bf16.msra.mxu1 %v8267_v47  ;;  %v10732_v24 = vpack.c.bf16 %v3626_v22, %v3626_v22  ;;  %v10739_v29 = vpack.c.bf16 %v3629_v63, %v3629_v63  ;;  %v8698_v47 = vld [vmem:[#allocation8 + $0x4a0] sm:$0xf]  ;;  %v10030_v35 = vld [vmem:[#allocation8 + $0x42c] sm:$0xf0] }
 0x279   :  { %v8778_v22 = vld [vmem:[#allocation8 + $0x540] sm:$0xf]  ;;  %v10062_v21 = vld [vmem:[#allocation8 + $0x52c] sm:$0xf0] }
 0x27a   :  { %5219 = vmatpush.bf16.msra.mxu2 %v8395_v12  ;;  %5194 = vmatpush.bf16.msra.mxu0 %v8123_v53  ;;  %v10046_v12 = vld [vmem:[#allocation8 + $0x4ac] sm:$0xf0]  ;;  %v3442_v42 = vpop.f32.mrf.mxu1  ;;  %v8779_v63 = vor.u32 %v10066_v38, %v8778_v22  ;;  %v8460_v22 = vld [vmem:[#allocation8 + $0x2d0] sm:$0xf0]  ;;  %v9082_v38 = vld [vmem:[#allocation8 + $0x7a0] sm:$0xf] }
 0x27b   :  { %v8699_v36 = vor.u32 %v10046_v12, %v8698_v47  ;;  %v10074_v53 = vld [vmem:[#allocation8 + $0x58c] sm:$0xf0]  ;;  %v8746_v47 = vld [vmem:[#allocation8 + $0x500] sm:$0xf]  ;;  %v9948_v42 = vld [vmem:[#allocation8 + $0x1a4] sm:$0xf] }
 0x27c   :  { %5232 = vmatpush.bf16.msra.mxu3 %v8523_v44  ;;  %5207 = vmatpush.bf16.msra.mxu1 %v8251_v55  ;;  %v8954_v44 = vld [vmem:[#allocation8 + $0x6a0] sm:$0xf]  ;;  %v8811_v60 = vor.u32 %v10074_v53, %v8810_v52  ;;  %v10026_v28 = vld [vmem:[#allocation8 + $0x40c] sm:$0xf0]  ;;  %v3468_v53 = vpop.f32.mrf.mxu3 }
 0x27d   :  { %v8955_v55 = vor.u32 %v10110_v45, %v8954_v44  ;;  %v9114_v12 = vld [vmem:[#allocation8 + $0x7e0] sm:$0xf] }
 0x27e   :  { %5220 = vmatpush.bf16.msra.mxu2 %v8379_v56  ;;  %5195 = vmatpush.bf16.msra.mxu0 %v8107_v4  ;;  %v3389_v56 = vadd.f32 %v10719_v18, %v3376_v15  ;;  %v10102_v4 = vld [vmem:[#allocation8 + $0x66c] sm:$0xf0]  ;;  %v8795_v18 = vor.u32 %v10070_v0, %v8794_v62  ;;  %v9924_v15 = vld [vmem:[#allocation8 + $0xe4] sm:$0xf]  ;;  %v9115_v45 = vor.u32 %v10150_v31, %v9114_v12  ;;  %v8204_v0 = vld [vmem:[#allocation8 + $0xd0] sm:$0xf0] }
 0x27f   :  { %v8351_v62 = vor.u32 %v9956_v50, %v8348_v51  ;;  %v9976_v12 = vld [vmem:[#allocation8 + $0x284] sm:$0xf] }
 0x280   :  { %5233 = vmatpush.bf16.msra.mxu3 %v8507_v20  ;;  %5208 = vmatpush.bf16.msra.mxu1 %v8235_v7  ;;  %v8666_v20 = vld [vmem:[#allocation8 + $0x460] sm:$0xf]  ;;  %v3402_v40 = vadd.f32 %v10721_v23, %v3389_v56  ;;  %v10748_v7 = vpop.f32.mrf.mxu2  ;;  %v8651_v23 = vor.u32 %v10034_v6, %v8650_v37  ;;  %v10090_v56 = vld [vmem:[#allocation8 + $0x60c] sm:$0xf0]  ;;  %v9940_v51 = vld [vmem:[#allocation8 + $0x164] sm:$0xf] }
 0x281   :  { %5196 = vmatmul.bf16.vlgmr.msra.gmra.mxu0 %v10732_v24  ;;  %v8667_v3 = vor.u32 %v10038_v61, %v8666_v20  ;;  %v10146_v20 = vld [vmem:[#allocation8 + $0x7cc] sm:$0xf0] }
 0x282   :  { %5221 = vmatpush.bf16.msra.mxu2 %v8363_v8  ;;  %5240 = vmatpush.bf16.msrb.mxu0 %v8731_v14  ;;  %v8923_v8 = vor.u32 %v10102_v4, %v8922_v41  ;;  %v8906_v14 = vld [vmem:[#allocation8 + $0x640] sm:$0xf] }
 0x283   :  { %5209 = vmatmul.bf16.vlgmr.msra.gmra.mxu1 %v10734_v1  ;;  %v8907_v48 = vor.u32 %v10098_v16, %v8906_v14  ;;  %v8188_v14 = vld [vmem:[#allocation8 + $0xb0] sm:$0xf0] }
 0x284   :  { %5234 = vmatpush.bf16.msra.mxu3 %v8491_v13  ;;  %5253 = vmatpush.bf16.msrb.mxu1 %v8859_v34  ;;  %v3415_v13 = vadd.f32 %v10723_v27, %v3402_v40  ;;  %v8634_v34 = vld [vmem:[#allocation8 + $0x420] sm:$0xf]  ;;  %v10094_v27 = vld [vmem:[#allocation8 + $0x62c] sm:$0xf0]  ;;  %v9952_v40 = vld [vmem:[#allocation8 + $0x1c4] sm:$0xf] }
 0x285   :  { %5222 = vmatmul.bf16.vlgmr.msra.gmra.mxu2 %v10736_v26  ;;  %v8891_v52 = vor.u32 %v10094_v27, %v8890_v46  ;;  %v9944_v27 = vld [vmem:[#allocation8 + $0x184] sm:$0xf] }
 0x286   :  { %5266 = vmatpush.bf16.msrb.mxu2 %v8987_v25  ;;  %5241 = vmatpush.bf16.msrb.mxu0 %v8715_v39  ;;  %v3428_v9 = vadd.f32 %v3427_v54, %v3415_v13  ;;  %v8618_v25 = vld [vmem:[#allocation8 + $0x400] sm:$0xf]  ;;  %v8635_v39 = vor.u32 %v10030_v35, %v8634_v34  ;;  %v9980_v35 = vld [vmem:[#allocation8 + $0x2a4] sm:$0xf] }
 0x287   :  { %5235 = vmatmul.bf16.vlgmr.msra.gmra.mxu3 %v10739_v29  ;;  %v8619_v54 = vor.u32 %v10026_v28, %v8618_v25  ;;  %v10138_v25 = vld [vmem:[#allocation8 + $0x78c] sm:$0xf0]  ;;  %v8172_v28 = vld [vmem:[#allocation8 + $0x90] sm:$0xf0] }
 0x288   :  { %5254 = vmatpush.bf16.msrb.mxu1 %v8843_v30  ;;  %v8763_v30 = vor.u32 %v10062_v21, %v8762_v17  ;;  %v3441_v32 = vadd.f32 %v3440_v58, %v3428_v9  ;;  %v3455_v44 = vpop.f32.mrf.mxu2  ;;  %5279 = vmatpush.bf16.msrb.mxu3 %v9115_v45  ;;  %v8444_v17 = vld [vmem:[#allocation8 + $0x2b0] sm:$0xf0]  ;;  %v9066_v21 = vld [vmem:[#allocation8 + $0x780] sm:$0xf] }
 0x289   :  { %v9067_v46 = vor.u32 %v10138_v25, %v9066_v21  ;;  %v9908_v44 = vld [vmem:[#allocation8 + $0x64] sm:$0xf]  ;;  %v8156_v45 = vld [vmem:[#allocation8 + $0x70] sm:$0xf0] }
 0x28a   :  { %5267 = vmatpush.bf16.msrb.mxu2 %v8971_v43  ;;  %5242 = vmatpush.bf16.msrb.mxu0 %v8699_v36  ;;  %v10058_v43 = vld [vmem:[#allocation8 + $0x50c] sm:$0xf0]  ;;  %v8220_v36 = vld [vmem:[#allocation8 + $0xf0] sm:$0xf0]  ;;  %v3631_v61 = vmax.f32 %v3441_v32, 0.0 }
 0x28b   :  { %v8747_v58 = vor.u32 %v10058_v43, %v8746_v47  ;;  %v8223_v59 = vor.u32 %v9924_v15, %v8220_v36  ;;  %v8447_v47 = vor.u32 %v9980_v35, %v8444_v17  ;;  %v8428_v32 = vld [vmem:[#allocation8 + $0x290] sm:$0xf0]  ;;  %v9050_v43 = vld [vmem:[#allocation8 + $0x760] sm:$0xf]  ;;  %v10134_v15 = vld [vmem:[#allocation8 + $0x76c] sm:$0xf0] }
 0x28c   :  { %5255 = vmatpush.bf16.msrb.mxu1 %v8827_v49  ;;  %v3630_v49 = vmax.f32 %v10709_v33, 0.0  ;;  %v9920_v33 = vld [vmem:[#allocation8 + $0xc4] sm:$0xf]  ;;  %v10756_v11 = vpack.c.bf16 %v3631_v61, %v3631_v61  ;;  %v9051_v50 = vor.u32 %v10134_v15, %v9050_v43  ;;  %v8140_v61 = vld [vmem:[#allocation8 + $0x50] sm:$0xf0] }
 0x28d   :  { %v8207_v6 = vor.u32 %v9920_v33, %v8204_v0  ;;  %v9936_v33 = vld [vmem:[#allocation8 + $0x144] sm:$0xf]  ;;  %v8268_v0 = vld [vmem:[#allocation8 + $0x150] sm:$0xf0] }
 0x28e   :  { %5268 = vmatpush.bf16.msrb.mxu2 %v8955_v55  ;;  %5243 = vmatpush.bf16.msrb.mxu0 %v8683_v57  ;;  %v8874_v55 = vld [vmem:[#allocation8 + $0x600] sm:$0xf]  ;;  %v9988_v57 = vld [vmem:[#allocation8 + $0x2e4] sm:$0xf]  ;;  %v10754_v37 = vpack.c.bf16 %v3630_v49, %v3630_v49  ;;  %v10760_v49 = vpop.f32.mrf.mxu0  ;;  %v10762_v53 = vpop.f32.mrf.mxu1  ;;  %v8732_v43 = vld [vmem:[#allocation8 + $0x4f0] sm:$0xf0] }
 0x28f   :  { %v8875_v41 = vor.u32 %v10090_v56, %v8874_v55  ;;  %v8479_v4 = vor.u32 %v9988_v57, %v8476_v5  ;;  %v9972_v55 = vld [vmem:[#allocation8 + $0x264] sm:$0xf]  ;;  %v8159_v56 = vor.u32 %v9908_v44, %v8156_v45  ;;  %v8412_v57 = vld [vmem:[#allocation8 + $0x270] sm:$0xf0]  ;;  %v623_v5 = vperm.slane %v10728_v19, 6 }
 0x290   :  { %5256 = vmatpush.bf16.msrb.mxu1 %v8811_v60  ;;  %v9098_v60 = vld [vmem:[#allocation8 + $0x7c0] sm:$0xf]  ;;  %v9896_v35 = vld [vmem:[#allocation8 + $0x4] sm:$0xf]  ;;  %v8860_v45 = vld [vmem:[#allocation8 + $0x5f0] sm:$0xf0] }
 0x291   :  { %v9964_v21 = vld [vmem:[#allocation8 + $0x224] sm:$0xf] }
 0x292   :  { %5269 = vmatpush.bf16.msrb.mxu2 %v8939_v2  ;;  %5244 = vmatpush.bf16.msrb.mxu0 %v8667_v3  ;;  %v9099_v2 = vor.u32 %v10146_v20, %v9098_v60  ;;  %v8332_v3 = vld [vmem:[#allocation8 + $0x1d0] sm:$0xf0]  ;;  %v9904_v20 = vld [vmem:[#allocation8 + $0x44] sm:$0xf] }
 0x293   :  { %v8335_v13 = vor.u32 %v9952_v40, %v8332_v3  ;;  %v8415_v3 = vor.u32 %v9972_v55, %v8412_v57  ;;  %v10084_v44 = vld [vmem:[#allocation8 + $0x5e4] sm:$0xf] }
 0x294   :  { %5257 = vmatpush.bf16.msrb.mxu1 %v8795_v18  ;;  %v9984_v18 = vld [vmem:[#allocation8 + $0x2c4] sm:$0xf]  ;;  %5280 = vmatpush.bf16.msrb.mxu3 %v9099_v2 }
 0x295   :  { %v8463_v34 = vor.u32 %v9984_v18, %v8460_v22  ;;  %v8396_v18 = vld [vmem:[#allocation8 + $0x250] sm:$0xf0]  ;;  %v10126_v22 = vld [vmem:[#allocation8 + $0x72c] sm:$0xf0] }
 0x296   :  { %5270 = vmatpush.bf16.msrb.mxu2 %v8923_v8  ;;  %5245 = vmatpush.bf16.msrb.mxu0 %v8651_v23  ;;  %v10142_v8 = vld [vmem:[#allocation8 + $0x7ac] sm:$0xf0]  ;;  %v9916_v23 = vld [vmem:[#allocation8 + $0xa4] sm:$0xf]  ;;  %v10765_v2 = vpop.f32.mrf.mxu2 }
 0x297   :  { %v9083_v16 = vor.u32 %v10142_v8, %v9082_v38  ;;  %v8191_v9 = vor.u32 %v9916_v23, %v8188_v14  ;;  %v3454_v38 = vadd.f32 %v10748_v7, %v623_v5  ;;  %v8271_v8 = vor.u32 %v9936_v33, %v8268_v0  ;;  %v8124_v23 = vld [vmem:[#allocation8 + $0x30] sm:$0xf0]  ;;  %v3481_v14 = vpop.f32.mrf.mxu0  ;;  %v10122_v7 = vld [vmem:[#allocation8 + $0x70c] sm:$0xf0] }
 0x298   :  { %5258 = vmatpush.bf16.msrb.mxu1 %v8779_v63  ;;  %v8316_v63 = vld [vmem:[#allocation8 + $0x1b0] sm:$0xf0]  ;;  %v10767_v40 = vpop.f32.mrf.mxu3  ;;  %v8863_v5 = vor.u32 %v10084_v44, %v8860_v45  ;;  %v10008_v14 = vld [vmem:[#allocation8 + $0x384] sm:$0xf] }
 0x299   :  { %5281 = vmatpush.bf16.msrb.mxu3 %v9083_v16  ;;  %v8844_v33 = vld [vmem:[#allocation8 + $0x5d0] sm:$0xf0] }
 0x29a   :  { %5271 = vmatpush.bf16.msrb.mxu2 %v8907_v48  ;;  %5246 = vmatpush.bf16.msrb.mxu0 %v8635_v39  ;;  %v8319_v48 = vor.u32 %v9948_v42, %v8316_v63  ;;  %v9912_v39 = vld [vmem:[#allocation8 + $0x84] sm:$0xf]  ;;  %v8252_v63 = vld [vmem:[#allocation8 + $0x130] sm:$0xf0] }
 0x29b   :  { %v8175_v31 = vor.u32 %v9912_v39, %v8172_v28  ;;  %v9932_v42 = vld [vmem:[#allocation8 + $0x124] sm:$0xf]  ;;  %v9002_v39 = vld [vmem:[#allocation8 + $0x700] sm:$0xf]  ;;  %v3467_v28 = vadd.f32 %v10750_v10, %v3454_v38  ;;  %v8364_v10 = vld [vmem:[#allocation8 + $0x210] sm:$0xf0] }
 0x29c   :  { %5259 = vmatpush.bf16.msrb.mxu1 %v8763_v30  ;;  %v8300_v30 = vld [vmem:[#allocation8 + $0x190] sm:$0xf0] }
 0x29d   :  { %5282 = vmatpush.bf16.msrb.mxu3 %v9067_v46  ;;  %v8303_v36 = vor.u32 %v9944_v27, %v8300_v30  ;;  %v8255_v46 = vor.u32 %v9932_v42, %v8252_v63  ;;  %v9928_v27 = vld [vmem:[#allocation8 + $0x104] sm:$0xf]  ;;  %v9003_v30 = vor.u32 %v10122_v7, %v9002_v39  ;;  %v3480_v55 = vadd.f32 %v10760_v49, %v3467_v28  ;;  %v8540_v39 = vld [vmem:[#allocation8 + $0x370] sm:$0xf0] }
 0x29e   :  { %5272 = vmatpush.bf16.msrb.mxu2 %v8891_v52  ;;  %5247 = vmatpush.bf16.msrb.mxu0 %v8619_v54  ;;  %v8284_v52 = vld [vmem:[#allocation8 + $0x170] sm:$0xf0]  ;;  %v8431_v54 = vor.u32 %v9976_v12, %v8428_v32  ;;  %v10052_v32 = vld [vmem:[#allocation8 + $0x4e4] sm:$0xf]  ;;  %v3507_v15 = vpop.f32.mrf.mxu2 }
 0x29f   :  { %v8287_v60 = vor.u32 %v9940_v51, %v8284_v52  ;;  %v8604_v12 = vld [vmem:[#allocation8 + $0x3f0] sm:$0xf0]  ;;  %v8735_v57 = vor.u32 %v10052_v32, %v8732_v43  ;;  %v10040_v63 = vld [vmem:[#allocation8 + $0x484] sm:$0xf] }
 0x2a0   :  { %5260 = vmatpush.bf16.msrb.mxu1 %v8747_v58  ;;  %v9034_v58 = vld [vmem:[#allocation8 + $0x740] sm:$0xf]  ;;  %v3520_v51 = vpop.f32.mrf.mxu3  ;;  %v10036_v28 = vld [vmem:[#allocation8 + $0x464] sm:$0xf]  ;;  %v8988_v32 = vld [vmem:[#allocation8 + $0x6f0] sm:$0xf0] }
 0x2a1   :  { %5248 = vmatmul.bf16.vlgmr.msrb.gmra.mxu0 %v10754_v37  ;;  %5283 = vmatpush.bf16.msrb.mxu3 %v9051_v50  ;;  %v8524_v44 = vld [vmem:[#allocation8 + $0x350] sm:$0xf0]  ;;  %v10032_v51 = vld [vmem:[#allocation8 + $0x444] sm:$0xf] }
 0x2a2   :  { %5292 = vmatpush.bf16.msra.mxu0 %v8223_v59  ;;  %5273 = vmatpush.bf16.msrb.mxu2 %v8875_v41  ;;  %v10130_v59 = vld [vmem:[#allocation8 + $0x74c] sm:$0xf0]  ;;  %v9968_v41 = vld [vmem:[#allocation8 + $0x244] sm:$0xf] }
 0x2a3   :  { %5261 = vmatmul.bf16.vlgmr.msrb.gmra.mxu1 %v10756_v11  ;;  %v8399_v17 = vor.u32 %v9968_v41, %v8396_v18  ;;  %v10012_v41 = vld [vmem:[#allocation8 + $0x3a4] sm:$0xf] }
 0x2a4   :  { %5305 = vmatpush.bf16.msra.mxu1 %v8351_v62  ;;  %v9035_v62 = vor.u32 %v10130_v59, %v9034_v58  ;;  %v10016_v58 = vld [vmem:[#allocation8 + $0x3c4] sm:$0xf]  ;;  %v8588_v59 = vld [vmem:[#allocation8 + $0x3d0] sm:$0xf0] }
 0x2a6   :  { %5318 = vmatpush.bf16.msra.mxu2 %v8479_v4  ;;  %5293 = vmatpush.bf16.msra.mxu0 %v8207_v6  ;;  %v8143_v4 = vor.u32 %v9904_v20, %v8140_v61  ;;  %v9018_v6 = vld [vmem:[#allocation8 + $0x720] sm:$0xf]  ;;  %v8716_v20 = vld [vmem:[#allocation8 + $0x4d0] sm:$0xf0]  ;;  %v8591_v61 = vor.u32 %v10016_v58, %v8588_v59 }
 0x2a7   :  { %5284 = vmatpush.bf16.msrb.mxu3 %v9035_v62  ;;  %v9019_v16 = vor.u32 %v10126_v22, %v9018_v6  ;;  %v10080_v62 = vld [vmem:[#allocation8 + $0x5c4] sm:$0xf]  ;;  %v8700_v22 = vld [vmem:[#allocation8 + $0x4b0] sm:$0xf0] }
 0x2a8   :  { %5306 = vmatpush.bf16.msra.mxu1 %v8335_v13  ;;  %v9900_v13 = vld [vmem:[#allocation8 + $0x24] sm:$0xf]  ;;  %v8847_v18 = vor.u32 %v10080_v62, %v8844_v33 }
 0x2a9   :  { %v8127_v25 = vor.u32 %v9900_v13, %v8124_v23  ;;  %v10044_v6 = vld [vmem:[#allocation8 + $0x4a4] sm:$0xf]  ;;  %v8828_v13 = vld [vmem:[#allocation8 + $0x5b0] sm:$0xf0] }
 0x2aa   :  { %5319 = vmatpush.bf16.msra.mxu2 %v8463_v34  ;;  %5294 = vmatpush.bf16.msra.mxu0 %v8191_v9  ;;  %v3494_v34 = vpop.f32.mrf.mxu1  ;;  %v8108_v9 = vld [vmem:[#allocation8 + $0x10] sm:$0xf0]  ;;  %v8703_v23 = vor.u32 %v10044_v6, %v8700_v22 }
 0x2ab   :  { %5285 = vmatpush.bf16.msrb.mxu3 %v9019_v16  ;;  %v8111_v52 = vor.u32 %v9896_v35, %v8108_v9  ;;  %v8556_v16 = vld [vmem:[#allocation8 + $0x390] sm:$0xf0]  ;;  %v10072_v9 = vld [vmem:[#allocation8 + $0x584] sm:$0xf] }
 0x2ac   :  { %5307 = vmatpush.bf16.msra.mxu1 %v8319_v48  ;;  %v8380_v48 = vld [vmem:[#allocation8 + $0x230] sm:$0xf0]  ;;  %v8559_v35 = vor.u32 %v10008_v14, %v8556_v16 }
 0x2ad   :  { %v8383_v50 = vor.u32 %v9964_v21, %v8380_v48  ;;  %v8684_v34 = vld [vmem:[#allocation8 + $0x490] sm:$0xf0]  ;;  %v10004_v48 = vld [vmem:[#allocation8 + $0x364] sm:$0xf] }
 0x2ae   :  { %5320 = vmatpush.bf16.msra.mxu2 %v8447_v47  ;;  %5295 = vmatpush.bf16.msra.mxu0 %v8175_v31  ;;  %v10020_v47 = vld [vmem:[#allocation8 + $0x3e4] sm:$0xf]  ;;  %v8236_v31 = vld [vmem:[#allocation8 + $0x110] sm:$0xf0] }
 0x2af   :  { %5286 = vmatpush.bf16.msrb.mxu3 %v9003_v30  ;;  %v8543_v30 = vor.u32 %v10004_v48, %v8540_v39  ;;  %v8956_v6 = vld [vmem:[#allocation8 + $0x6b0] sm:$0xf0]  ;;  %v10104_v48 = vld [vmem:[#allocation8 + $0x684] sm:$0xf] }
 0x2b0   :  { %5308 = vmatpush.bf16.msra.mxu1 %v8303_v36  ;;  %v8607_v36 = vor.u32 %v10020_v47, %v8604_v12  ;;  %v8796_v12 = vld [vmem:[#allocation8 + $0x570] sm:$0xf0] }
 0x2b1   :  { %v8940_v39 = vld [vmem:[#allocation8 + $0x690] sm:$0xf0] }
 0x2b2   :  { %5321 = vmatpush.bf16.msra.mxu2 %v8431_v54  ;;  %5296 = vmatpush.bf16.msra.mxu0 %v8159_v56  ;;  %v9960_v54 = vld [vmem:[#allocation8 + $0x204] sm:$0xf]  ;;  %v8239_v56 = vor.u32 %v9928_v27, %v8236_v31  ;;  %v10777_v43 = vpop.f32.mrf.mxu1 }
 0x2b3   :  { %5331 = vmatpush.bf16.msra.mxu3 %v8607_v36  ;;  %v8367_v0 = vor.u32 %v9960_v54, %v8364_v10  ;;  %v10068_v27 = vld [vmem:[#allocation8 + $0x564] sm:$0xf] }
 0x2b4   :  { %5309 = vmatpush.bf16.msra.mxu1 %v8287_v60  ;;  %v10048_v60 = vld [vmem:[#allocation8 + $0x4c4] sm:$0xf]  ;;  %v8799_v45 = vor.u32 %v10068_v27, %v8796_v12  ;;  %v8943_v12 = vor.u32 %v10104_v48, %v8940_v39  ;;  %v8274_v39 = vld [vmem:[#allocation8 + $0x148] sm:$0xf] }
 0x2b5   :  { %v8719_v49 = vor.u32 %v10048_v60, %v8716_v20  ;;  %v10116_v31 = vld [vmem:[#allocation8 + $0x6e4] sm:$0xf] }
 0x2b6   :  { %5322 = vmatpush.bf16.msra.mxu2 %v8415_v3  ;;  %5297 = vmatpush.bf16.msra.mxu0 %v8143_v4  ;;  %v3493_v3 = vadd.f32 %v10762_v53, %v3480_v55  ;;  %v8572_v4 = vld [vmem:[#allocation8 + $0x3b0] sm:$0xf0]  ;;  %v10000_v36 = vld [vmem:[#allocation8 + $0x344] sm:$0xf] }
 0x2b7   :  { %5332 = vmatpush.bf16.msra.mxu3 %v8591_v61  ;;  %v8575_v38 = vor.u32 %v10012_v41, %v8572_v4  ;;  %v10064_v54 = vld [vmem:[#allocation8 + $0x544] sm:$0xf]  ;;  %v8780_v55 = vld [vmem:[#allocation8 + $0x550] sm:$0xf0]  ;;  %v8527_v58 = vor.u32 %v10000_v36, %v8524_v44 }
 0x2b8   :  { %5310 = vmatpush.bf16.msra.mxu1 %v8271_v8  ;;  %v10076_v8 = vld [vmem:[#allocation8 + $0x5a4] sm:$0xf]  ;;  %v3506_v53 = vadd.f32 %v10765_v2, %v3493_v3  ;;  %v3531_v2 = vpop.f32.mrf.mxu0  ;;  %v10784_v60 = vpop.f32.mrf.mxu3  ;;  %v8508_v61 = vld [vmem:[#allocation8 + $0x330] sm:$0xf0]  ;;  %v8783_v62 = vor.u32 %v10064_v54, %v8780_v55  ;;  %v8322_v54 = vld [vmem:[#allocation8 + $0x1a8] sm:$0xf] }
 0x2b9   :  { %v8831_v42 = vor.u32 %v10076_v8, %v8828_v13  ;;  %v9996_v20 = vld [vmem:[#allocation8 + $0x324] sm:$0xf]  ;;  %v8636_v3 = vld [vmem:[#allocation8 + $0x430] sm:$0xf0] }
 0x2ba   :  { %5323 = vmatpush.bf16.msra.mxu2 %v8399_v17  ;;  %5298 = vmatpush.bf16.msra.mxu0 %v8127_v25  ;;  %v8812_v17 = vld [vmem:[#allocation8 + $0x590] sm:$0xf0]  ;;  %v3519_v21 = vadd.f32 %v10767_v40, %v3506_v53  ;;  %v8687_v25 = vor.u32 %v10040_v63, %v8684_v34  ;;  %v8511_v22 = vor.u32 %v9996_v20, %v8508_v61  ;;  %v10024_v13 = vld [vmem:[#allocation8 + $0x404] sm:$0xf] }
 0x2bb   :  { %5333 = vmatpush.bf16.msra.mxu3 %v8575_v38  ;;  %v8815_v7 = vor.u32 %v10072_v9, %v8812_v17  ;;  %v8764_v4 = vld [vmem:[#allocation8 + $0x530] sm:$0xf0]  ;;  %v3546_v38 = vpop.f32.mrf.mxu1  ;;  %v9992_v53 = vld [vmem:[#allocation8 + $0x304] sm:$0xf]  ;;  %v9927_v9 = vld [vmem:[#allocation8 + $0xf4] sm:$0xf0] }
 0x2bc   :  { %5311 = vmatpush.bf16.msra.mxu1 %v8255_v46  ;;  %v8668_v46 = vld [vmem:[#allocation8 + $0x470] sm:$0xf0]  ;;  %v3532_v47 = vadd.f32 %v3531_v2, %v3519_v21  ;;  %v10056_v63 = vld [vmem:[#allocation8 + $0x504] sm:$0xf]  ;;  %v8354_v17 = vld [vmem:[#allocation8 + $0x1e8] sm:$0xf] }
 0x2bd   :  { %v8671_v40 = vor.u32 %v10036_v28, %v8668_v46  ;;  %v8748_v34 = vld [vmem:[#allocation8 + $0x510] sm:$0xf0]  ;;  %v624_v46 = vperm.slane %v10728_v19, 7  ;;  %v10100_v36 = vld [vmem:[#allocation8 + $0x664] sm:$0xf] }
 0x2be   :  { %5324 = vmatpush.bf16.msra.mxu2 %v8383_v50  ;;  %5299 = vmatpush.bf16.msra.mxu0 %v8111_v52  ;;  %v3632_v15 = vmax.f32 %v3532_v47, 0.0  ;;  %v8991_v50 = vor.u32 %v10116_v31, %v8988_v32  ;;  %v8652_v52 = vld [vmem:[#allocation8 + $0x450] sm:$0xf0]  ;;  %v8751_v27 = vor.u32 %v10056_v63, %v8748_v34  ;;  %v8210_v31 = vld [vmem:[#allocation8 + $0xc8] sm:$0xf] }
 0x2bf   :  { %5334 = vmatpush.bf16.msra.mxu3 %v8559_v35  ;;  %v8655_v59 = vor.u32 %v10032_v51, %v8652_v52  ;;  %v8226_v35 = vld [vmem:[#allocation8 + $0xe8] sm:$0xf]  ;;  %v9923_v32 = vld [vmem:[#allocation8 + $0xd4] sm:$0xf0]  ;;  %v8924_v44 = vld [vmem:[#allocation8 + $0x670] sm:$0xf0]  ;;  %v3545_v55 = vadd.f32 %v10777_v43, %v624_v46 }
 0x2c0   :  { %5312 = vmatpush.bf16.msra.mxu1 %v8239_v56  ;;  %v10779_v10 = vpack.c.bf16 %v3632_v15, %v3632_v15  ;;  %v10112_v56 = vld [vmem:[#allocation8 + $0x6c4] sm:$0xf]  ;;  %v3533_v41 = vpop.f32.mrf.mxu0  ;;  %v3572_v28 = vpop.f32.mrf.mxu3  ;;  %v8338_v15 = vld [vmem:[#allocation8 + $0x1c8] sm:$0xf]  ;;  %v9919_v52 = vld [vmem:[#allocation8 + $0xb4] sm:$0xf0] }
 0x2c1   :  { %5300 = vmatmul.bf16.vlgmr.msra.gmra.mxu0 %v10732_v24  ;;  %v8194_v51 = vld [vmem:[#allocation8 + $0xa8] sm:$0xf]  ;;  %v8892_v41 = vld [vmem:[#allocation8 + $0x630] sm:$0xf0]  ;;  %v9911_v38 = vld [vmem:[#allocation8 + $0x74] sm:$0xf0] }
 0x2c2   :  { %5344 = vmatpush.bf16.msrb.mxu0 %v8735_v57  ;;  %5325 = vmatpush.bf16.msra.mxu2 %v8367_v0  ;;  %v8972_v57 = vld [vmem:[#allocation8 + $0x6d0] sm:$0xf0]  ;;  %v10028_v0 = vld [vmem:[#allocation8 + $0x424] sm:$0xf]  ;;  %v9991_v63 = vld [vmem:[#allocation8 + $0x2f4] sm:$0xf0] }
 0x2c3   :  { %5313 = vmatmul.bf16.vlgmr.msra.gmra.mxu1 %v10734_v1  ;;  %5335 = vmatpush.bf16.msra.mxu3 %v8543_v30  ;;  %v8975_v33 = vor.u32 %v10112_v56, %v8972_v57  ;;  %v8639_v8 = vor.u32 %v10028_v0, %v8636_v3  ;;  %v8227_v30 = vor.u32 %v9927_v9, %v8226_v35  ;;  %v9951_v56 = vld [vmem:[#allocation8 + $0x1b4] sm:$0xf0]  ;;  %v10096_v57 = vld [vmem:[#allocation8 + $0x644] sm:$0xf]  ;;  %v8306_v0 = vld [vmem:[#allocation8 + $0x188] sm:$0xf] }
 0x2c4   :  { %5357 = vmatpush.bf16.msrb.mxu1 %v8863_v5  ;;  %5274 = vmatmul.bf16.vlgmr.msrb.gmra.mxu2 %v10779_v10  ;;  %v10782_v5 = vpop.f32.mrf.mxu2  ;;  %v8323_v20 = vor.u32 %v9951_v56, %v8322_v54  ;;  %v9947_v3 = vld [vmem:[#allocation8 + $0x194] sm:$0xf0]  ;;  %v8114_v56 = vld [vmem:[#allocation8 + $0x8] sm:$0xf] }
 0x2c5   :  { %v3558_v43 = vadd.f32 %v10782_v5, %v3545_v55  ;;  %v8482_v5 = vld [vmem:[#allocation8 + $0x2e8] sm:$0xf]  ;;  %v9116_v55 = vld [vmem:[#allocation8 + $0x7f0] sm:$0xf0] }
 0x2c6   :  { %5345 = vmatpush.bf16.msrb.mxu0 %v8719_v49  ;;  %5370 = vmatpush.bf16.msrb.mxu2 %v8991_v50  ;;  %v10060_v49 = vld [vmem:[#allocation8 + $0x524] sm:$0xf]  ;;  %v8927_v50 = vor.u32 %v10100_v36, %v8924_v44  ;;  %v8483_v48 = vor.u32 %v9991_v63, %v8482_v5  ;;  %v8258_v36 = vld [vmem:[#allocation8 + $0x128] sm:$0xf]  ;;  %v9935_v44 = vld [vmem:[#allocation8 + $0x134] sm:$0xf0] }
 0x2c7   :  { %5336 = vmatpush.bf16.msra.mxu3 %v8527_v58  ;;  %v8767_v14 = vor.u32 %v10060_v49, %v8764_v4  ;;  %v8908_v58 = vld [vmem:[#allocation8 + $0x650] sm:$0xf0]  ;;  %v10092_v49 = vld [vmem:[#allocation8 + $0x624] sm:$0xf]  ;;  %v10051_v5 = vld [vmem:[#allocation8 + $0x4d4] sm:$0xf0] }
 0x2c8   :  { %5358 = vmatpush.bf16.msrb.mxu1 %v8847_v18  ;;  %v10108_v18 = vld [vmem:[#allocation8 + $0x6a4] sm:$0xf]  ;;  %v8911_v61 = vor.u32 %v10096_v57, %v8908_v58  ;;  %v9899_v57 = vld [vmem:[#allocation8 + $0x14] sm:$0xf0]  ;;  %v8259_v58 = vor.u32 %v9935_v44, %v8258_v36  ;;  %v8850_v63 = vld [vmem:[#allocation8 + $0x5c8] sm:$0xf] }
 0x2c9   :  { %v8959_v16 = vor.u32 %v10108_v18, %v8956_v6  ;;  %v8307_v18 = vor.u32 %v9947_v3, %v8306_v0  ;;  %v8895_v6 = vor.u32 %v10092_v49, %v8892_v41  ;;  %v10055_v0 = vld [vmem:[#allocation8 + $0x4f4] sm:$0xf0]  ;;  %v8434_v41 = vld [vmem:[#allocation8 + $0x288] sm:$0xf] }
 0x2ca   :  { %5346 = vmatpush.bf16.msrb.mxu0 %v8703_v23  ;;  %v8492_v23 = vld [vmem:[#allocation8 + $0x310] sm:$0xf0]  ;;  %5371 = vmatpush.bf16.msrb.mxu2 %v8975_v33  ;;  %v9915_v33 = vld [vmem:[#allocation8 + $0x94] sm:$0xf0] }
 0x2cb   :  { %5337 = vmatpush.bf16.msra.mxu3 %v8511_v22  ;;  %v8495_v21 = vor.u32 %v9992_v53, %v8492_v23  ;;  %v8162_v22 = vld [vmem:[#allocation8 + $0x68] sm:$0xf]  ;;  %v9943_v23 = vld [vmem:[#allocation8 + $0x174] sm:$0xf0] }
 0x2cc   :  { %5359 = vmatpush.bf16.msrb.mxu1 %v8831_v42  ;;  %v8620_v42 = vld [vmem:[#allocation8 + $0x410] sm:$0xf0]  ;;  %v8163_v35 = vor.u32 %v9911_v38, %v8162_v22  ;;  %v10087_v49 = vld [vmem:[#allocation8 + $0x5f4] sm:$0xf0]  ;;  %v10144_v22 = vld [vmem:[#allocation8 + $0x7c4] sm:$0xf] }
 0x2cd   :  { %v8623_v2 = vor.u32 %v10024_v13, %v8620_v42  ;;  %v3571_v13 = vadd.f32 %v10784_v60, %v3558_v43  ;;  %v8466_v60 = vld [vmem:[#allocation8 + $0x2c8] sm:$0xf]  ;;  %v9100_v38 = vld [vmem:[#allocation8 + $0x7d0] sm:$0xf0] }
 0x2ce   :  { %5347 = vmatpush.bf16.msrb.mxu0 %v8687_v25  ;;  %v9959_v25 = vld [vmem:[#allocation8 + $0x1f4] sm:$0xf0]  ;;  %5372 = vmatpush.bf16.msrb.mxu2 %v8959_v16  ;;  %v8876_v16 = vld [vmem:[#allocation8 + $0x610] sm:$0xf0]  ;;  %v8866_v43 = vld [vmem:[#allocation8 + $0x5e8] sm:$0xf] }
 0x2cf   :  { %v8355_v47 = vor.u32 %v9959_v25, %v8354_v17  ;;  %5338 = vmatpush.bf16.msra.mxu3 %v8495_v21  ;;  %v8146_v21 = vld [vmem:[#allocation8 + $0x48] sm:$0xf]  ;;  %v9907_v25 = vld [vmem:[#allocation8 + $0x54] sm:$0xf0] }
 0x2d0   :  { %5360 = vmatpush.bf16.msrb.mxu1 %v8815_v7  ;;  %v3559_v7 = vpop.f32.mrf.mxu2  ;;  %v8147_v46 = vor.u32 %v9907_v25, %v8146_v21  ;;  %v10140_v21 = vld [vmem:[#allocation8 + $0x7a4] sm:$0xf]  ;;  %v9084_v25 = vld [vmem:[#allocation8 + $0x7b0] sm:$0xf0] }
 0x2d1   :  { %v9987_v7 = vld [vmem:[#allocation8 + $0x2d4] sm:$0xf0] }
 0x2d2   :  { %5348 = vmatpush.bf16.msrb.mxu0 %v8671_v40  ;;  %v9955_v40 = vld [vmem:[#allocation8 + $0x1d4] sm:$0xf0]  ;;  %5373 = vmatpush.bf16.msrb.mxu2 %v8943_v12 }
 0x2d3   :  { %v8339_v19 = vor.u32 %v9955_v40, %v8338_v15  ;;  %v9903_v12 = vld [vmem:[#allocation8 + $0x34] sm:$0xf0]  ;;  %v8467_v40 = vor.u32 %v9987_v7, %v8466_v60 }
 0x2d4   :  { %5361 = vmatpush.bf16.msrb.mxu1 %v8799_v45  ;;  %v8211_v45 = vor.u32 %v9923_v32, %v8210_v31  ;;  %5326 = vmatmul.bf16.vlgmr.msra.gmra.mxu2 %v10736_v26  ;;  %v10047_v7 = vld [vmem:[#allocation8 + $0x4b4] sm:$0xf0] }
 0x2d6   :  { %5349 = vmatpush.bf16.msrb.mxu0 %v8655_v59  ;;  %v8195_v59 = vor.u32 %v9919_v52, %v8194_v51  ;;  %5374 = vmatpush.bf16.msrb.mxu2 %v8927_v50  ;;  %v8450_v50 = vld [vmem:[#allocation8 + $0x2a8] sm:$0xf]  ;;  %v9983_v51 = vld [vmem:[#allocation8 + $0x2b4] sm:$0xf0] }
 0x2d8   :  { %5362 = vmatpush.bf16.msrb.mxu1 %v8783_v62  ;;  %v8178_v62 = vld [vmem:[#allocation8 + $0x88] sm:$0xf] }
 0x2d9   :  { %v8179_v4 = vor.u32 %v9915_v33, %v8178_v62  ;;  %v8451_v33 = vor.u32 %v9983_v51, %v8450_v50  ;;  %v8818_v51 = vld [vmem:[#allocation8 + $0x588] sm:$0xf] }
 0x2da   :  { %5350 = vmatpush.bf16.msrb.mxu0 %v8639_v8  ;;  %5375 = vmatpush.bf16.msrb.mxu2 %v8911_v61  ;;  %v8290_v8 = vld [vmem:[#allocation8 + $0x168] sm:$0xf] }
 0x2db   :  { %v8291_v9 = vor.u32 %v9943_v23, %v8290_v8  ;;  %v8738_v61 = vld [vmem:[#allocation8 + $0x4e8] sm:$0xf] }
 0x2dc   :  { %5363 = vmatpush.bf16.msrb.mxu1 %v8767_v14  ;;  %v10088_v14 = vld [vmem:[#allocation8 + $0x604] sm:$0xf] }
 0x2dd   :  { %v8879_v17 = vor.u32 %v10088_v14, %v8876_v16  ;;  %v8867_v14 = vor.u32 %v10087_v49, %v8866_v43  ;;  %v8802_v43 = vld [vmem:[#allocation8 + $0x568] sm:$0xf]  ;;  %v10128_v49 = vld [vmem:[#allocation8 + $0x744] sm:$0xf] }
 0x2de   :  { %5351 = vmatpush.bf16.msrb.mxu0 %v8623_v2  ;;  %v3583_v53 = vpop.f32.mrf.mxu0  ;;  %5376 = vmatpush.bf16.msrb.mxu2 %v8895_v6  ;;  %v9939_v2 = vld [vmem:[#allocation8 + $0x154] sm:$0xf0]  ;;  %v8115_v6 = vor.u32 %v9899_v57, %v8114_v56  ;;  %v8386_v56 = vld [vmem:[#allocation8 + $0x228] sm:$0xf] }
 0x2df   :  { %v3584_v34 = vadd.f32 %v3583_v53, %v3571_v13  ;;  %v8739_v53 = vor.u32 %v10055_v0, %v8738_v61  ;;  %v9967_v57 = vld [vmem:[#allocation8 + $0x234] sm:$0xf0] }
 0x2e0   :  { %5364 = vmatpush.bf16.msrb.mxu1 %v8751_v27  ;;  %v3596_v42 = vpop.f32.mrf.mxu1  ;;  %v10039_v61 = vld [vmem:[#allocation8 + $0x474] sm:$0xf0]  ;;  %v8387_v0 = vor.u32 %v9967_v57, %v8386_v56  ;;  %v8626_v56 = vld [vmem:[#allocation8 + $0x408] sm:$0xf] }
 0x2e1   :  { %5352 = vmatmul.bf16.vlgmr.msrb.gmra.mxu0 %v10754_v37  ;;  %v3597_v28 = vadd.f32 %v3596_v42, %v3584_v34  ;;  %v8722_v42 = vld [vmem:[#allocation8 + $0x4c8] sm:$0xf]  ;;  %v9103_v34 = vor.u32 %v10144_v22, %v9100_v38  ;;  %v9963_v38 = vld [vmem:[#allocation8 + $0x214] sm:$0xf0] }
 0x2e2   :  { %5396 = vmatpush.bf16.msra.mxu0 %v8227_v30  ;;  %5377 = vmatpush.bf16.msrb.mxu2 %v8879_v17  ;;  %v8275_v30 = vor.u32 %v9939_v2, %v8274_v39  ;;  %v9975_v17 = vld [vmem:[#allocation8 + $0x274] sm:$0xf0]  ;;  %v8706_v39 = vld [vmem:[#allocation8 + $0x4a8] sm:$0xf] }
 0x2e3   :  { %5365 = vmatmul.bf16.vlgmr.msrb.gmra.mxu1 %v10756_v11  ;;  %v8370_v22 = vld [vmem:[#allocation8 + $0x208] sm:$0xf]  ;;  %v10027_v57 = vld [vmem:[#allocation8 + $0x414] sm:$0xf0] }
 0x2e4   :  { %5409 = vmatpush.bf16.msra.mxu1 %v8355_v47  ;;  %v8130_v47 = vld [vmem:[#allocation8 + $0x28] sm:$0xf] }
 0x2e5   :  { %5378 = vmatmul.bf16.vlgmr.msrb.gmra.mxu2 %v10779_v10  ;;  %v8131_v54 = vor.u32 %v9903_v12, %v8130_v47  ;;  %v9971_v47 = vld [vmem:[#allocation8 + $0x254] sm:$0xf0]  ;;  %v10798_v12 = vld [vmem:[#allocation10] sm:$0xf] }
 0x2e6   :  { %5397 = vmatpush.bf16.msra.mxu0 %v8211_v45  ;;  %5422 = vmatpush.bf16.msra.mxu2 %v8483_v48  ;;  %v3585_v15 = vpop.f32.mrf.mxu0  ;;  %v8723_v48 = vor.u32 %v10051_v5, %v8722_v42  ;;  %v3900_v44 = vperm.slane %v10798_v12, 0  ;;  %v10035_v42 = vld [vmem:[#allocation8 + $0x454] sm:$0xf0] }
 0x2e7   :  { %v8707_v15 = vor.u32 %v10047_v7, %v8706_v39  ;;  %v10115_v39 = vld [vmem:[#allocation8 + $0x6d4] sm:$0xf0]  ;;  %v8642_v7 = vld [vmem:[#allocation8 + $0x428] sm:$0xf] }
 0x2e8   :  { %5410 = vmatpush.bf16.msra.mxu1 %v8339_v19  ;;  %v3609_v27 = vpop.f32.mrf.mxu2  ;;  %v3598_v45 = vpop.f32.mrf.mxu1  ;;  %v10148_v19 = vld [vmem:[#allocation8 + $0x7e4] sm:$0xf] }
 0x2e9   :  { %v3610_v31 = vadd.f32 %v3609_v27, %v3597_v28  ;;  %v9119_v3 = vor.u32 %v10148_v19, %v9116_v55  ;;  %v8834_v28 = vld [vmem:[#allocation8 + $0x5a8] sm:$0xf]  ;;  %v9087_v27 = vor.u32 %v10140_v21, %v9084_v25  ;;  %v10043_v19 = vld [vmem:[#allocation8 + $0x494] sm:$0xf0]  ;;  %v9052_v55 = vld [vmem:[#allocation8 + $0x770] sm:$0xf0] }
 0x2ea   :  { %5398 = vmatpush.bf16.msra.mxu0 %v8195_v59  ;;  %v3622_v32 = vpop.f32.mrf.mxu3  ;;  %v8242_v59 = vld [vmem:[#allocation8 + $0x108] sm:$0xf]  ;;  %5423 = vmatpush.bf16.msra.mxu2 %v8467_v40  ;;  %v9020_v21 = vld [vmem:[#allocation8 + $0x730] sm:$0xf0] }
 0x2eb   :  { %v3623_v52 = vadd.f32 %v3622_v32, %v3610_v31  ;;  %v10136_v31 = vld [vmem:[#allocation8 + $0x784] sm:$0xf]  ;;  %v9068_v32 = vld [vmem:[#allocation8 + $0x790] sm:$0xf0]  ;;  %v8690_v45 = vld [vmem:[#allocation8 + $0x488] sm:$0xf] }
 0x2ec   :  { %5411 = vmatpush.bf16.msra.mxu1 %v8323_v20  ;;  %v9931_v20 = vld [vmem:[#allocation8 + $0x114] sm:$0xf0]  ;;  %v9071_v50 = vor.u32 %v10136_v31, %v9068_v32  ;;  %v8770_v31 = vld [vmem:[#allocation8 + $0x528] sm:$0xf] }
 0x2ed   :  { %v3633_v62 = vmax.f32 %v3623_v52, 0.0  ;;  %v8243_v13 = vor.u32 %v9931_v20, %v8242_v59  ;;  %v10075_v52 = vld [vmem:[#allocation8 + $0x594] sm:$0xf0]  ;;  %v8674_v20 = vld [vmem:[#allocation8 + $0x468] sm:$0xf] }
 0x2ee   :  { %5399 = vmatpush.bf16.msra.mxu0 %v8179_v4  ;;  %v9979_v4 = vld [vmem:[#allocation8 + $0x294] sm:$0xf0]  ;;  %5424 = vmatpush.bf16.msra.mxu2 %v8451_v33  ;;  %v8819_v59 = vor.u32 %v10075_v52, %v8818_v51  ;;  %v8962_v52 = vld [vmem:[#allocation8 + $0x6a8] sm:$0xf] }
 0x2ef   :  { %v8435_v16 = vor.u32 %v9979_v4, %v8434_v41  ;;  %v10063_v32 = vld [vmem:[#allocation8 + $0x534] sm:$0xf0] }
 0x2f0   :  { %5412 = vmatpush.bf16.msra.mxu1 %v8307_v18  ;;  %v10794_v18 = vpack.c.bf16 %v3633_v62, %v3633_v62  ;;  %v3611_v8 = vpop.f32.mrf.mxu2  ;;  %v10023_v51 = vld [vmem:[#allocation8 + $0x3f4] sm:$0xf0] }
 0x2f1   :  { %v8675_v8 = vor.u32 %v10039_v61, %v8674_v20  ;;  %v10059_v20 = vld [vmem:[#allocation8 + $0x514] sm:$0xf0]  ;;  %v9925_v61 = vld [vmem:[#allocation8 + $0xec] sm:$0xf] }
 0x2f2   :  { %5400 = vmatpush.bf16.msra.mxu0 %v8163_v35  ;;  %v3624_v23 = vpop.f32.mrf.mxu3  ;;  %5287 = vmatmul.bf16.vlgmr.msrb.gmra.mxu3 %v10794_v18  ;;  %v10083_v35 = vld [vmem:[#allocation8 + $0x5d4] sm:$0xf0] }
 0x2f3   :  { %5383 = vmatpush.bf16.msrb.mxu3 %v9119_v3  ;;  %5425 = vmatpush.bf16.msra.mxu2 %v8435_v16  ;;  %v8851_v2 = vor.u32 %v10083_v35, %v8850_v63  ;;  %v10071_v3 = vld [vmem:[#allocation8 + $0x574] sm:$0xf0]  ;;  %v8658_v16 = vld [vmem:[#allocation8 + $0x448] sm:$0xf]  ;;  %v8371_v63 = vor.u32 %v9963_v38, %v8370_v22 }
 0x2f4   :  { %5413 = vmatpush.bf16.msra.mxu1 %v8291_v9  ;;  %v8418_v9 = vld [vmem:[#allocation8 + $0x268] sm:$0xf]  ;;  %v10067_v35 = vld [vmem:[#allocation8 + $0x554] sm:$0xf0]  ;;  %v8659_v25 = vor.u32 %v10035_v42, %v8658_v16  ;;  %v8212_v16 = vld [vmem:[#allocation8 + $0xd8] sm:$0xf0] }
 0x2f5   :  { %v8419_v60 = vor.u32 %v9975_v17, %v8418_v9  ;;  %v10124_v17 = vld [vmem:[#allocation8 + $0x724] sm:$0xf]  ;;  %v10107_v22 = vld [vmem:[#allocation8 + $0x694] sm:$0xf0] }
 0x2f6   :  { %5401 = vmatpush.bf16.msra.mxu0 %v8147_v46  ;;  %v10079_v46 = vld [vmem:[#allocation8 + $0x5b4] sm:$0xf0] }
 0x2f7   :  { %5384 = vmatpush.bf16.msrb.mxu3 %v9103_v34  ;;  %5426 = vmatpush.bf16.msra.mxu2 %v8419_v60  ;;  %v8835_v40 = vor.u32 %v10079_v46, %v8834_v28  ;;  %v8786_v34 = vld [vmem:[#allocation8 + $0x548] sm:$0xf]  ;;  %v10031_v28 = vld [vmem:[#allocation8 + $0x434] sm:$0xf0] }
 0x2f8   :  { %5414 = vmatpush.bf16.msra.mxu1 %v8275_v30  ;;  %v8402_v30 = vld [vmem:[#allocation8 + $0x248] sm:$0xf]  ;;  %v8787_v60 = vor.u32 %v10067_v35, %v8786_v34  ;;  %v8340_v34 = vld [vmem:[#allocation8 + $0x1d8] sm:$0xf0] }
 0x2f9   :  { %v8403_v36 = vor.u32 %v9971_v47, %v8402_v30  ;;  %v9023_v47 = vor.u32 %v10124_v17, %v9020_v21  ;;  %v8578_v35 = vld [vmem:[#allocation8 + $0x3a8] sm:$0xf]  ;;  %v10103_v21 = vld [vmem:[#allocation8 + $0x674] sm:$0xf0] }
 0x2fa   :  { %5402 = vmatpush.bf16.msra.mxu0 %v8131_v54  ;;  %v10132_v54 = vld [vmem:[#allocation8 + $0x764] sm:$0xf]  ;;  %v8930_v17 = vld [vmem:[#allocation8 + $0x668] sm:$0xf] }
 0x2fb   :  { %5385 = vmatpush.bf16.msrb.mxu3 %v9087_v27  ;;  %5427 = vmatpush.bf16.msra.mxu2 %v8403_v36  ;;  %v9055_v33 = vor.u32 %v10132_v54, %v9052_v55  ;;  %v10120_v36 = vld [vmem:[#allocation8 + $0x704] sm:$0xf]  ;;  %v10111_v54 = vld [vmem:[#allocation8 + $0x6b4] sm:$0xf0]  ;;  %v8771_v55 = vor.u32 %v10063_v32, %v8770_v31 }
 0x2fc   :  { %5415 = vmatpush.bf16.msra.mxu1 %v8259_v58  ;;  %v8691_v58 = vor.u32 %v10043_v19, %v8690_v45  ;;  %v8610_v45 = vld [vmem:[#allocation8 + $0x3e8] sm:$0xf]  ;;  %v10099_v31 = vld [vmem:[#allocation8 + $0x654] sm:$0xf0] }
 0x2fe   :  { %5403 = vmatpush.bf16.msra.mxu0 %v8115_v6  ;;  %v5197_v62 = vpop.f32.mrf.mxu0  ;;  %v9036_v6 = vld [vmem:[#allocation8 + $0x750] sm:$0xf0] }
 0x2ff   :  { %5386 = vmatpush.bf16.msrb.mxu3 %v9071_v50  ;;  %v5198_v41 = vadd.f32 %v5197_v62, %v3900_v44  ;;  %5428 = vmatpush.bf16.msra.mxu2 %v8387_v0  ;;  %v9039_v5 = vor.u32 %v10128_v49, %v9036_v6  ;;  %v9004_v44 = vld [vmem:[#allocation8 + $0x710] sm:$0xf0]  ;;  %v8643_v50 = vor.u32 %v10031_v28, %v8642_v7  ;;  %v8228_v62 = vld [vmem:[#allocation8 + $0xf8] sm:$0xf0]  ;;  %v8594_v49 = vld [vmem:[#allocation8 + $0x3c8] sm:$0xf] }
 0x300   :  { %5416 = vmatpush.bf16.msra.mxu1 %v8243_v13  ;;  %v5210_v4 = vpop.f32.mrf.mxu1  ;;  %v8994_v13 = vld [vmem:[#allocation8 + $0x6e8] sm:$0xf]  ;;  %v8963_v0 = vor.u32 %v10111_v54, %v8962_v52  ;;  %v8931_v7 = vor.u32 %v10103_v21, %v8930_v17  ;;  %v9949_v28 = vld [vmem:[#allocation8 + $0x1ac] sm:$0xf]  ;;  %v10007_v54 = vld [vmem:[#allocation8 + $0x374] sm:$0xf0] }
 0x301   :  { %5404 = vmatmul.bf16.vlgmr.msra.gmra.mxu0 %v10732_v24  ;;  %v5211_v23 = vadd.f32 %v5210_v4, %v5198_v41  ;;  %v8627_v41 = vor.u32 %v10027_v57, %v8626_v56  ;;  %v10019_v4 = vld [vmem:[#allocation8 + $0x3d4] sm:$0xf0]  ;;  %v8946_v6 = vld [vmem:[#allocation8 + $0x688] sm:$0xf]  ;;  %v9985_v17 = vld [vmem:[#allocation8 + $0x2cc] sm:$0xf] }
 0x302   :  { %5448 = vmatpush.bf16.msrb.mxu0 %v8739_v53  ;;  %v10119_v53 = vld [vmem:[#allocation8 + $0x6f4] sm:$0xf0]  ;;  %5339 = vmatmul.bf16.vlgmr.msra.gmra.mxu3 %v10739_v29  ;;  %v8595_v42 = vor.u32 %v10019_v4, %v8594_v49  ;;  %v8546_v52 = vld [vmem:[#allocation8 + $0x368] sm:$0xf]  ;;  %v8468_v21 = vld [vmem:[#allocation8 + $0x2d8] sm:$0xf0] }
 0x303   :  { %5417 = vmatmul.bf16.vlgmr.msra.gmra.mxu1 %v10734_v1  ;;  %5387 = vmatpush.bf16.msrb.mxu3 %v9055_v33  ;;  %v8995_v9 = vor.u32 %v10119_v53, %v8994_v13  ;;  %v8611_v33 = vor.u32 %v10023_v51, %v8610_v45  ;;  %v8231_v53 = vor.u32 %v9925_v61, %v8228_v62  ;;  %v8308_v51 = vld [vmem:[#allocation8 + $0x198] sm:$0xf0]  ;;  %v10095_v56 = vld [vmem:[#allocation8 + $0x634] sm:$0xf0] }
 0x304   :  { %5461 = vmatpush.bf16.msrb.mxu1 %v8867_v14  ;;  %v8803_v14 = vor.u32 %v10071_v3, %v8802_v43  ;;  %5429 = vmatpush.bf16.msra.mxu2 %v8371_v63  ;;  %v9957_v43 = vld [vmem:[#allocation8 + $0x1ec] sm:$0xf]  ;;  %v8356_v3 = vld [vmem:[#allocation8 + $0x1f8] sm:$0xf0]  ;;  %v8547_v61 = vor.u32 %v10007_v54, %v8546_v52  ;;  %v10003_v49 = vld [vmem:[#allocation8 + $0x354] sm:$0xf0] }
 0x305   :  { %v9953_v63 = vld [vmem:[#allocation8 + $0x1cc] sm:$0xf]  ;;  %v10091_v4 = vld [vmem:[#allocation8 + $0x614] sm:$0xf0]  ;;  %v8116_v52 = vld [vmem:[#allocation8 + $0x18] sm:$0xf0] }
 0x306   :  { %5449 = vmatpush.bf16.msrb.mxu0 %v8723_v48  ;;  %v8978_v48 = vld [vmem:[#allocation8 + $0x6c8] sm:$0xf]  ;;  %v5199_v30 = vpop.f32.mrf.mxu0  ;;  %v9929_v54 = vld [vmem:[#allocation8 + $0x10c] sm:$0xf] }
 0x307   :  { %5388 = vmatpush.bf16.msrb.mxu3 %v9039_v5  ;;  %5430 = vmatmul.bf16.vlgmr.msra.gmra.mxu2 %v10736_v26  ;;  %v8947_v5 = vor.u32 %v10107_v22, %v8946_v6  ;;  %v10011_v30 = vld [vmem:[#allocation8 + $0x394] sm:$0xf0] }
 0x308   :  { %5462 = vmatpush.bf16.msrb.mxu1 %v8851_v2  ;;  %v5223_v2 = vpop.f32.mrf.mxu2  ;;  %5474 = vmatpush.bf16.msrb.mxu2 %v8995_v9  ;;  %v10015_v9 = vld [vmem:[#allocation8 + $0x3b4] sm:$0xf0] }
 0x309   :  { %v5224_v46 = vadd.f32 %v5223_v2, %v5211_v23  ;;  %v8359_v23 = vor.u32 %v9957_v43, %v8356_v3  ;;  %v8196_v2 = vld [vmem:[#allocation8 + $0xb8] sm:$0xf0]  ;;  %v8530_v43 = vld [vmem:[#allocation8 + $0x348] sm:$0xf] }
 0x30a   :  { %5450 = vmatpush.bf16.msrb.mxu0 %v8707_v15  ;;  %v5236_v27 = vpop.f32.mrf.mxu3  ;;  %v5212_v15 = vpop.f32.mrf.mxu1 }
 0x30b   :  { %v10803_v19 = vadd.f32 %v5236_v27, %v5224_v46  ;;  %5389 = vmatpush.bf16.msrb.mxu3 %v9023_v47  ;;  %v8324_v46 = vld [vmem:[#allocation8 + $0x1b8] sm:$0xf0]  ;;  %v8562_v27 = vld [vmem:[#allocation8 + $0x388] sm:$0xf] }
 0x30c   :  { %5463 = vmatpush.bf16.msrb.mxu1 %v8835_v40  ;;  %v8979_v40 = vor.u32 %v10115_v39, %v8978_v48  ;;  %v8343_v48 = vor.u32 %v9953_v63, %v8340_v34  ;;  %v9917_v39 = vld [vmem:[#allocation8 + $0xac] sm:$0xf]  ;;  %v8914_v47 = vld [vmem:[#allocation8 + $0x648] sm:$0xf]  ;;  %v8327_v15 = vor.u32 %v9949_v28, %v8324_v46  ;;  %v8260_v28 = vld [vmem:[#allocation8 + $0x138] sm:$0xf0] }
 0x30d   :  { %v8199_v32 = vor.u32 %v9917_v39, %v8196_v2  ;;  %v8915_v45 = vor.u32 %v10099_v31, %v8914_v47  ;;  %v9937_v63 = vld [vmem:[#allocation8 + $0x14c] sm:$0xf]  ;;  %v9995_v47 = vld [vmem:[#allocation8 + $0x314] sm:$0xf0]  ;;  %v9122_v31 = vld [vmem:[#allocation8 + $0x7e8] sm:$0xf] }
 0x30e   :  { %5451 = vmatpush.bf16.msrb.mxu0 %v8691_v58  ;;  %v8754_v58 = vld [vmem:[#allocation8 + $0x508] sm:$0xf]  ;;  %5475 = vmatpush.bf16.msrb.mxu2 %v8979_v40  ;;  %v9913_v40 = vld [vmem:[#allocation8 + $0x8c] sm:$0xf] }
 0x310   :  { %5464 = vmatpush.bf16.msrb.mxu1 %v8819_v59  ;;  %v9007_v59 = vor.u32 %v10120_v36, %v9004_v44  ;;  %v5225_v38 = vpop.f32.mrf.mxu2  ;;  %v8180_v36 = vld [vmem:[#allocation8 + $0x98] sm:$0xf0]  ;;  %v8563_v44 = vor.u32 %v10011_v30, %v8562_v27  ;;  %v8471_v27 = vor.u32 %v9985_v17, %v8468_v21  ;;  %v8498_v30 = vld [vmem:[#allocation8 + $0x308] sm:$0xf]  ;;  %v10077_v17 = vld [vmem:[#allocation8 + $0x5ac] sm:$0xf] }
 0x311   :  { %v8183_v57 = vor.u32 %v9913_v40, %v8180_v36  ;;  %v9989_v38 = vld [vmem:[#allocation8 + $0x2ec] sm:$0xf]  ;;  %v8452_v36 = vld [vmem:[#allocation8 + $0x2b8] sm:$0xf0] }
 0x312   :  { %5452 = vmatpush.bf16.msrb.mxu0 %v8675_v8  ;;  %v8755_v8 = vor.u32 %v10059_v20, %v8754_v58  ;;  %v5238_v13 = vpop.f32.mrf.mxu3  ;;  %5390 = vmatpush.bf16.msrb.mxu3 %v9007_v59  ;;  %v9909_v59 = vld [vmem:[#allocation8 + $0x6c] sm:$0xf]  ;;  %v8164_v20 = vld [vmem:[#allocation8 + $0x78] sm:$0xf0] }
 0x313   :  { %5476 = vmatpush.bf16.msrb.mxu2 %v8963_v0  ;;  %v8292_v0 = vld [vmem:[#allocation8 + $0x178] sm:$0xf0]  ;;  %v8167_v13 = vor.u32 %v9909_v59, %v8164_v20  ;;  %v9981_v40 = vld [vmem:[#allocation8 + $0x2ac] sm:$0xf] }
 0x314   :  { %5465 = vmatpush.bf16.msrb.mxu1 %v8803_v14  ;;  %v9921_v14 = vld [vmem:[#allocation8 + $0xcc] sm:$0xf]  ;;  %v8740_v59 = vld [vmem:[#allocation8 + $0x4f8] sm:$0xf0] }
 0x315   :  { %5391 = vmatmul.bf16.vlgmr.msrb.gmra.mxu3 %v10794_v18  ;;  %v10085_v20 = vld [vmem:[#allocation8 + $0x5ec] sm:$0xf] }
 0x316   :  { %5453 = vmatpush.bf16.msrb.mxu0 %v8659_v25  ;;  %5435 = vmatpush.bf16.msra.mxu3 %v8611_v33  ;;  %v8215_v25 = vor.u32 %v9921_v14, %v8212_v16  ;;  %v9941_v33 = vld [vmem:[#allocation8 + $0x16c] sm:$0xf]  ;;  %v8531_v14 = vor.u32 %v10003_v49, %v8530_v43 }
 0x317   :  { %5477 = vmatpush.bf16.msrb.mxu2 %v8947_v5  ;;  %v8148_v5 = vld [vmem:[#allocation8 + $0x58] sm:$0xf0]  ;;  %v9977_v43 = vld [vmem:[#allocation8 + $0x28c] sm:$0xf] }
 0x318   :  { %5466 = vmatpush.bf16.msrb.mxu1 %v8787_v60  ;;  %v8579_v60 = vor.u32 %v10015_v9, %v8578_v35  ;;  %v8276_v35 = vld [vmem:[#allocation8 + $0x158] sm:$0xf0]  ;;  %v8514_v9 = vld [vmem:[#allocation8 + $0x328] sm:$0xf] }
 0x319   :  { %v8279_v39 = vor.u32 %v9937_v63, %v8276_v35 }
 0x31a   :  { %5454 = vmatpush.bf16.msrb.mxu0 %v8643_v50  ;;  %5436 = vmatpush.bf16.msra.mxu3 %v8595_v42  ;;  %v9945_v50 = vld [vmem:[#allocation8 + $0x18c] sm:$0xf] }
 0x31b   :  { %5478 = vmatpush.bf16.msrb.mxu2 %v8931_v7  ;;  %v8311_v58 = vor.u32 %v9945_v50, %v8308_v51  ;;  %v9905_v42 = vld [vmem:[#allocation8 + $0x4c] sm:$0xf]  ;;  %v8499_v51 = vor.u32 %v9995_v47, %v8498_v30  ;;  %v8692_v30 = vld [vmem:[#allocation8 + $0x498] sm:$0xf0] }
 0x31c   :  { %5467 = vmatpush.bf16.msrb.mxu1 %v8771_v55  ;;  %v8898_v55 = vld [vmem:[#allocation8 + $0x628] sm:$0xf]  ;;  %v9933_v7 = vld [vmem:[#allocation8 + $0x12c] sm:$0xf] }
 0x31d   :  { %v8899_v62 = vor.u32 %v10095_v56, %v8898_v55  ;;  %v8263_v50 = vor.u32 %v9933_v7, %v8260_v28  ;;  %v8244_v55 = vld [vmem:[#allocation8 + $0x118] sm:$0xf0]  ;;  %v10073_v47 = vld [vmem:[#allocation8 + $0x58c] sm:$0xf] }
 0x31e   :  { %5455 = vmatpush.bf16.msrb.mxu0 %v8627_v41  ;;  %5437 = vmatpush.bf16.msra.mxu3 %v8579_v60  ;;  %v5249_v3 = vpop.f32.mrf.mxu0  ;;  %v8882_v41 = vld [vmem:[#allocation8 + $0x608] sm:$0xf]  ;;  %v8132_v60 = vld [vmem:[#allocation8 + $0x38] sm:$0xf0]  ;;  %v8247_v49 = vor.u32 %v9929_v54, %v8244_v55  ;;  %v10069_v54 = vld [vmem:[#allocation8 + $0x56c] sm:$0xf] }
 0x31f   :  { %5479 = vmatpush.bf16.msrb.mxu2 %v8915_v45  ;;  %v5250_v6 = vadd.f32 %v5249_v3, %v10803_v19  ;;  %v8883_v16 = vor.u32 %v10091_v4, %v8882_v41  ;;  %v9999_v19 = vld [vmem:[#allocation8 + $0x334] sm:$0xf0]  ;;  %v9897_v45 = vld [vmem:[#allocation8 + $0xc] sm:$0xf]  ;;  %v8436_v3 = vld [vmem:[#allocation8 + $0x298] sm:$0xf0] }
 0x320   :  { %5468 = vmatpush.bf16.msrb.mxu1 %v8755_v8  ;;  %v5262_v22 = vpop.f32.mrf.mxu1  ;;  %v8484_v8 = vld [vmem:[#allocation8 + $0x2f8] sm:$0xf0]  ;;  %v8515_v2 = vor.u32 %v9999_v19, %v8514_v9  ;;  %v10045_v9 = vld [vmem:[#allocation8 + $0x4ac] sm:$0xf] }
 0x321   :  { %5456 = vmatmul.bf16.vlgmr.msrb.gmra.mxu0 %v10754_v37  ;;  %v8487_v34 = vor.u32 %v9989_v38, %v8484_v8  ;;  %v8724_v38 = vld [vmem:[#allocation8 + $0x4d8] sm:$0xf0]  ;;  %v10081_v8 = vld [vmem:[#allocation8 + $0x5cc] sm:$0xf] }
 0x322   :  { %5500 = vmatpush.bf16.msra.mxu0 %v8231_v53  ;;  %5438 = vmatpush.bf16.msra.mxu3 %v8563_v44  ;;  %v8295_v53 = vor.u32 %v9941_v33, %v8292_v0  ;;  %v10147_v33 = vld [vmem:[#allocation8 + $0x7d4] sm:$0xf0]  ;;  %v8119_v0 = vor.u32 %v9897_v45, %v8116_v52  ;;  %v8708_v19 = vld [vmem:[#allocation8 + $0x4b8] sm:$0xf0] }
 0x323   :  { %5469 = vmatmul.bf16.vlgmr.msrb.gmra.mxu1 %v10756_v11  ;;  %5480 = vmatpush.bf16.msrb.mxu2 %v8899_v62  ;;  %v9106_v62 = vld [vmem:[#allocation8 + $0x7c8] sm:$0xf]  ;;  %v8711_v7 = vor.u32 %v10045_v9, %v8708_v19  ;;  %v8676_v52 = vld [vmem:[#allocation8 + $0x478] sm:$0xf0] }
 0x324   :  { %5513 = vmatpush.bf16.msra.mxu1 %v8359_v23  ;;  %v10810_v23 = vadd.f32 %v5262_v22, %v5250_v6  ;;  %v9107_v6 = vor.u32 %v10147_v33, %v9106_v62  ;;  %v10049_v22 = vld [vmem:[#allocation8 + $0x4cc] sm:$0xf]  ;;  %v8372_v62 = vld [vmem:[#allocation8 + $0x218] sm:$0xf0] }
 0x325   :  { %v8727_v63 = vor.u32 %v10049_v22, %v8724_v38  ;;  %v10065_v38 = vld [vmem:[#allocation8 + $0x54c] sm:$0xf] }
 0x326   :  { %5501 = vmatpush.bf16.msra.mxu0 %v8215_v25  ;;  %5439 = vmatpush.bf16.msra.mxu3 %v8547_v61  ;;  %v8151_v25 = vor.u32 %v9905_v42, %v8148_v5  ;;  %v5251_v46 = vpop.f32.mrf.mxu0  ;;  %v8868_v61 = vld [vmem:[#allocation8 + $0x5f8] sm:$0xf0]  ;;  %v9973_v42 = vld [vmem:[#allocation8 + $0x26c] sm:$0xf] }
 0x327   :  { %5481 = vmatpush.bf16.msrb.mxu2 %v8883_v16  ;;  %v8871_v4 = vor.u32 %v10085_v20, %v8868_v61  ;;  %v10143_v16 = vld [vmem:[#allocation8 + $0x7b4] sm:$0xf0]  ;;  %v8420_v5 = vld [vmem:[#allocation8 + $0x278] sm:$0xf0] }
 0x328   :  { %5514 = vmatpush.bf16.msra.mxu1 %v8343_v48  ;;  %v9901_v48 = vld [vmem:[#allocation8 + $0x2c] sm:$0xf]  ;;  %v8423_v21 = vor.u32 %v9973_v42, %v8420_v5  ;;  %v8980_v5 = vld [vmem:[#allocation8 + $0x6d8] sm:$0xf0] }
 0x329   :  { %v8135_v44 = vor.u32 %v9901_v48, %v8132_v60  ;;  %v9074_v48 = vld [vmem:[#allocation8 + $0x788] sm:$0xf]  ;;  %v8404_v60 = vld [vmem:[#allocation8 + $0x258] sm:$0xf0]  ;;  %v10113_v42 = vld [vmem:[#allocation8 + $0x6cc] sm:$0xf] }
 0x32a   :  { %5502 = vmatpush.bf16.msra.mxu0 %v8199_v32  ;;  %5440 = vmatpush.bf16.msra.mxu3 %v8531_v14  ;;  %v5264_v32 = vpop.f32.mrf.mxu1  ;;  %v9090_v14 = vld [vmem:[#allocation8 + $0x7a8] sm:$0xf] }
 0x32b   :  { %5526 = vmatpush.bf16.msra.mxu2 %v8487_v34  ;;  %v9091_v35 = vor.u32 %v10143_v16, %v9090_v14  ;;  %v9058_v32 = vld [vmem:[#allocation8 + $0x768] sm:$0xf]  ;;  %v10127_v14 = vld [vmem:[#allocation8 + $0x734] sm:$0xf0] }
 0x32c   :  { %5515 = vmatpush.bf16.msra.mxu1 %v8327_v15  ;;  %v10151_v15 = vld [vmem:[#allocation8 + $0x7f4] sm:$0xf0]  ;;  %5482 = vmatmul.bf16.vlgmr.msrb.gmra.mxu2 %v10779_v10 }
 0x32d   :  { %v9123_v56 = vor.u32 %v10151_v15, %v9122_v31  ;;  %v10135_v15 = vld [vmem:[#allocation8 + $0x774] sm:$0xf0] }
 0x32e   :  { %5503 = vmatpush.bf16.msra.mxu0 %v8183_v57  ;;  %5441 = vmatpush.bf16.msra.mxu3 %v8515_v2  ;;  %v8455_v57 = vor.u32 %v9981_v40, %v8452_v36  ;;  %v9969_v2 = vld [vmem:[#allocation8 + $0x24c] sm:$0xf]  ;;  %v3901_v40 = vperm.slane %v10798_v12, 1 }
 0x32f   :  { %5527 = vmatpush.bf16.msra.mxu2 %v8471_v27  ;;  %v10041_v27 = vld [vmem:[#allocation8 + $0x48c] sm:$0xf]  ;;  %v8407_v31 = vor.u32 %v9969_v2, %v8404_v60  ;;  %v10123_v2 = vld [vmem:[#allocation8 + $0x714] sm:$0xf0] }
 0x330   :  { %5516 = vmatpush.bf16.msra.mxu1 %v8311_v58  ;;  %v10053_v58 = vld [vmem:[#allocation8 + $0x4ec] sm:$0xf] }
 0x331   :  { %v8743_v41 = vor.u32 %v10053_v58, %v8740_v59  ;;  %v9965_v36 = vld [vmem:[#allocation8 + $0x22c] sm:$0xf]  ;;  %v9042_v58 = vld [vmem:[#allocation8 + $0x748] sm:$0xf]  ;;  %v10131_v59 = vld [vmem:[#allocation8 + $0x754] sm:$0xf0] }
 0x332   :  { %5504 = vmatpush.bf16.msra.mxu0 %v8167_v13  ;;  %5442 = vmatpush.bf16.msra.mxu3 %v8499_v51  ;;  %v8439_v13 = vor.u32 %v9977_v43, %v8436_v3  ;;  %v10037_v51 = vld [vmem:[#allocation8 + $0x46c] sm:$0xf]  ;;  %v8996_v43 = vld [vmem:[#allocation8 + $0x6f8] sm:$0xf0] }
 0x333   :  { %5528 = vmatpush.bf16.msra.mxu2 %v8455_v57  ;;  %v8804_v57 = vld [vmem:[#allocation8 + $0x578] sm:$0xf0]  ;;  %v9961_v12 = vld [vmem:[#allocation8 + $0x20c] sm:$0xf]  ;;  %v8679_v33 = vor.u32 %v10037_v51, %v8676_v52 }
 0x334   :  { %5517 = vmatpush.bf16.msra.mxu1 %v8295_v53  ;;  %v8852_v53 = vld [vmem:[#allocation8 + $0x5d8] sm:$0xf0]  ;;  %v8375_v22 = vor.u32 %v9961_v12, %v8372_v62  ;;  %v10021_v60 = vld [vmem:[#allocation8 + $0x3ec] sm:$0xf] }
 0x335   :  { %5443 = vmatmul.bf16.vlgmr.msra.gmra.mxu3 %v10739_v29  ;;  %v8855_v34 = vor.u32 %v10081_v8, %v8852_v53  ;;  %v8788_v8 = vld [vmem:[#allocation8 + $0x558] sm:$0xf0]  ;;  %v9026_v53 = vld [vmem:[#allocation8 + $0x728] sm:$0xf]  ;;  %v10105_v52 = vld [vmem:[#allocation8 + $0x68c] sm:$0xf] }
 0x336   :  { %5505 = vmatpush.bf16.msra.mxu0 %v8151_v25  ;;  %5487 = vmatpush.bf16.msrb.mxu3 %v9123_v56  ;;  %v8836_v25 = vld [vmem:[#allocation8 + $0x5b8] sm:$0xf0]  ;;  %v9027_v19 = vor.u32 %v10127_v14, %v9026_v53  ;;  %v10101_v12 = vld [vmem:[#allocation8 + $0x66c] sm:$0xf] }
 0x337   :  { %5529 = vmatpush.bf16.msra.mxu2 %v8439_v13  ;;  %v8839_v28 = vor.u32 %v10077_v17, %v8836_v25  ;;  %v10061_v17 = vld [vmem:[#allocation8 + $0x52c] sm:$0xf]  ;;  %v8596_v51 = vld [vmem:[#allocation8 + $0x3d8] sm:$0xf0] }
 0x338   :  { %5518 = vmatpush.bf16.msra.mxu1 %v8279_v39  ;;  %v10139_v39 = vld [vmem:[#allocation8 + $0x794] sm:$0xf0]  ;;  %v8932_v62 = vld [vmem:[#allocation8 + $0x678] sm:$0xf0] }
 0x339   :  { %v9075_v46 = vor.u32 %v10139_v39, %v9074_v48  ;;  %v8983_v48 = vor.u32 %v10113_v42, %v8980_v5  ;;  %v9010_v39 = vld [vmem:[#allocation8 + $0x708] sm:$0xf]  ;;  %v8916_v53 = vld [vmem:[#allocation8 + $0x658] sm:$0xf0]  ;;  %v10005_v42 = vld [vmem:[#allocation8 + $0x36c] sm:$0xf] }
 0x33a   :  { %5506 = vmatpush.bf16.msra.mxu0 %v8135_v44  ;;  %5488 = vmatpush.bf16.msrb.mxu3 %v9107_v6  ;;  %v8695_v44 = vor.u32 %v10041_v27, %v8692_v30  ;;  %v8660_v6 = vld [vmem:[#allocation8 + $0x458] sm:$0xf0]  ;;  %v9162_v5 = vld [vmem:[#allocation11 + $0x40] sm:$0xf] }
 0x33b   :  { %5530 = vmatpush.bf16.msra.mxu2 %v8423_v21  ;;  %v8772_v21 = vld [vmem:[#allocation8 + $0x538] sm:$0xf0] }
 0x33c   :  { %5519 = vmatpush.bf16.msra.mxu1 %v8263_v50  ;;  %v9059_v50 = vor.u32 %v10135_v15, %v9058_v32  ;;  %v8964_v27 = vld [vmem:[#allocation8 + $0x6b8] sm:$0xf0]  ;;  %v8775_v30 = vor.u32 %v10061_v17, %v8772_v21  ;;  %v10057_v32 = vld [vmem:[#allocation8 + $0x50c] sm:$0xf] }
 0x33d   :  { %v8756_v15 = vld [vmem:[#allocation8 + $0x518] sm:$0xf0] }
 0x33e   :  { %5507 = vmatpush.bf16.msra.mxu0 %v8119_v0  ;;  %5489 = vmatpush.bf16.msrb.mxu3 %v9091_v35  ;;  %v5301_v55 = vpop.f32.mrf.mxu0  ;;  %v10117_v0 = vld [vmem:[#allocation8 + $0x6ec] sm:$0xf]  ;;  %v8644_v35 = vld [vmem:[#allocation8 + $0x438] sm:$0xf0] }
 0x33f   :  { %5531 = vmatpush.bf16.msra.mxu2 %v8407_v31  ;;  %v5302_v20 = vadd.f32 %v5301_v55, %v3901_v40  ;;  %v8999_v13 = vor.u32 %v10117_v0, %v8996_v43  ;;  %v8628_v31 = vld [vmem:[#allocation8 + $0x418] sm:$0xf0]  ;;  %v10009_v43 = vld [vmem:[#allocation8 + $0x38c] sm:$0xf] }
 0x340   :  { %5520 = vmatpush.bf16.msra.mxu1 %v8247_v49  ;;  %v5314_v61 = vpop.f32.mrf.mxu1  ;;  %v8807_v49 = vor.u32 %v10069_v54, %v8804_v57  ;;  %v8948_v54 = vld [vmem:[#allocation8 + $0x698] sm:$0xf0] }
 0x341   :  { %5508 = vmatmul.bf16.vlgmr.msra.gmra.mxu0 %v10732_v24  ;;  %v8820_v24 = vld [vmem:[#allocation8 + $0x598] sm:$0xf0]  ;;  %v10817_v3 = vadd.f32 %v5314_v61, %v5302_v20  ;;  %v8951_v57 = vor.u32 %v10105_v52, %v8948_v54  ;;  %v10165_v20 = vld [vmem:[#allocation11 + $0x64] sm:$0xf0] }
 0x342   :  { %5552 = vmatpush.bf16.msrb.mxu0 %v8743_v41  ;;  %5490 = vmatpush.bf16.msrb.mxu3 %v9075_v46  ;;  %v8823_v45 = vor.u32 %v10073_v47, %v8820_v24  ;;  %v9043_v41 = vor.u32 %v10131_v59, %v9042_v58  ;;  %v10109_v46 = vld [vmem:[#allocation8 + $0x6ac] sm:$0xf]  ;;  %v9011_v24 = vor.u32 %v10123_v2, %v9010_v39  ;;  %v9178_v59 = vld [vmem:[#allocation11 + $0x60] sm:$0xf]  ;;  %v8580_v61 = vld [vmem:[#allocation8 + $0x3b8] sm:$0xf0] }
 0x343   :  { %5521 = vmatmul.bf16.vlgmr.msra.gmra.mxu1 %v10734_v1  ;;  %v8388_v1 = vld [vmem:[#allocation8 + $0x238] sm:$0xf0]  ;;  %v10025_v47 = vld [vmem:[#allocation8 + $0x40c] sm:$0xf]  ;;  %v9179_v0 = vor.u32 %v10165_v20, %v9178_v59  ;;  %v9154_v2 = vld [vmem:[#allocation11 + $0x30] sm:$0xf] }
 0x344   :  { %5565 = vmatpush.bf16.msrb.mxu1 %v8871_v4  ;;  %v8391_v56 = vor.u32 %v9965_v36, %v8388_v1  ;;  %v10033_v4 = vld [vmem:[#allocation8 + $0x44c] sm:$0xf]  ;;  %v8967_v36 = vor.u32 %v10109_v46, %v8964_v27  ;;  %v8548_v17 = vld [vmem:[#allocation8 + $0x378] sm:$0xf0]  ;;  %v9234_v27 = vld [vmem:[#allocation11 + $0xd0] sm:$0xf] }
 0x345   :  { %v8663_v16 = vor.u32 %v10033_v4, %v8660_v6  ;;  %v10017_v1 = vld [vmem:[#allocation8 + $0x3cc] sm:$0xf]  ;;  %v8935_v4 = vor.u32 %v10101_v12, %v8932_v62  ;;  %v10163_v6 = vld [vmem:[#allocation11 + $0x54] sm:$0xf0] }
 0x346   :  { %5553 = vmatpush.bf16.msrb.mxu0 %v8727_v63  ;;  %5491 = vmatpush.bf16.msrb.mxu3 %v9059_v50  ;;  %v8791_v63 = vor.u32 %v10065_v38, %v8788_v8  ;;  %v5303_v9 = vpop.f32.mrf.mxu0  ;;  %v8631_v50 = vor.u32 %v10025_v47, %v8628_v31  ;;  %v10013_v58 = vld [vmem:[#allocation8 + $0x3ac] sm:$0xf]  ;;  %v10183_v38 = vld [vmem:[#allocation11 + $0xf4] sm:$0xf0] }
 0x347   :  { %5532 = vmatpush.bf16.msra.mxu2 %v8391_v56  ;;  %v8599_v56 = vor.u32 %v10017_v1, %v8596_v51  ;;  %v8564_v8 = vld [vmem:[#allocation8 + $0x398] sm:$0xf0]  ;;  %v9242_v9 = vld [vmem:[#allocation11 + $0xe0] sm:$0xf]  ;;  %v10001_v39 = vld [vmem:[#allocation8 + $0x34c] sm:$0xf] }
 0x348   :  { %5566 = vmatpush.bf16.msrb.mxu1 %v8855_v34  ;;  %v10029_v34 = vld [vmem:[#allocation8 + $0x42c] sm:$0xf]  ;;  %v5316_v25 = vpop.f32.mrf.mxu1  ;;  %v8900_v21 = vld [vmem:[#allocation8 + $0x638] sm:$0xf0] }
 0x349   :  { %v10159_v46 = vld [vmem:[#allocation11 + $0x34] sm:$0xf0]  ;;  %v10177_v51 = vld [vmem:[#allocation11 + $0xc4] sm:$0xf0] }
 0x34a   :  { %5554 = vmatpush.bf16.msrb.mxu0 %v8711_v7  ;;  %5492 = vmatpush.bf16.msrb.mxu3 %v9043_v41  ;;  %v8647_v7 = vor.u32 %v10029_v34, %v8644_v35  ;;  %v8583_v41 = vor.u32 %v10013_v58, %v8580_v61  ;;  %v10161_v35 = vld [vmem:[#allocation11 + $0x44] sm:$0xf0]  ;;  %v8532_v31 = vld [vmem:[#allocation8 + $0x358] sm:$0xf0]  ;;  %v9218_v61 = vld [vmem:[#allocation11 + $0xb0] sm:$0xf] }
 0x34b   :  { %5533 = vmatpush.bf16.msra.mxu2 %v8375_v22  ;;  %v9250_v22 = vld [vmem:[#allocation11 + $0xf0] sm:$0xf]  ;;  %v8535_v1 = vor.u32 %v10001_v39, %v8532_v31  ;;  %v9997_v52 = vld [vmem:[#allocation8 + $0x32c] sm:$0xf]  ;;  %v8516_v54 = vld [vmem:[#allocation8 + $0x338] sm:$0xf0] }
 0x34c   :  { %5567 = vmatpush.bf16.msrb.mxu1 %v8839_v28  ;;  %v8612_v28 = vld [vmem:[#allocation8 + $0x3f8] sm:$0xf0]  ;;  %v9251_v14 = vor.u32 %v10183_v38, %v9250_v22  ;;  %v8519_v59 = vor.u32 %v9997_v52, %v8516_v54  ;;  %v9130_v22 = vld [vmem:[#allocation11] sm:$0xf]  ;;  %v9244_v52 = vld [vmem:[#allocation11 + $0xe8] sm:$0xf0] }
 0x34d   :  { %v8615_v40 = vor.u32 %v10021_v60, %v8612_v28  ;;  %v10155_v20 = vld [vmem:[#allocation11 + $0x14] sm:$0xf0]  ;;  %v10835_v54 = vld [vmem:[#allocation10] sm:$0xf] }
 0x34e   :  { %5555 = vmatpush.bf16.msrb.mxu0 %v8695_v44  ;;  %5534 = vmatmul.bf16.vlgmr.msra.gmra.mxu2 %v10736_v26  ;;  %v9186_v44 = vld [vmem:[#allocation11 + $0x70] sm:$0xf]  ;;  %v8759_v26 = vor.u32 %v10057_v32, %v8756_v15  ;;  %v8884_v32 = vld [vmem:[#allocation8 + $0x618] sm:$0xf0] }
 0x34f   :  { %5578 = vmatpush.bf16.msrb.mxu2 %v8999_v13  ;;  %5493 = vmatpush.bf16.msrb.mxu3 %v9027_v19  ;;  %v10097_v13 = vld [vmem:[#allocation8 + $0x64c] sm:$0xf]  ;;  %v10175_v12 = vld [vmem:[#allocation11 + $0xb4] sm:$0xf0] }
 0x350   :  { %5568 = vmatpush.bf16.msrb.mxu1 %v8823_v45  ;;  %v10167_v45 = vld [vmem:[#allocation11 + $0x74] sm:$0xf0]  ;;  %v8919_v34 = vor.u32 %v10097_v13, %v8916_v53  ;;  %v10181_v19 = vld [vmem:[#allocation11 + $0xe4] sm:$0xf0]  ;;  %v9210_v13 = vld [vmem:[#allocation11 + $0xa0] sm:$0xf] }
 0x351   :  { %v9187_v55 = vor.u32 %v10167_v45, %v9186_v44  ;;  %v10157_v45 = vld [vmem:[#allocation11 + $0x24] sm:$0xf0]  ;;  %v9092_v39 = vld [vmem:[#allocation8 + $0x7b8] sm:$0xf0] }
 0x352   :  { %5556 = vmatpush.bf16.msrb.mxu0 %v8679_v33  ;;  %v10821_v33 = vpop.f32.mrf.mxu2  ;;  %v10173_v53 = vld [vmem:[#allocation11 + $0xa4] sm:$0xf0] }
 0x353   :  { %5579 = vmatpush.bf16.msrb.mxu2 %v8983_v48  ;;  %5494 = vmatpush.bf16.msrb.mxu3 %v9011_v24  ;;  %v9163_v48 = vor.u32 %v10161_v35, %v9162_v5  ;;  %v10089_v24 = vld [vmem:[#allocation8 + $0x60c] sm:$0xf]  ;;  %v9211_v5 = vor.u32 %v10173_v53, %v9210_v13 }
 0x354   :  { %5569 = vmatpush.bf16.msrb.mxu1 %v8807_v49  ;;  %v9170_v49 = vld [vmem:[#allocation11 + $0x50] sm:$0xf]  ;;  %v8887_v44 = vor.u32 %v10089_v24, %v8884_v32  ;;  %v10182_v24 = vld [vmem:[#allocation11 + $0xf4] sm:$0xf]  ;;  %v9252_v32 = vld [vmem:[#allocation11 + $0xf8] sm:$0xf0] }
 0x356   :  { %5557 = vmatpush.bf16.msrb.mxu0 %v8663_v16  ;;  %5495 = vmatmul.bf16.vlgmr.msrb.gmra.mxu3 %v10794_v18  ;;  %v9171_v16 = vor.u32 %v10163_v6, %v9170_v49  ;;  %v9219_v49 = vor.u32 %v10175_v12, %v9218_v61  ;;  %v5276_v61 = vadd.f32 %v10821_v33, %v10810_v23  ;;  %v10156_v23 = vld [vmem:[#allocation11 + $0x24] sm:$0xf]  ;;  %v9148_v33 = vld [vmem:[#allocation11 + $0x28] sm:$0xf0] }
 0x357   :  { %5539 = vmatpush.bf16.msra.mxu3 %v8615_v40  ;;  %5580 = vmatpush.bf16.msrb.mxu2 %v8967_v36  ;;  %v9155_v40 = vor.u32 %v10159_v46, %v9154_v2  ;;  %v9146_v36 = vld [vmem:[#allocation11 + $0x20] sm:$0xf]  ;;  %v10169_v46 = vld [vmem:[#allocation11 + $0x84] sm:$0xf0] }
 0x358   :  { %5570 = vmatpush.bf16.msrb.mxu1 %v8791_v63  ;;  %v8567_v63 = vor.u32 %v10009_v43, %v8564_v8  ;;  %v8500_v43 = vld [vmem:[#allocation8 + $0x318] sm:$0xf0]  ;;  %v10153_v8 = vld [vmem:[#allocation11 + $0x4] sm:$0xf0] }
 0x35a   :  { %5558 = vmatpush.bf16.msrb.mxu0 %v8647_v7  ;;  %v5277_v25 = vpop.f32.mrf.mxu2  ;;  %v8551_v7 = vor.u32 %v10005_v42, %v8548_v17  ;;  %v9188_v42 = vld [vmem:[#allocation11 + $0x78] sm:$0xf0]  ;;  %v10171_v17 = vld [vmem:[#allocation11 + $0x94] sm:$0xf0] }
 0x35b   :  { %5540 = vmatpush.bf16.msra.mxu3 %v8599_v56  ;;  %5581 = vmatpush.bf16.msrb.mxu2 %v8951_v57  ;;  %v9147_v56 = vor.u32 %v10157_v45, %v9146_v36  ;;  %v9138_v57 = vld [vmem:[#allocation11 + $0x10] sm:$0xf]  ;;  %v9255_v36 = vor.u32 %v10182_v24, %v9252_v32 }
 0x35c   :  { %5571 = vmatpush.bf16.msrb.mxu1 %v8775_v30  ;;  %v10179_v30 = vld [vmem:[#allocation11 + $0xd4] sm:$0xf0]  ;;  %v9139_v6 = vor.u32 %v10155_v20, %v9138_v57  ;;  %v10158_v20 = vld [vmem:[#allocation11 + $0x34] sm:$0xf] }
 0x35d   :  { %v9235_v15 = vor.u32 %v10179_v30, %v9234_v27  ;;  %v9172_v30 = vld [vmem:[#allocation11 + $0x58] sm:$0xf0]  ;;  %v9060_v57 = vld [vmem:[#allocation8 + $0x778] sm:$0xf0] }
 0x35e   :  { %5559 = vmatpush.bf16.msrb.mxu0 %v8631_v50  ;;  %v10825_v60 = vpop.f32.mrf.mxu0  ;;  %v9226_v50 = vld [vmem:[#allocation11 + $0xc0] sm:$0xf] }
 0x35f   :  { %5541 = vmatpush.bf16.msra.mxu3 %v8583_v41  ;;  %5582 = vmatpush.bf16.msrb.mxu2 %v8935_v4  ;;  %v10149_v41 = vld [vmem:[#allocation8 + $0x7ec] sm:$0xf]  ;;  %v9124_v4 = vld [vmem:[#allocation8 + $0x7f8] sm:$0xf0] }
 0x360   :  { %5572 = vmatpush.bf16.msrb.mxu1 %v8759_v26  ;;  %v10827_v47 = vpop.f32.mrf.mxu1  ;;  %v9227_v26 = vor.u32 %v10177_v51, %v9226_v50  ;;  %v9164_v50 = vld [vmem:[#allocation11 + $0x48] sm:$0xf0]  ;;  %v10180_v51 = vld [vmem:[#allocation11 + $0xe4] sm:$0xf] }
 0x361   :  { %5560 = vmatmul.bf16.vlgmr.msrb.gmra.mxu0 %v10754_v37  ;;  %v10093_v37 = vld [vmem:[#allocation8 + $0x62c] sm:$0xf] }
 0x362   :  { %6002 = vmatpush.bf16.msra.mxu0 %v9187_v55  ;;  %v8903_v28 = vor.u32 %v10093_v37, %v8900_v21  ;;  %v10829_v55 = vpop.f32.mrf.mxu2  ;;  %v10164_v21 = vld [vmem:[#allocation11 + $0x64] sm:$0xf] }
 0x363   :  { %5573 = vmatmul.bf16.vlgmr.msrb.gmra.mxu1 %v10756_v11  ;;  %v9243_v11 = vor.u32 %v10181_v19, %v9242_v9  ;;  %5542 = vmatpush.bf16.msra.mxu3 %v8567_v63  ;;  %v10145_v63 = vld [vmem:[#allocation8 + $0x7cc] sm:$0xf]  ;;  %v9131_v9 = vor.u32 %v10153_v8, %v9130_v22  ;;  %v9202_v19 = vld [vmem:[#allocation11 + $0x90] sm:$0xf] }
 0x364   :  { %6015 = vmatpush.bf16.msra.mxu1 %v9251_v14  ;;  %5583 = vmatpush.bf16.msrb.mxu2 %v8919_v34  ;;  %v9127_v14 = vor.u32 %v10149_v41, %v9124_v4  ;;  %v9108_v34 = vld [vmem:[#allocation8 + $0x7d8] sm:$0xf0]  ;;  %v9203_v25 = vor.u32 %v10171_v17, %v9202_v19  ;;  %v10129_v22 = vld [vmem:[#allocation8 + $0x74c] sm:$0xf]  ;;  %v9151_v17 = vor.u32 %v10156_v23, %v9148_v33 }
 0x365   :  { %v9111_v37 = vor.u32 %v10145_v63, %v9108_v34  ;;  %v10176_v63 = vld [vmem:[#allocation11 + $0xc4] sm:$0xf]  ;;  %v9228_v34 = vld [vmem:[#allocation11 + $0xc8] sm:$0xf0] }
 0x366   :  { %6003 = vmatpush.bf16.msra.mxu0 %v9179_v0  ;;  %v5355_v58 = vpop.f32.mrf.mxu0  ;;  %v9993_v0 = vld [vmem:[#allocation8 + $0x30c] sm:$0xf] }
 0x367   :  { %5543 = vmatpush.bf16.msra.mxu3 %v8551_v7  ;;  %v8503_v38 = vor.u32 %v9993_v0, %v8500_v43  ;;  %v10162_v7 = vld [vmem:[#allocation11 + $0x54] sm:$0xf]  ;;  %v9247_v58 = vor.u32 %v10180_v51, %v9244_v52  ;;  %v9156_v0 = vld [vmem:[#allocation11 + $0x38] sm:$0xf0]  ;;  %v5328_v52 = vadd.f32 %v10829_v55, %v10817_v3 }
 0x368   :  { %6016 = vmatpush.bf16.msra.mxu1 %v9243_v11  ;;  %5584 = vmatpush.bf16.msrb.mxu2 %v8903_v28  ;;  %v5368_v62 = vpop.f32.mrf.mxu1  ;;  %v9180_v11 = vld [vmem:[#allocation11 + $0x68] sm:$0xf0]  ;;  %v9194_v28 = vld [vmem:[#allocation11 + $0x80] sm:$0xf]  ;;  %v10178_v43 = vld [vmem:[#allocation11 + $0xd4] sm:$0xf] }
 0x369   :  { %v9183_v2 = vor.u32 %v10164_v21, %v9180_v11  ;;  %v9195_v31 = vor.u32 %v10169_v46, %v9194_v28  ;;  %v10121_v28 = vld [vmem:[#allocation8 + $0x70c] sm:$0xf]  ;;  %v9012_v46 = vld [vmem:[#allocation8 + $0x718] sm:$0xf0] }
 0x36a   :  { %6004 = vmatpush.bf16.msra.mxu0 %v9171_v16  ;;  %v10166_v16 = vld [vmem:[#allocation11 + $0x74] sm:$0xf]  ;;  %v5329_v35 = vpop.f32.mrf.mxu2  ;;  %v9015_v32 = vor.u32 %v10121_v28, %v9012_v46  ;;  %v10196_v28 = vld [vmem:[#allocation11 + $0x164] sm:$0xf]  ;;  %v9308_v46 = vld [vmem:[#allocation11 + $0x168] sm:$0xf0] }
 0x36b   :  { %5544 = vmatpush.bf16.msra.mxu3 %v8535_v1  ;;  %v10125_v35 = vld [vmem:[#allocation8 + $0x72c] sm:$0xf] }
 0x36c   :  { %6017 = vmatpush.bf16.msra.mxu1 %v9235_v15  ;;  %5585 = vmatpush.bf16.msrb.mxu2 %v8887_v44  ;;  %v10137_v15 = vld [vmem:[#allocation8 + $0x78c] sm:$0xf]  ;;  %v10160_v44 = vld [vmem:[#allocation11 + $0x44] sm:$0xf] }
 0x36e   :  { %6005 = vmatpush.bf16.msra.mxu0 %v9163_v48  ;;  %v10141_v48 = vld [vmem:[#allocation8 + $0x7ac] sm:$0xf] }
 0x36f   :  { %5586 = vmatmul.bf16.vlgmr.msrb.gmra.mxu2 %v10779_v10  ;;  %5545 = vmatpush.bf16.msra.mxu3 %v8519_v59  ;;  %v9191_v10 = vor.u32 %v10166_v16, %v9188_v42  ;;  %v9095_v27 = vor.u32 %v10141_v48, %v9092_v39  ;;  %v9167_v59 = vor.u32 %v10160_v44, %v9164_v50  ;;  %v10174_v48 = vld [vmem:[#allocation11 + $0xb4] sm:$0xf]  ;;  %v9220_v39 = vld [vmem:[#allocation11 + $0xb8] sm:$0xf0] }
 0x370   :  { %6018 = vmatpush.bf16.msra.mxu1 %v9227_v26  ;;  %v3902_v26 = vperm.slane %v10835_v54, 2  ;;  %v9159_v16 = vor.u32 %v10158_v20, %v9156_v0  ;;  %v9204_v44 = vld [vmem:[#allocation11 + $0x98] sm:$0xf0]  ;;  %v9196_v20 = vld [vmem:[#allocation11 + $0x88] sm:$0xf0] }
 0x371   :  { %v10197_v0 = vld [vmem:[#allocation11 + $0x164] sm:$0xf0] }
 0x372   :  { %6006 = vmatpush.bf16.msra.mxu0 %v9155_v40  ;;  %v9076_v40 = vld [vmem:[#allocation8 + $0x798] sm:$0xf0]  ;;  %v10833_v1 = vpop.f32.mrf.mxu2 }
 0x373   :  { %5546 = vmatpush.bf16.msra.mxu3 %v8503_v38  ;;  %v9079_v45 = vor.u32 %v10137_v15, %v9076_v40  ;;  %v9044_v38 = vld [vmem:[#allocation8 + $0x758] sm:$0xf0]  ;;  %v10152_v15 = vld [vmem:[#allocation11 + $0x4] sm:$0xf]  ;;  %v9132_v40 = vld [vmem:[#allocation11 + $0x8] sm:$0xf0] }
 0x374   :  { %6019 = vmatpush.bf16.msra.mxu1 %v9219_v49  ;;  %v9236_v49 = vld [vmem:[#allocation11 + $0xd8] sm:$0xf0] }
 0x375   :  { %v9239_v8 = vor.u32 %v10178_v43, %v9236_v49  ;;  %v9298_v49 = vld [vmem:[#allocation11 + $0x150] sm:$0xf] }
 0x376   :  { %6007 = vmatpush.bf16.msra.mxu0 %v9147_v56  ;;  %5547 = vmatmul.bf16.vlgmr.msra.gmra.mxu3 %v10739_v29  ;;  %v9175_v29 = vor.u32 %v10162_v7, %v9172_v30  ;;  %v10133_v56 = vld [vmem:[#allocation8 + $0x76c] sm:$0xf]  ;;  %v10172_v30 = vld [vmem:[#allocation11 + $0xa4] sm:$0xf] }
 0x377   :  { %5591 = vmatpush.bf16.msrb.mxu3 %v9127_v14  ;;  %v9063_v62 = vor.u32 %v10133_v56, %v9060_v57  ;;  %v9314_v56 = vld [vmem:[#allocation11 + $0x170] sm:$0xf]  ;;  %v10199_v57 = vld [vmem:[#allocation11 + $0x174] sm:$0xf0] }
 0x378   :  { %6020 = vmatpush.bf16.msra.mxu1 %v9211_v5  ;;  %v9047_v5 = vor.u32 %v10129_v22, %v9044_v38  ;;  %v9290_v38 = vld [vmem:[#allocation11 + $0x140] sm:$0xf] }
 0x37a   :  { %6008 = vmatpush.bf16.msra.mxu0 %v9139_v6  ;;  %v5288_v6 = vpop.f32.mrf.mxu3  ;;  %v5381_v14 = vpop.f32.mrf.mxu2 }
 0x37b   :  { %5592 = vmatpush.bf16.msrb.mxu3 %v9111_v37  ;;  %v5289_v13 = vadd.f32 %v5288_v6, %v5276_v61  ;;  %v10154_v37 = vld [vmem:[#allocation11 + $0x14] sm:$0xf] }
 0x37c   :  { %6021 = vmatpush.bf16.msra.mxu1 %v9203_v25  ;;  %v9140_v25 = vld [vmem:[#allocation11 + $0x18] sm:$0xf0] }
 0x37d   :  { %v5604_v42 = vmax.f32 %v5289_v13, 0.0  ;;  %v9143_v24 = vor.u32 %v10154_v37, %v9140_v25  ;;  %v10185_v25 = vld [vmem:[#allocation11 + $0x104] sm:$0xf0] }
 0x37e   :  { %6009 = vmatpush.bf16.msra.mxu0 %v9131_v9  ;;  %v5405_v12 = vpop.f32.mrf.mxu0  ;;  %v9028_v9 = vld [vmem:[#allocation8 + $0x738] sm:$0xf0] }
 0x37f   :  { %5593 = vmatpush.bf16.msrb.mxu3 %v9095_v27  ;;  %v5406_v41 = vadd.f32 %v5405_v12, %v3902_v26  ;;  %v5608_v19 = vpack.c.bf16 %v5604_v42, %v5604_v42  ;;  %v9031_v11 = vor.u32 %v10125_v35, %v9028_v9  ;;  %v9223_v27 = vor.u32 %v10174_v48, %v9220_v39  ;;  %v9282_v42 = vld [vmem:[#allocation11 + $0x130] sm:$0xf]  ;;  %v9274_v9 = vld [vmem:[#allocation11 + $0x120] sm:$0xf]  ;;  %v10198_v39 = vld [vmem:[#allocation11 + $0x174] sm:$0xf] }
 0x380   :  { %6022 = vmatpush.bf16.msra.mxu1 %v9195_v31  ;;  %v5418_v4 = vpop.f32.mrf.mxu1  ;;  %v9212_v31 = vld [vmem:[#allocation11 + $0xa8] sm:$0xf0] }
 0x381   :  { %v10840_v53 = vadd.f32 %v5418_v4, %v5406_v41  ;;  %6010 = vmatmul.bf16.vlgmr.msra.gmra.mxu0 %v5608_v19  ;;  %v10195_v41 = vld [vmem:[#allocation11 + $0x154] sm:$0xf0] }
 0x382   :  { %6054 = vmatpush.bf16.msrb.mxu0 %v9191_v10  ;;  %v9231_v10 = vor.u32 %v10176_v63, %v9228_v34  ;;  %v5290_v7 = vpop.f32.mrf.mxu3  ;;  %v9299_v4 = vor.u32 %v10195_v41, %v9298_v49  ;;  %v9260_v49 = vld [vmem:[#allocation11 + $0x108] sm:$0xf0] }
 0x383   :  { %5594 = vmatpush.bf16.msrb.mxu3 %v9079_v45  ;;  %v9135_v45 = vor.u32 %v10152_v15, %v9132_v40 }
 0x384   :  { %6067 = vmatpush.bf16.msrb.mxu1 %v9255_v36  ;;  %v9215_v36 = vor.u32 %v10172_v30, %v9212_v31  ;;  %v9311_v30 = vor.u32 %v10196_v28, %v9308_v46  ;;  %v3903_v31 = vperm.slane %v10835_v54, 3 }
 0x386   :  { %6055 = vmatpush.bf16.msrb.mxu0 %v9183_v2  ;;  %v5407_v21 = vpop.f32.mrf.mxu0 }
 0x387   :  { %5595 = vmatpush.bf16.msrb.mxu3 %v9063_v62  ;;  %v9306_v62 = vld [vmem:[#allocation11 + $0x160] sm:$0xf] }
 0x388   :  { %6068 = vmatpush.bf16.msrb.mxu1 %v9247_v58  ;;  %v5420_v2 = vpop.f32.mrf.mxu1  ;;  %v10168_v58 = vld [vmem:[#allocation11 + $0x84] sm:$0xf] }
 0x389   :  { %v9199_v61 = vor.u32 %v10168_v58, %v9196_v20  ;;  %v9316_v2 = vld [vmem:[#allocation11 + $0x178] sm:$0xf0]  ;;  %v10188_v20 = vld [vmem:[#allocation11 + $0x124] sm:$0xf] }
 0x38a   :  { %6056 = vmatpush.bf16.msrb.mxu0 %v9175_v29  ;;  %v10170_v29 = vld [vmem:[#allocation11 + $0x94] sm:$0xf]  ;;  %v5340_v50 = vpop.f32.mrf.mxu3  ;;  %v10846_v43 = vpop.f32.mrf.mxu2  ;;  %v9319_v7 = vor.u32 %v10198_v39, %v9316_v2  ;;  %v9338_v2 = vld [vmem:[#allocation11 + $0x1a0] sm:$0xf] }
 0x38b   :  { %5596 = vmatpush.bf16.msrb.mxu3 %v9047_v5  ;;  %v9207_v51 = vor.u32 %v10170_v29, %v9204_v44  ;;  %v5341_v26 = vadd.f32 %v5340_v50, %v5328_v52  ;;  %v10192_v44 = vld [vmem:[#allocation11 + $0x144] sm:$0xf] }
 0x38c   :  { %6069 = vmatpush.bf16.msrb.mxu1 %v9239_v8  ;;  %v10193_v8 = vld [vmem:[#allocation11 + $0x144] sm:$0xf0] }
 0x38d   :  { %v5354_v12 = vadd.f32 %v10825_v60, %v5341_v26 }
 0x38e   :  { %6057 = vmatpush.bf16.msrb.mxu0 %v9167_v59  ;;  %v9315_v59 = vor.u32 %v10199_v57, %v9314_v56  ;;  %v10190_v56 = vld [vmem:[#allocation11 + $0x134] sm:$0xf]  ;;  %v9284_v57 = vld [vmem:[#allocation11 + $0x138] sm:$0xf0] }
 0x38f   :  { %5597 = vmatpush.bf16.msrb.mxu3 %v9031_v11  ;;  %v5367_v55 = vadd.f32 %v10827_v47, %v5354_v12  ;;  %v10191_v47 = vld [vmem:[#allocation11 + $0x134] sm:$0xf0]  ;;  %v9258_v11 = vld [vmem:[#allocation11 + $0x100] sm:$0xf]  ;;  %v9287_v58 = vor.u32 %v10190_v56, %v9284_v57  ;;  %v9364_v56 = vld [vmem:[#allocation11 + $0x1d8] sm:$0xf0] }
 0x390   :  { %6070 = vmatpush.bf16.msrb.mxu1 %v9231_v10  ;;  %6028 = vmatpush.bf16.msra.mxu2 %v9315_v59  ;;  %v9283_v5 = vor.u32 %v10191_v47, %v9282_v42  ;;  %v10189_v10 = vld [vmem:[#allocation11 + $0x124] sm:$0xf0]  ;;  %v9259_v48 = vor.u32 %v10185_v25, %v9258_v11  ;;  %v9362_v47 = vld [vmem:[#allocation11 + $0x1d0] sm:$0xf] }
 0x391   :  { %v5380_v60 = vadd.f32 %v10833_v1, %v5367_v55  ;;  %v9266_v1 = vld [vmem:[#allocation11 + $0x110] sm:$0xf]  ;;  %v10184_v55 = vld [vmem:[#allocation11 + $0x104] sm:$0xf] }
 0x392   :  { %6058 = vmatpush.bf16.msrb.mxu0 %v9159_v16  ;;  %v5342_v3 = vpop.f32.mrf.mxu3  ;;  %v5433_v13 = vpop.f32.mrf.mxu2  ;;  %v9291_v16 = vor.u32 %v10193_v8, %v9290_v38  ;;  %v9263_v41 = vor.u32 %v10184_v55, %v9260_v49  ;;  %v10215_v38 = vld [vmem:[#allocation11 + $0x1f4] sm:$0xf0]  ;;  %v10202_v49 = vld [vmem:[#allocation11 + $0x194] sm:$0xf] }
 0x393   :  { %5598 = vmatpush.bf16.msrb.mxu3 %v9015_v32  ;;  %v9300_v32 = vld [vmem:[#allocation11 + $0x158] sm:$0xf0] }
 0x394   :  { %6071 = vmatpush.bf16.msrb.mxu1 %v9223_v27 }
 0x396   :  { %6059 = vmatpush.bf16.msrb.mxu0 %v9151_v17  ;;  %5599 = vmatmul.bf16.vlgmr.msrb.gmra.mxu3 %v10794_v18  ;;  %v9307_v18 = vor.u32 %v10197_v0, %v9306_v62  ;;  %v10187_v17 = vld [vmem:[#allocation11 + $0x114] sm:$0xf0]  ;;  %v10186_v62 = vld [vmem:[#allocation11 + $0x114] sm:$0xf]  ;;  %v9268_v0 = vld [vmem:[#allocation11 + $0x118] sm:$0xf0] }
 0x397   :  { %v9267_v21 = vor.u32 %v10187_v17, %v9266_v1 }
 0x398   :  { %6072 = vmatpush.bf16.msrb.mxu1 %v9215_v36  ;;  %6029 = vmatpush.bf16.msra.mxu2 %v9307_v18  ;;  %v9271_v18 = vor.u32 %v10186_v62, %v9268_v0  ;;  %v9348_v62 = vld [vmem:[#allocation11 + $0x1b8] sm:$0xf0] }
 0x39a   :  { %6060 = vmatpush.bf16.msrb.mxu0 %v9143_v24  ;;  %v5392_v14 = vpop.f32.mrf.mxu3  ;;  %v10194_v24 = vld [vmem:[#allocation11 + $0x154] sm:$0xf] }
 0x39b   :  { %v5393_v23 = vadd.f32 %v5392_v14, %v5380_v60  ;;  %v9303_v15 = vor.u32 %v10194_v24, %v9300_v32  ;;  %v9378_v60 = vld [vmem:[#allocation11 + $0x1f0] sm:$0xf]  ;;  %v9370_v14 = vld [vmem:[#allocation11 + $0x1e0] sm:$0xf]  ;;  %v10201_v32 = vld [vmem:[#allocation11 + $0x184] sm:$0xf0] }
 0x39c   :  { %6073 = vmatpush.bf16.msrb.mxu1 %v9207_v51  ;;  %6030 = vmatpush.bf16.msra.mxu2 %v9299_v4  ;;  %v5432_v4 = vadd.f32 %v10846_v43, %v10840_v53  ;;  %v9379_v13 = vor.u32 %v10215_v38, %v9378_v60 }
 0x39d   :  { %v5605_v33 = vmax.f32 %v5393_v23, 0.0 }
 0x39e   :  { %6061 = vmatpush.bf16.msrb.mxu0 %v9135_v45  ;;  %v10849_v6 = vpop.f32.mrf.mxu0  ;;  %v9292_v45 = vld [vmem:[#allocation11 + $0x148] sm:$0xf0]  ;;  %6041 = vmatpush.bf16.msra.mxu3 %v9379_v13 }
 0x39f   :  { %v5609_v63 = vpack.c.bf16 %v5605_v33, %v5605_v33  ;;  %v9295_v26 = vor.u32 %v10192_v44, %v9292_v45  ;;  %v10212_v44 = vld [vmem:[#allocation11 + $0x1e4] sm:$0xf]  ;;  %v9372_v45 = vld [vmem:[#allocation11 + $0x1e8] sm:$0xf0] }
 0x3a0   :  { %6074 = vmatpush.bf16.msrb.mxu1 %v9199_v61  ;;  %v10851_v22 = vpop.f32.mrf.mxu1  ;;  %6031 = vmatpush.bf16.msra.mxu2 %v9291_v16  ;;  %v9276_v61 = vld [vmem:[#allocation11 + $0x128] sm:$0xf0]  ;;  %v10213_v16 = vld [vmem:[#allocation11 + $0x1e4] sm:$0xf0] }
 0x3a1   :  { %6062 = vmatmul.bf16.vlgmr.msrb.gmra.mxu0 %v5608_v19  ;;  %v9275_v19 = vor.u32 %v10189_v10, %v9274_v9  ;;  %6023 = vmatmul.bf16.vlgmr.msra.gmra.mxu1 %v5609_v63  ;;  %v9279_v12 = vor.u32 %v10188_v20, %v9276_v61  ;;  %v9371_v33 = vor.u32 %v10213_v16, %v9370_v14  ;;  %v10209_v9 = vld [vmem:[#allocation11 + $0x1c4] sm:$0xf0]  ;;  %v9324_v13 = vld [vmem:[#allocation11 + $0x188] sm:$0xf0] }
 0x3a2   :  { %v5394_v37 = vpop.f32.mrf.mxu3 }
 0x3a3   :  { %6042 = vmatpush.bf16.msra.mxu3 %v9371_v33  ;;  %v9346_v37 = vld [vmem:[#allocation11 + $0x1b0] sm:$0xf] }
 0x3a4   :  { %6032 = vmatpush.bf16.msra.mxu2 %v9283_v5  ;;  %v10211_v5 = vld [vmem:[#allocation11 + $0x1d4] sm:$0xf0] }
 0x3a6   :  { %v5459_v34 = vpop.f32.mrf.mxu0 }
 0x3a7   :  { %v9363_v34 = vor.u32 %v10211_v5, %v9362_v47 }
 0x3a8   :  { %v5472_v35 = vpop.f32.mrf.mxu1  ;;  %6033 = vmatpush.bf16.msra.mxu2 %v9275_v19 }
 0x3a9   :  { %6043 = vmatpush.bf16.msra.mxu3 %v9363_v34  ;;  %v9354_v35 = vld [vmem:[#allocation11 + $0x1c0] sm:$0xf] }
 0x3aa   :  { %v9355_v19 = vor.u32 %v10209_v9, %v9354_v35 }
 0x3ac   :  { %6034 = vmatpush.bf16.msra.mxu2 %v9267_v21  ;;  %v10207_v21 = vld [vmem:[#allocation11 + $0x1b4] sm:$0xf0] }
 0x3ad   :  { %6044 = vmatpush.bf16.msra.mxu3 %v9355_v19  ;;  %v9347_v25 = vor.u32 %v10207_v21, %v9346_v37 }
 0x3af   :  { %v5483_v27 = vpop.f32.mrf.mxu2 }
 0x3b0   :  { %6035 = vmatpush.bf16.msra.mxu2 %v9259_v48 }
 0x3b1   :  { %6075 = vmatmul.bf16.vlgmr.msrb.gmra.mxu1 %v5609_v63  ;;  %6045 = vmatpush.bf16.msra.mxu3 %v9347_v25 }
 0x3b4   :  { %6080 = vmatpush.bf16.msrb.mxu2 %v9319_v7  ;;  %v10205_v7 = vld [vmem:[#allocation11 + $0x1a4] sm:$0xf0] }
 0x3b5   :  { %v9339_v28 = vor.u32 %v10205_v7, %v9338_v2  ;;  %v10231_v2 = vld [vmem:[#allocation14 + $0x78] sm:$0xff]  ;;  %v10222_v7 = vld [vmem:[#allocation14 + $0x30] sm:$0xff] }
 0x3b6   :  { %6255 = vmatpush.bf16.msra.mxu1 %v10231_v2 }
 0x3b7   :  { %v5485_v52 = vpop.f32.mrf.mxu2  ;;  %6046 = vmatpush.bf16.msra.mxu3 %v9339_v28  ;;  %v10230_v28 = vld [vmem:[#allocation14 + $0x70] sm:$0xff] }
 0x3b8   :  { %6081 = vmatpush.bf16.msrb.mxu2 %v9311_v30  ;;  %v5444_v51 = vpop.f32.mrf.mxu3  ;;  %v10203_v30 = vld [vmem:[#allocation11 + $0x194] sm:$0xf0] }
 0x3b9   :  { %v5445_v8 = vadd.f32 %v5444_v51, %v5432_v4  ;;  %v9375_v51 = vor.u32 %v10212_v44, %v9372_v45  ;;  %v10216_v44 = vld [vmem:[#allocation14] sm:$0xff] }
 0x3ba   :  { %6256 = vmatpush.bf16.msra.mxu1 %v10230_v28  ;;  %v10228_v45 = vld [vmem:[#allocation14 + $0x60] sm:$0xff] }
 0x3bb   :  { %v5458_v23 = vadd.f32 %v10849_v6, %v5445_v8  ;;  %v10200_v8 = vld [vmem:[#allocation11 + $0x184] sm:$0xf] }
 0x3bc   :  { %6082 = vmatpush.bf16.msrb.mxu2 %v9303_v15  ;;  %v10214_v15 = vld [vmem:[#allocation11 + $0x1f4] sm:$0xf]  ;;  %v9327_v16 = vor.u32 %v10200_v8, %v9324_v13 }
 0x3bd   :  { %v5471_v63 = vadd.f32 %v10851_v22, %v5458_v23 }
 0x3be   :  { %v5509_v40 = vpop.f32.mrf.mxu0 }
 0x3bf   :  { %v5510_v36 = vadd.f32 %v5509_v40, %v3903_v31  ;;  %v5484_v10 = vadd.f32 %v5483_v27, %v5471_v63  ;;  %v9330_v27 = vld [vmem:[#allocation11 + $0x190] sm:$0xf]  ;;  %v9322_v31 = vld [vmem:[#allocation11 + $0x180] sm:$0xf]  ;;  %v9380_v40 = vld [vmem:[#allocation11 + $0x1f8] sm:$0xf0] }
 0x3c0   :  { %v5522_v29 = vpop.f32.mrf.mxu1  ;;  %6083 = vmatpush.bf16.msrb.mxu2 %v9295_v26  ;;  %v5446_v3 = vpop.f32.mrf.mxu3  ;;  %v9331_v24 = vor.u32 %v10203_v30, %v9330_v27  ;;  %v10210_v26 = vld [vmem:[#allocation11 + $0x1d4] sm:$0xf]  ;;  %v10220_v30 = vld [vmem:[#allocation14 + $0x20] sm:$0xff] }
 0x3c1   :  { %v10855_v50 = vadd.f32 %v5522_v29, %v5510_v36  ;;  %v9323_v36 = vor.u32 %v10201_v32, %v9322_v31  ;;  %v9383_v29 = vor.u32 %v10214_v15, %v9380_v40  ;;  %v9367_v57 = vor.u32 %v10210_v26, %v9364_v56  ;;  %v10204_v3 = vld [vmem:[#allocation11 + $0x1a4] sm:$0xf]  ;;  %v10219_v31 = vld [vmem:[#allocation14 + $0x18] sm:$0xff]  ;;  %v10218_v32 = vld [vmem:[#allocation14 + $0x10] sm:$0xff] }
 0x3c2   :  { %6047 = vmatpush.bf16.msra.mxu3 %v9331_v24  ;;  %v10225_v26 = vld [vmem:[#allocation14 + $0x48] sm:$0xff]  ;;  %v10224_v56 = vld [vmem:[#allocation14 + $0x40] sm:$0xff] }
 0x3c4   :  { %6084 = vmatpush.bf16.msrb.mxu2 %v9287_v58  ;;  %v10208_v58 = vld [vmem:[#allocation11 + $0x1c4] sm:$0xf] }
 0x3c6   :  { %v5511_v54 = vpop.f32.mrf.mxu0  ;;  %6048 = vmatpush.bf16.msra.mxu3 %v9323_v36  ;;  %v10217_v36 = vld [vmem:[#allocation14 + $0x8] sm:$0xff] }
 0x3c7   :  { %v9356_v54 = vld [vmem:[#allocation11 + $0x1c8] sm:$0xf0] }
 0x3c8   :  { %v5524_v59 = vpop.f32.mrf.mxu1  ;;  %6085 = vmatpush.bf16.msrb.mxu2 %v9279_v12  ;;  %v10206_v12 = vld [vmem:[#allocation11 + $0x1b4] sm:$0xf] }
 0x3c9   :  { %v9359_v59 = vor.u32 %v10208_v58, %v9356_v54  ;;  %v9351_v0 = vor.u32 %v10206_v12, %v9348_v62 }
 0x3ca   :  { %6093 = vmatpush.bf16.msrb.mxu3 %v9383_v29  ;;  %v10229_v29 = vld [vmem:[#allocation14 + $0x68] sm:$0xff] }
 0x3cb   :  { %6257 = vmatpush.bf16.msra.mxu1 %v10229_v29 }
 0x3cc   :  { %6086 = vmatpush.bf16.msrb.mxu2 %v9271_v18  ;;  %v9340_v18 = vld [vmem:[#allocation11 + $0x1a8] sm:$0xf0] }
 0x3cd   :  { %v9343_v55 = vor.u32 %v10204_v3, %v9340_v18 }
 0x3ce   :  { %6094 = vmatpush.bf16.msrb.mxu3 %v9375_v51  ;;  %v10227_v51 = vld [vmem:[#allocation14 + $0x58] sm:$0xff] }
 0x3cf   :  { %6258 = vmatpush.bf16.msra.mxu1 %v10228_v45 }
 0x3d0   :  { %6087 = vmatpush.bf16.msrb.mxu2 %v9263_v41  ;;  %v9332_v41 = vld [vmem:[#allocation11 + $0x198] sm:$0xf0] }
 0x3d1   :  { %v10860_v42 = vpop.f32.mrf.mxu2  ;;  %v9335_v60 = vor.u32 %v10202_v49, %v9332_v41 }
 0x3d2   :  { %6095 = vmatpush.bf16.msrb.mxu3 %v9367_v57  ;;  %v5536_v14 = vadd.f32 %v10860_v42, %v10855_v50 }
 0x3d3   :  { %6259 = vmatpush.bf16.msra.mxu1 %v10227_v51 }
 0x3d6   :  { %6096 = vmatpush.bf16.msrb.mxu3 %v9359_v59 }
 0x3d9   :  { %v5496_v1 = vpop.f32.mrf.mxu3  ;;  %v5537_v6 = vpop.f32.mrf.mxu2 }
 0x3da   :  { %v5497_v17 = vadd.f32 %v5496_v1, %v5484_v10  ;;  %6097 = vmatpush.bf16.msrb.mxu3 %v9351_v0  ;;  %v5676_v1 = vld [vmem:[#allocation13] sm:$0x3] }
 0x3db   :  { %v5678_v37 = vperm.slane %v5676_v1, 0 }
 0x3dc   :  { %v5606_v11 = vmax.f32 %v5497_v17, 0.0 }
 0x3de   :  { %v10863_v53 = vpop.f32.mrf.mxu0  ;;  %v5610_v48 = vpack.c.bf16 %v5606_v11, %v5606_v11  ;;  %6098 = vmatpush.bf16.msrb.mxu3 %v9343_v55 }
 0x3e0   :  { %v10865_v43 = vpop.f32.mrf.mxu1  ;;  %6036 = vmatmul.bf16.vlgmr.msra.gmra.mxu2 %v5610_v48 }
 0x3e1   :  { %v5498_v46 = vpop.f32.mrf.mxu3 }
 0x3e2   :  { %6099 = vmatpush.bf16.msrb.mxu3 %v9335_v60  ;;  %v10221_v46 = vld [vmem:[#allocation14 + $0x28] sm:$0xff] }
 0x3e6   :  { %v5563_v22 = vpop.f32.mrf.mxu0  ;;  %6100 = vmatpush.bf16.msrb.mxu3 %v9327_v16 }
 0x3e8   :  { %v5576_v39 = vpop.f32.mrf.mxu1 }
 0x3e9   :  { %v10223_v39 = vld [vmem:[#allocation14 + $0x38] sm:$0xff] }
 0x3ea   :  { %6242 = vmatpush.bf16.msra.mxu0 %v10223_v39 }
 0x3ee   :  { %6243 = vmatpush.bf16.msra.mxu0 %v10222_v7 }
 0x3f0   :  { %6088 = vmatmul.bf16.vlgmr.msrb.gmra.mxu2 %v5610_v48 }
 0x3f2   :  { %v5587_v52 = vpop.f32.mrf.mxu2  ;;  %6244 = vmatpush.bf16.msra.mxu0 %v10221_v46 }
 0x3f6   :  { %6245 = vmatpush.bf16.msra.mxu0 %v10220_v30 }
 0x3f9   :  { %v5548_v20 = vpop.f32.mrf.mxu3 }
 0x3fa   :  { %v5589_v61 = vpop.f32.mrf.mxu2  ;;  %v5549_v23 = vadd.f32 %v5548_v20, %v5536_v14  ;;  %6246 = vmatpush.bf16.msra.mxu0 %v10219_v31 }
 0x3fc   :  { %v5562_v33 = vadd.f32 %v10863_v53, %v5549_v23  ;;  %v5679_v53 = vperm.slane %v5676_v1, 1 }
 0x3fe   :  { %v6011_v38 = vpop.f32.mrf.mxu0  ;;  %v5575_v5 = vadd.f32 %v10865_v43, %v5562_v33  ;;  %6247 = vmatpush.bf16.msra.mxu0 %v10218_v32 }
 0x3ff   :  { %v6012_v50 = vadd.f32 %v6011_v38, %v5678_v37 }
 0x400   :  { %v5588_v63 = vadd.f32 %v5587_v52, %v5575_v5  ;;  %v10226_v52 = vld [vmem:[#allocation14 + $0x50] sm:$0xff] }
 0x401   :  { %v5550_v4 = vpop.f32.mrf.mxu3  ;;  %6260 = vmatpush.bf16.msra.mxu1 %v10226_v52 }
 0x402   :  { %6248 = vmatpush.bf16.msra.mxu0 %v10217_v36  ;;  %v10250_v4 = vld [vmem:[#allocation16] ss:$0 sm:$0xff] }
 0x405   :  { %6261 = vmatpush.bf16.msra.mxu1 %v10225_v26 }
 0x406   :  { %v6013_v47 = vpop.f32.mrf.mxu0  ;;  %6249 = vmatpush.bf16.msra.mxu0 %v10216_v44 }
 0x409   :  { %6262 = vmatpush.bf16.msra.mxu1 %v10224_v56 }
 0x419   :  { %v5600_v35 = vpop.f32.mrf.mxu3 }
 0x41a   :  { %v5601_v9 = vadd.f32 %v5600_v35, %v5588_v63 }
 0x41c   :  { %v5607_v10 = vmax.f32 %v5601_v9, 0.0 }
 0x41e   :  { %v6063_v34 = vpop.f32.mrf.mxu0  ;;  %v5611_v19 = vpack.c.bf16 %v5607_v10, %v5607_v10  ;;  %v6024_v42 = vpop.f32.mrf.mxu1 }
 0x41f   :  { %v6025_v21 = vadd.f32 %v6024_v42, %v6012_v50  ;;  %v6064_v25 = vadd.f32 %v6063_v34, %v5679_v53 }
 0x420   :  { %6049 = vmatmul.bf16.vlgmr.msra.gmra.mxu3 %v5611_v19 }
 0x421   :  { %v5602_v17 = vpop.f32.mrf.mxu3 }
 0x426   :  { %v6065_v6 = vpop.f32.mrf.mxu0  ;;  %v6026_v11 = vpop.f32.mrf.mxu1 }
 0x42e   :  { %v6076_v48 = vpop.f32.mrf.mxu1 }
 0x42f   :  { %v6077_v43 = vadd.f32 %v6076_v48, %v6064_v25 }
 0x430   :  { %6101 = vmatmul.bf16.vlgmr.msrb.gmra.mxu3 %v5611_v19 }
 0x436   :  { %v6078_v22 = vpop.f32.mrf.mxu1 }
 0x463   :  { %v6037_v27 = vpop.f32.mrf.mxu2 }
 0x464   :  { %v6038_v57 = vadd.f32 %v6037_v27, %v6025_v21 }
 0x46b   :  { %v6039_v24 = vpop.f32.mrf.mxu2 }
 0x473   :  { %v6089_v15 = vpop.f32.mrf.mxu2 }
 0x474   :  { %v6090_v12 = vadd.f32 %v6089_v15, %v6077_v43 }
 0x47b   :  { %v6091_v40 = vpop.f32.mrf.mxu2 }
 0x4a3   :  { %v6050_v58 = vpop.f32.mrf.mxu3 }
 0x4a4   :  { %v6051_v54 = vadd.f32 %v6050_v58, %v6038_v57 }
 0x4a6   :  { %v6106_v59 = vmax.f32 %v6051_v54, 0.0 }
 0x4a8   :  { %v6108_v20 = vpack.c.bf16 %v6106_v59, %v6106_v59 }
 0x4aa   :  { %6250 = vmatmul.bf16.vlgmr.msra.gmra.mxu0 %v6108_v20 }
 0x4ab   :  { %v6052_v61 = vpop.f32.mrf.mxu3 }
 0x4b3   :  { %v6102_v62 = vpop.f32.mrf.mxu3 }
 0x4b4   :  { %v6103_v0 = vadd.f32 %v6102_v62, %v6090_v12 }
 0x4b6   :  { %v6107_v3 = vmax.f32 %v6103_v0, 0.0 }
 0x4b8   :  { %v6109_v18 = vpack.c.bf16 %v6107_v3, %v6107_v3 }
 0x4ba   :  { %6263 = vmatmul.bf16.vlgmr.msra.gmra.mxu1 %v6109_v18 }
 0x4bb   :  { %v6104_v55 = vpop.f32.mrf.mxu3 }
 0x527   :  { %v6251_v49 = vpop.f32.mrf.mxu0 }
 0x528   :  { %v6252_v60 = vadd.f32 %v10250_v4, %v6251_v49 }
 0x52f   :  { %v6253_v41 = vpop.f32.mrf.mxu0 }
 0x537   :  { %v6264_v38 = vpop.f32.mrf.mxu1 }
 0x538   :  { %v6265_v8 = vadd.f32 %v6264_v38, %v6252_v60 }
 0x53a   :  { %6268 = vmax.xlane.f32.xlu0 %v6265_v8 }
 0x53f   :  { %v6266_v13 = vpop.f32.mrf.mxu1 }
 0x5ad   :  { %v6269_v14 = vpop.xlane.xlu0 %6268 }
 0x5ae   :  { %v6270_v16 = vsub.f32 %v6265_v8, %v6269_v14 }
 0x5b0   :  { %v6271_v23 = vmul.f32 1.442695, %v6270_v16 }
 0x5b2   :  { %10251 = vpow2.f32 %v6271_v23 }
 0x5b8   :  { %v10252_v33 = vpop.eup %10251 }
 0x5b9   :  { %6273 = vadd.xlane.f32.xlu0 %v10252_v33 }
 0x62c   :  { %v6274_v47 = vpop.xlane.xlu0 %6273 }
 0x62d   :  { %10253 = vrcp.f32 %v6274_v47  ;;  %v6286_v35 = vand.u32 2147483648, %v6274_v47  ;;  %v6284_v10 = vand.u32 2147483647, %v6274_v47  ;;  %vm6280_vm1 = vweird.f32 %v6274_v47 }
 0x62f   :  { %v6287_v1 = vor.u32 1.1754944e-38, %v6286_v35  ;;  %vm6285_vm3 = vcmp.eq.f32.partialorder %v6284_v10, 8.507059e+37 }
 0x633   :  { %v10254_v5 = vpop.eup %10253 }
 0x634   :  { %v6276_v63 = vmul.f32 %v10254_v5, %v6274_v47  ;;  %vm6281_vm0 = vweird.f32 %v10254_v5 }
 0x635   :  { %vm6282_vm2 = vmor %vm6280_vm1, %vm6281_vm0 }
 0x636   :  { %v6277_v34 = vsub.f32 1.0, %v6276_v63 }
 0x638   :  { %v6278_v9 = vmul.f32 %v10254_v5, %v6277_v34 }
 0x63a   :  { %v6279_v19 = vadd.f32 %v10254_v5, %v6278_v9 }
 0x63c   :  { %v6283_v6 = vsel %vm6282_vm2, %v10254_v5, %v6279_v19 }
 0x63d   :  { %v6288_v17 = vsel %vm6285_vm3, %v6287_v1, %v6283_v6 }
 0x63e   :  { %v6289_v37 = vmul.f32 %v10252_v33, %v6288_v17 }
 0x640   :  { %6290 = vst [vmem:[#allocation17] sm:$0xff] %v6289_v37 }
 0x641   :  { %6301 = dma.vmem_to_hbm [thread:$0]  %s6297_s8, 128, %s6299_s13, [#allocation4]  }
 0x642   :  { %10508 = dma.done.wait [#allocation4], 128  }
 0x643   :  { %10509 = vsyncadd [#allocation4], 4294967168 }
 0x644   :  { %6306 = vsyncpa [#allocation3], 1 }
 0x645   :  { %6307 = vsyncpa [#allocation6], 1 }
 0x646   :  { %6308 = vsyncpa [#allocation9], 1 }
 0x647   :  { %6309 = vsyncpa [#allocation12], 1 }
 0x648   :  { %6310 = vsyncpa [#allocation15], 1 }
 0x649   :  { %6311 = vsyncpa [#allocation4], 1 }

</bundles_post_ra>
